<compile_context>
chip_gen: v7x
topology: tpu7x:2x2x1
jax: 0.10.0
libtpu: 0.0.40
codegen_flags: <defaults>
</compile_context>

<pallas_src>
import functools

import jax
import jax.numpy as jnp
from jax.experimental import pallas as pl
from jax.experimental.pallas import tpu as pltpu


def _round_up(v, m):
    return (v + m - 1) // m * m


def _pad_to(x, shape):
    pads = [(0, s - d) for d, s in zip(x.shape, shape)]
    return jnp.pad(x, pads)


def gin_kernel(eps_ref, x_ref, a_ref, wemb_ref, bemb_ref,
               w1_ref, b1_ref, w2_ref, b2_ref, wr_ref, br_ref,
               out_ref, ha_ref, hb_ref, *, last_phase):
    """grid = (phase, row_tile).

    phase 0           : h = X @ W_emb + b_emb                  (writes ha)
    phase p in [1, L] : z = (1+eps)*h + A @ h ; MLP ; relu     (ping-pong ha<->hb)
    phase L  (fused)  : out = h @ W_r + b_r
    """
    phase = pl.program_id(0)
    i = pl.program_id(1)
    tm = x_ref.shape[0]
    rows = pl.ds(pl.multiple_of(i * tm, tm), tm)

    # ---- phase 0: embedding ------------------------------------------------
    @pl.when(phase == 0)
    def _embed():
        h = jnp.dot(x_ref[...], wemb_ref[...],
                    preferred_element_type=jnp.float32) + bemb_ref[...]
        ha_ref[rows, :] = h.astype(jnp.bfloat16)

    # ---- generic GIN layer body (weights blocked on the layer axis) --------
    def layer_body(src_ref, dst_ref):
        layer = phase - 1
        # sum aggregation over weighted in-edges: A_rowtile @ h  (bf16 MXU, f32 acc)
        agg = jnp.dot(a_ref[...], src_ref[...],
                      preferred_element_type=jnp.float32)
        z = (1.0 + eps_ref[layer]) * src_ref[rows, :].astype(jnp.float32) + agg
        # apply_func MLP: Linear -> ReLU -> Linear
        z = jnp.dot(z.astype(jnp.bfloat16), w1_ref[0],
                    preferred_element_type=jnp.float32) + b1_ref[0]
        z = jnp.maximum(z, 0.0)
        z = jnp.dot(z.astype(jnp.bfloat16), w2_ref[0],
                    preferred_element_type=jnp.float32) + b2_ref[0]
        h_new = jnp.maximum(z, 0.0)          # F.relu in GIN.forward

        @pl.when(phase == last_phase)
        def _readout():
            out_ref[...] = (jnp.dot(h_new.astype(jnp.bfloat16), wr_ref[...],
                                    preferred_element_type=jnp.float32)
                            + br_ref[...]).astype(out_ref.dtype)

        @pl.when(phase < last_phase)
        def _store():
            dst_ref[rows, :] = h_new.astype(jnp.bfloat16)

    # Embedding (phase 0) writes ha. Odd layer phases read ha -> write hb;
    # even layer phases read hb -> write ha.
    @pl.when((phase >= 1) & (phase % 2 == 1))
    def _odd_layer():
        layer_body(ha_ref, hb_ref)

    @pl.when((phase >= 2) & (phase % 2 == 0))
    def _even_layer():
        layer_body(hb_ref, ha_ref)


def _est_vmem_bytes(tm, n_pad, in_pad, h_pad, out_pad):
    """Rough VMEM need: double-buffered blocks + resident bf16 h ping-pong."""
    db = 2  # BlockSpec double-buffering
    blocks = (tm * n_pad * 2          # A row tile (bf16)
              + tm * in_pad * 2       # X row tile (bf16)
              + in_pad * h_pad * 2    # W_emb
              + h_pad * 4             # b_emb
              + 2 * h_pad * h_pad * 2  # W1, W2 current-layer blocks
              + 2 * h_pad * 4         # b1, b2
              + h_pad * out_pad * 2   # W_r
              + out_pad * 4           # b_r
              + tm * out_pad * 4)     # output tile (f32)
    scratch = 2 * n_pad * h_pad * 2   # h ping-pong (bf16 only)
    return db * blocks + scratch


def _vmem_budget_bytes():
    try:
        cap = int(pltpu.get_tpu_info().vmem_capacity_bytes)
    except Exception:
        cap = 64 * 1024 * 1024        # conservative fallback (v7x physical per core)
    return (cap * 3) // 4             # leave headroom for compiler internals


def gin_forward(x, adj, params, *, lane=128):
    n, in_dim = x.shape
    hidden = params["wemb"].shape[1]
    out_dim = params["wr"].shape[1]
    num_layers = int(params["w1"].shape[0])
    assert num_layers >= 1

    n_pad = _round_up(n, lane)
    in_pad = _round_up(in_dim, lane)
    h_pad = _round_up(hidden, lane)
    out_pad = _round_up(out_dim, lane)

    # Pick the largest row tile that fits the VMEM budget.  tm == n_pad collapses
    # the tile axis (grid = (phases, 1)) and makes A fully VMEM-resident.
    budget = _vmem_budget_bytes()
    candidates = [n_pad] + [t for t in (512, 256, 128)
                            if t < n_pad and n_pad % t == 0]
    tm = candidates[-1]
    for cand in candidates:
        if _est_vmem_bytes(cand, n_pad, in_pad, h_pad, out_pad) <= budget:
            tm = cand
            break
    num_tiles = n_pad // tm
    a_resident = (tm == n_pad)

    num_phases = num_layers + 1          # embedding + L conv phases (readout fused)
    last_phase = num_phases - 1

    # Pad to lane-dense shapes; MXU operands in bf16, biases/eps in f32.
    x_p = _pad_to(x, (n_pad, in_pad)).astype(jnp.bfloat16)
    a_p = _pad_to(adj, (n_pad, n_pad)).astype(jnp.bfloat16)
    wemb_p = _pad_to(params["wemb"], (in_pad, h_pad)).astype(jnp.bfloat16)
    bemb_p = _pad_to(params["bemb"], (1, h_pad)).astype(jnp.float32)
    w1_p = _pad_to(params["w1"], (num_layers, h_pad, h_pad)).astype(jnp.bfloat16)
    b1_p = _pad_to(params["b1"], (num_layers, 1, h_pad)).astype(jnp.float32)
    w2_p = _pad_to(params["w2"], (num_layers, h_pad, h_pad)).astype(jnp.bfloat16)
    b2_p = _pad_to(params["b2"], (num_layers, 1, h_pad)).astype(jnp.float32)
    wr_p = _pad_to(params["wr"], (h_pad, out_pad)).astype(jnp.bfloat16)
    br_p = _pad_to(params["br"], (1, out_pad)).astype(jnp.float32)
    eps = params["eps"].astype(jnp.float32)

    # Index maps: stream A/X row tiles only in the phases that use them; pin the
    # block otherwise (same block on consecutive steps -> Pallas skips the DMA).
    # W1/b1/W2/b2 are blocked per layer on the leading axis.
    x_map = lambda p, i: (jnp.where(p == 0, i, 0), 0)
    a_map = lambda p, i: (jnp.where(p == 0, 0, i), 0)
    out_map = lambda p, i: (jnp.where(p == last_phase, i, 0), 0)
    layer_map3 = lambda p, i: (jnp.maximum(p - 1, 0), 0, 0)
    const2 = lambda p, i: (0, 0)

    in_specs = [
        pl.BlockSpec(memory_space=pltpu.MemorySpace.SMEM),      # eps    [L]
        pl.BlockSpec((tm, in_pad), x_map),                      # X      row tile
        pl.BlockSpec((tm, n_pad), a_map),                       # A      row tile (resident if tm == n_pad)
        pl.BlockSpec((in_pad, h_pad), const2),                  # W_emb
        pl.BlockSpec((1, h_pad), const2),                       # b_emb
        pl.BlockSpec((1, h_pad, h_pad), layer_map3),            # W1[layer]
        pl.BlockSpec((1, 1, h_pad), layer_map3),                # b1[layer]
        pl.BlockSpec((1, h_pad, h_pad), layer_map3),            # W2[layer]
        pl.BlockSpec((1, 1, h_pad), layer_map3),                # b2[layer]
        pl.BlockSpec((h_pad, out_pad), const2),                 # W_r
        pl.BlockSpec((1, out_pad), const2),                     # b_r
    ]
    out_spec = pl.BlockSpec((tm, out_pad), out_map)

    need = _est_vmem_bytes(tm, n_pad, in_pad, h_pad, out_pad)
    vmem_limit = int(min(budget, max(32 * 1024 * 1024,
                                     need + need // 4 + (2 << 20))))

    flops = int(2 * n_pad * in_pad * h_pad
                + num_layers * (2 * n_pad * n_pad * h_pad + 4 * n_pad * h_pad * h_pad)
                + 2 * n_pad * h_pad * out_pad)
    a_passes = 1 if a_resident else num_layers
    bytes_accessed = int(n_pad * in_pad * 2
                         + a_passes * n_pad * n_pad * 2
                         + (in_pad * h_pad + 2 * num_layers * h_pad * h_pad
                            + h_pad * out_pad) * 2
                         + (h_pad + 2 * num_layers * h_pad + out_pad) * 4
                         + n_pad * out_pad * 4)

    out_padded = pl.pallas_call(
        functools.partial(gin_kernel, last_phase=last_phase),
        grid=(num_phases, num_tiles),
        in_specs=in_specs,
        out_specs=out_spec,
        out_shape=jax.ShapeDtypeStruct((n_pad, out_pad), jnp.float32),
        scratch_shapes=[
            pltpu.VMEM((n_pad, h_pad), jnp.bfloat16),   # h ping-pong slot A
            pltpu.VMEM((n_pad, h_pad), jnp.bfloat16),   # h ping-pong slot B
        ],
        compiler_params=pltpu.CompilerParams(
            # Row-tile axis must stay 'arbitrary': every layer phase reads the
            # full h written by all tiles of the previous phase (per-core scratch).
            dimension_semantics=("arbitrary", "arbitrary"),
            vmem_limit_bytes=vmem_limit,
        ),
        cost_estimate=pl.CostEstimate(flops=flops, transcendentals=0,
                                      bytes_accessed=bytes_accessed),
    )(eps, x_p, a_p, wemb_p, bemb_p, w1_p, b1_p, w2_p, b2_p, wr_p, br_p)

    return out_padded[:n, :out_dim]


def gin_reference(x, adj, params):
    """Plain-JAX f32 reference of the same forward pass (for verification)."""
    h = x @ params["wemb"] + params["bemb"]
    for l in range(params["w1"].shape[0]):
        z = (1.0 + params["eps"][l]) * h + adj @ h
        z = jnp.maximum(z @ params["w1"][l] + params["b1"][l], 0.0)
        z = z @ params["w2"][l] + params["b2"][l]
        h = jnp.maximum(z, 0.0)
    return h @ params["wr"] + params["br"]


def init_params(key, in_dim, hidden_dim, out_dim, num_layers):
    keys = jax.random.split(key, 8)
    scale = 0.1
    return {
        "wemb": scale * jax.random.normal(keys[0], (in_dim, hidden_dim), jnp.float32),
        "bemb": scale * jax.random.normal(keys[1], (1, hidden_dim), jnp.float32),
        "w1":   scale * jax.random.normal(keys[2], (num_layers, hidden_dim, hidden_dim), jnp.float32),
        "b1":   scale * jax.random.normal(keys[3], (num_layers, 1, hidden_dim), jnp.float32),
        "w2":   scale * jax.random.normal(keys[4], (num_layers, hidden_dim, hidden_dim), jnp.float32),
        "b2":   scale * jax.random.normal(keys[5], (num_layers, 1, hidden_dim), jnp.float32),
        "wr":   scale * jax.random.normal(keys[6], (hidden_dim, out_dim), jnp.float32),
        "br":   scale * jax.random.normal(keys[7], (1, out_dim), jnp.float32),
        # DGL GINConv default: init_eps=0, learn_eps=False
        "eps":  jnp.zeros((num_layers,), jnp.float32),
    }


if __name__ == "__main__":
    N, IN_DIM, HIDDEN, OUT_DIM, NUM_LAYERS = 200, 16, 32, 8, 2

    key = jax.random.PRNGKey(0)
    k_feat, k_adj_mask, k_adj_w, k_params = jax.random.split(key, 4)

    # Node features.
    features = jax.random.normal(k_feat, (N, IN_DIM), jnp.float32)

    # Dense weighted adjacency: random sparse-ish graph with positive edge weights.
    mask = (jax.random.uniform(k_adj_mask, (N, N)) < 0.1).astype(jnp.float32)
    weights = jax.random.uniform(k_adj_w, (N, N), jnp.float32)
    adj = mask * weights  # adj[i, j] = weight of edge j -> i

    params = init_params(k_params, IN_DIM, HIDDEN, OUT_DIM, NUM_LAYERS)

    out = gin_forward(features, adj, params)
    out = jax.block_until_ready(out)

    ref = gin_reference(features, adj, params)
    assert out.shape == (N, OUT_DIM)
    # bf16 MXU inputs with f32 accumulation -> compare against the f32 reference
    # at a bf16-appropriate relative-error threshold.
    rel_err = float(jnp.linalg.norm(out - ref) / jnp.linalg.norm(ref))
    assert rel_err < 3e-2, f"Pallas output mismatch vs reference (rel_err={rel_err})"

    print("KERNEL_OK")
</pallas_src>

<mosaic_0001>
module attributes {stable_mosaic.version = 11 : i64} {
  func.func @gin_kernel(%arg0: i32, %arg1: i32, %arg2: memref<2xf32, #tpu.memory_space<smem>>, %arg3: memref<256x128xbf16, #tpu.memory_space<vmem>>, %arg4: memref<256x256xbf16, #tpu.memory_space<vmem>>, %arg5: memref<128x128xbf16, #tpu.memory_space<vmem>>, %arg6: memref<1x128xf32, #tpu.memory_space<vmem>>, %arg7: memref<1x128x128xbf16, #tpu.memory_space<vmem>>, %arg8: memref<1x1x128xf32, #tpu.memory_space<vmem>>, %arg9: memref<1x128x128xbf16, #tpu.memory_space<vmem>>, %arg10: memref<1x1x128xf32, #tpu.memory_space<vmem>>, %arg11: memref<128x128xbf16, #tpu.memory_space<vmem>>, %arg12: memref<1x128xf32, #tpu.memory_space<vmem>>, %arg13: memref<256x128xf32, #tpu.memory_space<vmem>>, %arg14: memref<256x128xbf16, #tpu.memory_space<vmem>>, %arg15: memref<256x128xbf16, #tpu.memory_space<vmem>>) attributes {dimension_semantics = [#tpu.dimension_semantics<arbitrary>, #tpu.dimension_semantics<arbitrary>], iteration_bounds = array<i64: 3, 1>, scalar_prefetch = 0 : i64, scratch_operands = 2 : i64, tpu.core_type = #tpu.core_type<tc>, window_params = [{transform_indices = @transform_0, window_bounds = array<i64: 2>}, {transform_indices = @transform_1, window_bounds = array<i64: 256, 128>}, {transform_indices = @transform_2, window_bounds = array<i64: 256, 256>}, {pipeline_mode = #tpu.pipeline_mode<synchronous>, transform_indices = @transform_3, window_bounds = array<i64: 128, 128>}, {pipeline_mode = #tpu.pipeline_mode<synchronous>, transform_indices = @transform_4, window_bounds = array<i64: 1, 128>}, {transform_indices = @transform_5, window_bounds = array<i64: 1, 128, 128>}, {transform_indices = @transform_6, window_bounds = array<i64: 1, 1, 128>}, {transform_indices = @transform_7, window_bounds = array<i64: 1, 128, 128>}, {transform_indices = @transform_8, window_bounds = array<i64: 1, 1, 128>}, {pipeline_mode = #tpu.pipeline_mode<synchronous>, transform_indices = @transform_9, window_bounds = array<i64: 128, 128>}, {pipeline_mode = #tpu.pipeline_mode<synchronous>, transform_indices = @transform_10, window_bounds = array<i64: 1, 128>}, {transform_indices = @transform_11, window_bounds = array<i64: 256, 128>}]} {
    %c256_i32 = arith.constant 256 : i32
    %0 = arith.muli %arg1, %c256_i32 : i32
    %1 = tpu.assume_multiple %0, 256 : i32
    %c0_i32 = arith.constant 0 : i32
    %2 = arith.cmpi eq, %arg0, %c0_i32 : i32
    %3 = arith.extui %2 : i1 to i32
    %c0_i32_0 = arith.constant 0 : i32
    %4 = arith.cmpi ne, %3, %c0_i32_0 : i32
    scf.if %4 {
      %c0 = arith.constant 0 : index
      %c0_17 = arith.constant 0 : index
      %35 = vector.load %arg3[%c0, %c0_17] : memref<256x128xbf16, #tpu.memory_space<vmem>>, vector<256x128xbf16>
      %c0_18 = arith.constant 0 : index
      %c0_19 = arith.constant 0 : index
      %36 = vector.load %arg5[%c0_18, %c0_19] : memref<128x128xbf16, #tpu.memory_space<vmem>>, vector<128x128xbf16>
      %cst = arith.constant dense<0.000000e+00> : vector<256x128xf32>
      %37 = tpu.matmul %35, %36, %cst {dimension_numbers = #tpu.dot_dimension_numbers<[1], [0], [0], [1], [0, 0, 1, 1], [], []>} : vector<256x128xbf16>, vector<128x128xbf16>, vector<256x128xf32> -> vector<256x128xf32>
      %c0_20 = arith.constant 0 : index
      %c0_21 = arith.constant 0 : index
      %38 = vector.load %arg6[%c0_20, %c0_21] : memref<1x128xf32, #tpu.memory_space<vmem>>, vector<1x128xf32>
      %39 = vector.broadcast %38 : vector<1x128xf32> to vector<256x128xf32>
      %40 = arith.addf %37, %39 : vector<256x128xf32>
      %41 = arith.truncf %40 : vector<256x128xf32> to vector<256x128xbf16>
      %42 = arith.index_cast %1 : i32 to index
      %c0_22 = arith.constant 0 : index
      %43 = vector.load %arg14[%42, %c0_22] : memref<256x128xbf16, #tpu.memory_space<vmem>>, vector<256x128xbf16>
      tpu.vector_store %arg14[%42, %c0_22], %41 {strides = array<i32>} : memref<256x128xbf16, #tpu.memory_space<vmem>>, vector<256x128xbf16>,
    } else {
    }
    %c1_i32 = arith.constant 1 : i32
    %5 = arith.cmpi sge, %arg0, %c1_i32 : i32
    %c2_i32 = arith.constant 2 : i32
    %c0_i32_1 = arith.constant 0 : i32
    %6 = arith.cmpi eq, %c2_i32, %c0_i32_1 : i32
    %c1_i32_2 = arith.constant 1 : i32
    %7 = arith.select %6, %c1_i32_2, %c2_i32 : i32
    %8 = arith.remsi %arg0, %7 : i32
    %c0_i32_3 = arith.constant 0 : i32
    %9 = arith.cmpi ne, %8, %c0_i32_3 : i32
    %c0_i32_4 = arith.constant 0 : i32
    %10 = arith.cmpi slt, %8, %c0_i32_4 : i32
    %c0_i32_5 = arith.constant 0 : i32
    %11 = arith.cmpi slt, %7, %c0_i32_5 : i32
    %12 = arith.xori %10, %11 : i1
    %13 = arith.andi %12, %9 : i1
    %14 = arith.addi %8, %7 : i32
    %15 = arith.select %13, %14, %8 : i32
    %c1_i32_6 = arith.constant 1 : i32
    %16 = arith.cmpi eq, %15, %c1_i32_6 : i32
    %17 = arith.andi %5, %16 : i1
    %18 = arith.extui %17 : i1 to i32
    %c0_i32_7 = arith.constant 0 : i32
    %19 = arith.cmpi ne, %18, %c0_i32_7 : i32
    scf.if %19 {
      %c1_i32_17 = arith.constant 1 : i32
      %35 = arith.subi %arg0, %c1_i32_17 : i32
      %c0 = arith.constant 0 : index
      %c0_18 = arith.constant 0 : index
      %36 = vector.load %arg4[%c0, %c0_18] : memref<256x256xbf16, #tpu.memory_space<vmem>>, vector<256x256xbf16>
      %c0_19 = arith.constant 0 : index
      %c0_20 = arith.constant 0 : index
      %37 = vector.load %arg14[%c0_19, %c0_20] : memref<256x128xbf16, #tpu.memory_space<vmem>>, vector<256x128xbf16>
      %cst = arith.constant dense<0.000000e+00> : vector<256x128xf32>
      %38 = tpu.matmul %36, %37, %cst {dimension_numbers = #tpu.dot_dimension_numbers<[1], [0], [0], [1], [0, 0, 1, 1], [], []>} : vector<256x256xbf16>, vector<256x128xbf16>, vector<256x128xf32> -> vector<256x128xf32>
      %39 = arith.index_cast %35 : i32 to index
      %40 = memref.load %arg2[%39] : memref<2xf32, #tpu.memory_space<smem>>
      %cst_21 = arith.constant 1.000000e+00 : f32
      %41 = arith.addf %cst_21, %40 : f32
      %42 = arith.index_cast %1 : i32 to index
      %c0_22 = arith.constant 0 : index
      %43 = vector.load %arg14[%42, %c0_22] : memref<256x128xbf16, #tpu.memory_space<vmem>>, vector<256x128xbf16>
      %44 = arith.extf %43 : vector<256x128xbf16> to vector<256x128xf32>
      %45 = vector.broadcast %41 : f32 to vector<256x128xf32>
      %46 = arith.mulf %45, %44 : vector<256x128xf32>
      %47 = arith.addf %46, %38 : vector<256x128xf32>
      %48 = arith.truncf %47 : vector<256x128xf32> to vector<256x128xbf16>
      %c0_23 = arith.constant 0 : index
      %c0_24 = arith.constant 0 : index
      %c0_25 = arith.constant 0 : index
      %49 = vector.load %arg7[%c0_23, %c0_24, %c0_25] : memref<1x128x128xbf16, #tpu.memory_space<vmem>>, vector<1x128x128xbf16>
      %50 = vector.shape_cast %49 : vector<1x128x128xbf16> to vector<128x128xbf16>
      %cst_26 = arith.constant dense<0.000000e+00> : vector<256x128xf32>
      %51 = tpu.matmul %48, %50, %cst_26 {dimension_numbers = #tpu.dot_dimension_numbers<[1], [0], [0], [1], [0, 0, 1, 1], [], []>} : vector<256x128xbf16>, vector<128x128xbf16>, vector<256x128xf32> -> vector<256x128xf32>
      %c0_27 = arith.constant 0 : index
      %c0_28 = arith.constant 0 : index
      %c0_29 = arith.constant 0 : index
      %52 = vector.load %arg8[%c0_27, %c0_28, %c0_29] : memref<1x1x128xf32, #tpu.memory_space<vmem>>, vector<1x1x128xf32>
      %53 = vector.shape_cast %52 : vector<1x1x128xf32> to vector<1x128xf32>
      %54 = vector.broadcast %53 : vector<1x128xf32> to vector<256x128xf32>
      %55 = arith.addf %51, %54 : vector<256x128xf32>
      %cst_30 = arith.constant 0.000000e+00 : f32
      %56 = vector.broadcast %cst_30 : f32 to vector<256x128xf32>
      %57 = arith.maximumf %55, %56 : vector<256x128xf32>
      %58 = arith.truncf %57 : vector<256x128xf32> to vector<256x128xbf16>
      %c0_31 = arith.constant 0 : index
      %c0_32 = arith.constant 0 : index
      %c0_33 = arith.constant 0 : index
      %59 = vector.load %arg9[%c0_31, %c0_32, %c0_33] : memref<1x128x128xbf16, #tpu.memory_space<vmem>>, vector<1x128x128xbf16>
      %60 = vector.shape_cast %59 : vector<1x128x128xbf16> to vector<128x128xbf16>
      %cst_34 = arith.constant dense<0.000000e+00> : vector<256x128xf32>
      %61 = tpu.matmul %58, %60, %cst_34 {dimension_numbers = #tpu.dot_dimension_numbers<[1], [0], [0], [1], [0, 0, 1, 1], [], []>} : vector<256x128xbf16>, vector<128x128xbf16>, vector<256x128xf32> -> vector<256x128xf32>
      %c0_35 = arith.constant 0 : index
      %c0_36 = arith.constant 0 : index
      %c0_37 = arith.constant 0 : index
      %62 = vector.load %arg10[%c0_35, %c0_36, %c0_37] : memref<1x1x128xf32, #tpu.memory_space<vmem>>, vector<1x1x128xf32>
      %63 = vector.shape_cast %62 : vector<1x1x128xf32> to vector<1x128xf32>
      %64 = vector.broadcast %63 : vector<1x128xf32> to vector<256x128xf32>
      %65 = arith.addf %61, %64 : vector<256x128xf32>
      %cst_38 = arith.constant 0.000000e+00 : f32
      %66 = vector.broadcast %cst_38 : f32 to vector<256x128xf32>
      %67 = arith.maximumf %65, %66 : vector<256x128xf32>
      %c2_i32_39 = arith.constant 2 : i32
      %68 = arith.cmpi eq, %arg0, %c2_i32_39 : i32
      %69 = arith.extui %68 : i1 to i32
      %c0_i32_40 = arith.constant 0 : i32
      %70 = arith.cmpi ne, %69, %c0_i32_40 : i32
      scf.if %70 {
        %74 = arith.truncf %67 : vector<256x128xf32> to vector<256x128xbf16>
        %c0_43 = arith.constant 0 : index
        %c0_44 = arith.constant 0 : index
        %75 = vector.load %arg11[%c0_43, %c0_44] : memref<128x128xbf16, #tpu.memory_space<vmem>>, vector<128x128xbf16>
        %cst_45 = arith.constant dense<0.000000e+00> : vector<256x128xf32>
        %76 = tpu.matmul %74, %75, %cst_45 {dimension_numbers = #tpu.dot_dimension_numbers<[1], [0], [0], [1], [0, 0, 1, 1], [], []>} : vector<256x128xbf16>, vector<128x128xbf16>, vector<256x128xf32> -> vector<256x128xf32>
        %c0_46 = arith.constant 0 : index
        %c0_47 = arith.constant 0 : index
        %77 = vector.load %arg12[%c0_46, %c0_47] : memref<1x128xf32, #tpu.memory_space<vmem>>, vector<1x128xf32>
        %78 = vector.broadcast %77 : vector<1x128xf32> to vector<256x128xf32>
        %79 = arith.addf %76, %78 : vector<256x128xf32>
        %c0_48 = arith.constant 0 : index
        %c0_49 = arith.constant 0 : index
        %80 = vector.load %arg13[%c0_48, %c0_49] : memref<256x128xf32, #tpu.memory_space<vmem>>, vector<256x128xf32>
        tpu.vector_store %arg13[%c0_48, %c0_49], %79 {strides = array<i32>} : memref<256x128xf32, #tpu.memory_space<vmem>>, vector<256x128xf32>,
      } else {
      }
      %c2_i32_41 = arith.constant 2 : i32
      %71 = arith.cmpi slt, %arg0, %c2_i32_41 : i32
      %72 = arith.extui %71 : i1 to i32
      %c0_i32_42 = arith.constant 0 : i32
      %73 = arith.cmpi ne, %72, %c0_i32_42 : i32
      scf.if %73 {
        %74 = arith.truncf %67 : vector<256x128xf32> to vector<256x128xbf16>
        %75 = arith.index_cast %1 : i32 to index
        %c0_43 = arith.constant 0 : index
        %76 = vector.load %arg15[%75, %c0_43] : memref<256x128xbf16, #tpu.memory_space<vmem>>, vector<256x128xbf16>
        tpu.vector_store %arg15[%75, %c0_43], %74 {strides = array<i32>} : memref<256x128xbf16, #tpu.memory_space<vmem>>, vector<256x128xbf16>,
      } else {
      }
    } else {
    }
    %c2_i32_8 = arith.constant 2 : i32
    %20 = arith.cmpi sge, %arg0, %c2_i32_8 : i32
    %c2_i32_9 = arith.constant 2 : i32
    %c0_i32_10 = arith.constant 0 : i32
    %21 = arith.cmpi eq, %c2_i32_9, %c0_i32_10 : i32
    %c1_i32_11 = arith.constant 1 : i32
    %22 = arith.select %21, %c1_i32_11, %c2_i32_9 : i32
    %23 = arith.remsi %arg0, %22 : i32
    %c0_i32_12 = arith.constant 0 : i32
    %24 = arith.cmpi ne, %23, %c0_i32_12 : i32
    %c0_i32_13 = arith.constant 0 : i32
    %25 = arith.cmpi slt, %23, %c0_i32_13 : i32
    %c0_i32_14 = arith.constant 0 : i32
    %26 = arith.cmpi slt, %22, %c0_i32_14 : i32
    %27 = arith.xori %25, %26 : i1
    %28 = arith.andi %27, %24 : i1
    %29 = arith.addi %23, %22 : i32
    %30 = arith.select %28, %29, %23 : i32
    %c0_i32_15 = arith.constant 0 : i32
    %31 = arith.cmpi eq, %30, %c0_i32_15 : i32
    %32 = arith.andi %20, %31 : i1
    %33 = arith.extui %32 : i1 to i32
    %c0_i32_16 = arith.constant 0 : i32
    %34 = arith.cmpi ne, %33, %c0_i32_16 : i32
    scf.if %34 {
      %c1_i32_17 = arith.constant 1 : i32
      %35 = arith.subi %arg0, %c1_i32_17 : i32
      %c0 = arith.constant 0 : index
      %c0_18 = arith.constant 0 : index
      %36 = vector.load %arg4[%c0, %c0_18] : memref<256x256xbf16, #tpu.memory_space<vmem>>, vector<256x256xbf16>
      %c0_19 = arith.constant 0 : index
      %c0_20 = arith.constant 0 : index
      %37 = vector.load %arg15[%c0_19, %c0_20] : memref<256x128xbf16, #tpu.memory_space<vmem>>, vector<256x128xbf16>
      %cst = arith.constant dense<0.000000e+00> : vector<256x128xf32>
      %38 = tpu.matmul %36, %37, %cst {dimension_numbers = #tpu.dot_dimension_numbers<[1], [0], [0], [1], [0, 0, 1, 1], [], []>} : vector<256x256xbf16>, vector<256x128xbf16>, vector<256x128xf32> -> vector<256x128xf32>
      %39 = arith.index_cast %35 : i32 to index
      %40 = memref.load %arg2[%39] : memref<2xf32, #tpu.memory_space<smem>>
      %cst_21 = arith.constant 1.000000e+00 : f32
      %41 = arith.addf %cst_21, %40 : f32
      %42 = arith.index_cast %1 : i32 to index
      %c0_22 = arith.constant 0 : index
      %43 = vector.load %arg15[%42, %c0_22] : memref<256x128xbf16, #tpu.memory_space<vmem>>, vector<256x128xbf16>
      %44 = arith.extf %43 : vector<256x128xbf16> to vector<256x128xf32>
      %45 = vector.broadcast %41 : f32 to vector<256x128xf32>
      %46 = arith.mulf %45, %44 : vector<256x128xf32>
      %47 = arith.addf %46, %38 : vector<256x128xf32>
      %48 = arith.truncf %47 : vector<256x128xf32> to vector<256x128xbf16>
      %c0_23 = arith.constant 0 : index
      %c0_24 = arith.constant 0 : index
      %c0_25 = arith.constant 0 : index
      %49 = vector.load %arg7[%c0_23, %c0_24, %c0_25] : memref<1x128x128xbf16, #tpu.memory_space<vmem>>, vector<1x128x128xbf16>
      %50 = vector.shape_cast %49 : vector<1x128x128xbf16> to vector<128x128xbf16>
      %cst_26 = arith.constant dense<0.000000e+00> : vector<256x128xf32>
      %51 = tpu.matmul %48, %50, %cst_26 {dimension_numbers = #tpu.dot_dimension_numbers<[1], [0], [0], [1], [0, 0, 1, 1], [], []>} : vector<256x128xbf16>, vector<128x128xbf16>, vector<256x128xf32> -> vector<256x128xf32>
      %c0_27 = arith.constant 0 : index
      %c0_28 = arith.constant 0 : index
      %c0_29 = arith.constant 0 : index
      %52 = vector.load %arg8[%c0_27, %c0_28, %c0_29] : memref<1x1x128xf32, #tpu.memory_space<vmem>>, vector<1x1x128xf32>
      %53 = vector.shape_cast %52 : vector<1x1x128xf32> to vector<1x128xf32>
      %54 = vector.broadcast %53 : vector<1x128xf32> to vector<256x128xf32>
      %55 = arith.addf %51, %54 : vector<256x128xf32>
      %cst_30 = arith.constant 0.000000e+00 : f32
      %56 = vector.broadcast %cst_30 : f32 to vector<256x128xf32>
      %57 = arith.maximumf %55, %56 : vector<256x128xf32>
      %58 = arith.truncf %57 : vector<256x128xf32> to vector<256x128xbf16>
      %c0_31 = arith.constant 0 : index
      %c0_32 = arith.constant 0 : index
      %c0_33 = arith.constant 0 : index
      %59 = vector.load %arg9[%c0_31, %c0_32, %c0_33] : memref<1x128x128xbf16, #tpu.memory_space<vmem>>, vector<1x128x128xbf16>
      %60 = vector.shape_cast %59 : vector<1x128x128xbf16> to vector<128x128xbf16>
      %cst_34 = arith.constant dense<0.000000e+00> : vector<256x128xf32>
      %61 = tpu.matmul %58, %60, %cst_34 {dimension_numbers = #tpu.dot_dimension_numbers<[1], [0], [0], [1], [0, 0, 1, 1], [], []>} : vector<256x128xbf16>, vector<128x128xbf16>, vector<256x128xf32> -> vector<256x128xf32>
      %c0_35 = arith.constant 0 : index
      %c0_36 = arith.constant 0 : index
      %c0_37 = arith.constant 0 : index
      %62 = vector.load %arg10[%c0_35, %c0_36, %c0_37] : memref<1x1x128xf32, #tpu.memory_space<vmem>>, vector<1x1x128xf32>
      %63 = vector.shape_cast %62 : vector<1x1x128xf32> to vector<1x128xf32>
      %64 = vector.broadcast %63 : vector<1x128xf32> to vector<256x128xf32>
      %65 = arith.addf %61, %64 : vector<256x128xf32>
      %cst_38 = arith.constant 0.000000e+00 : f32
      %66 = vector.broadcast %cst_38 : f32 to vector<256x128xf32>
      %67 = arith.maximumf %65, %66 : vector<256x128xf32>
      %c2_i32_39 = arith.constant 2 : i32
      %68 = arith.cmpi eq, %arg0, %c2_i32_39 : i32
      %69 = arith.extui %68 : i1 to i32
      %c0_i32_40 = arith.constant 0 : i32
      %70 = arith.cmpi ne, %69, %c0_i32_40 : i32
      scf.if %70 {
        %74 = arith.truncf %67 : vector<256x128xf32> to vector<256x128xbf16>
        %c0_43 = arith.constant 0 : index
        %c0_44 = arith.constant 0 : index
        %75 = vector.load %arg11[%c0_43, %c0_44] : memref<128x128xbf16, #tpu.memory_space<vmem>>, vector<128x128xbf16>
        %cst_45 = arith.constant dense<0.000000e+00> : vector<256x128xf32>
        %76 = tpu.matmul %74, %75, %cst_45 {dimension_numbers = #tpu.dot_dimension_numbers<[1], [0], [0], [1], [0, 0, 1, 1], [], []>} : vector<256x128xbf16>, vector<128x128xbf16>, vector<256x128xf32> -> vector<256x128xf32>
        %c0_46 = arith.constant 0 : index
        %c0_47 = arith.constant 0 : index
        %77 = vector.load %arg12[%c0_46, %c0_47] : memref<1x128xf32, #tpu.memory_space<vmem>>, vector<1x128xf32>
        %78 = vector.broadcast %77 : vector<1x128xf32> to vector<256x128xf32>
        %79 = arith.addf %76, %78 : vector<256x128xf32>
        %c0_48 = arith.constant 0 : index
        %c0_49 = arith.constant 0 : index
        %80 = vector.load %arg13[%c0_48, %c0_49] : memref<256x128xf32, #tpu.memory_space<vmem>>, vector<256x128xf32>
        tpu.vector_store %arg13[%c0_48, %c0_49], %79 {strides = array<i32>} : memref<256x128xf32, #tpu.memory_space<vmem>>, vector<256x128xf32>,
      } else {
      }
      %c2_i32_41 = arith.constant 2 : i32
      %71 = arith.cmpi slt, %arg0, %c2_i32_41 : i32
      %72 = arith.extui %71 : i1 to i32
      %c0_i32_42 = arith.constant 0 : i32
      %73 = arith.cmpi ne, %72, %c0_i32_42 : i32
      scf.if %73 {
        %74 = arith.truncf %67 : vector<256x128xf32> to vector<256x128xbf16>
        %75 = arith.index_cast %1 : i32 to index
        %c0_43 = arith.constant 0 : index
        %76 = vector.load %arg14[%75, %c0_43] : memref<256x128xbf16, #tpu.memory_space<vmem>>, vector<256x128xbf16>
        tpu.vector_store %arg14[%75, %c0_43], %74 {strides = array<i32>} : memref<256x128xbf16, #tpu.memory_space<vmem>>, vector<256x128xbf16>,
      } else {
      }
    } else {
    }
    return
  }
  func.func @transform_0(%arg0: i32, %arg1: i32) -> i32 {
    %c0_i32 = arith.constant 0 : i32
    %c0_i32_0 = arith.constant 0 : i32
    return %c0_i32 : i32
  }
  func.func @transform_1(%arg0: i32, %arg1: i32) -> (i32, i32) {
    %c0_i32 = arith.constant 0 : i32
    %0 = arith.cmpi eq, %arg0, %c0_i32 : i32
    %c0_i32_0 = arith.constant 0 : i32
    %1 = arith.select %0, %arg1, %c0_i32_0 : i32
    %c0_i32_1 = arith.constant 0 : i32
    %c0_i32_2 = arith.constant 0 : i32
    return %1, %c0_i32_1 : i32, i32
  }
  func.func @transform_2(%arg0: i32, %arg1: i32) -> (i32, i32) {
    %c0_i32 = arith.constant 0 : i32
    %0 = arith.cmpi eq, %arg0, %c0_i32 : i32
    %c0_i32_0 = arith.constant 0 : i32
    %1 = arith.select %0, %c0_i32_0, %arg1 : i32
    %c0_i32_1 = arith.constant 0 : i32
    %c0_i32_2 = arith.constant 0 : i32
    return %1, %c0_i32_1 : i32, i32
  }
  func.func @transform_3(%arg0: i32, %arg1: i32) -> (i32, i32) {
    %c0_i32 = arith.constant 0 : i32
    %c0_i32_0 = arith.constant 0 : i32
    %c0_i32_1 = arith.constant 0 : i32
    return %c0_i32, %c0_i32_0 : i32, i32
  }
  func.func @transform_4(%arg0: i32, %arg1: i32) -> (i32, i32) {
    %c0_i32 = arith.constant 0 : i32
    %c0_i32_0 = arith.constant 0 : i32
    %c0_i32_1 = arith.constant 0 : i32
    return %c0_i32, %c0_i32_0 : i32, i32
  }
  func.func @transform_5(%arg0: i32, %arg1: i32) -> (i32, i32, i32) {
    %c1_i32 = arith.constant 1 : i32
    %0 = arith.subi %arg0, %c1_i32 : i32
    %c0_i32 = arith.constant 0 : i32
    %1 = arith.maxsi %0, %c0_i32 : i32
    %c0_i32_0 = arith.constant 0 : i32
    %c0_i32_1 = arith.constant 0 : i32
    %c0_i32_2 = arith.constant 0 : i32
    return %1, %c0_i32_0, %c0_i32_1 : i32, i32, i32
  }
  func.func @transform_6(%arg0: i32, %arg1: i32) -> (i32, i32, i32) {
    %c1_i32 = arith.constant 1 : i32
    %0 = arith.subi %arg0, %c1_i32 : i32
    %c0_i32 = arith.constant 0 : i32
    %1 = arith.maxsi %0, %c0_i32 : i32
    %c0_i32_0 = arith.constant 0 : i32
    %c0_i32_1 = arith.constant 0 : i32
    %c0_i32_2 = arith.constant 0 : i32
    return %1, %c0_i32_0, %c0_i32_1 : i32, i32, i32
  }
  func.func @transform_7(%arg0: i32, %arg1: i32) -> (i32, i32, i32) {
    %c1_i32 = arith.constant 1 : i32
    %0 = arith.subi %arg0, %c1_i32 : i32
    %c0_i32 = arith.constant 0 : i32
    %1 = arith.maxsi %0, %c0_i32 : i32
    %c0_i32_0 = arith.constant 0 : i32
    %c0_i32_1 = arith.constant 0 : i32
    %c0_i32_2 = arith.constant 0 : i32
    return %1, %c0_i32_0, %c0_i32_1 : i32, i32, i32
  }
  func.func @transform_8(%arg0: i32, %arg1: i32) -> (i32, i32, i32) {
    %c1_i32 = arith.constant 1 : i32
    %0 = arith.subi %arg0, %c1_i32 : i32
    %c0_i32 = arith.constant 0 : i32
    %1 = arith.maxsi %0, %c0_i32 : i32
    %c0_i32_0 = arith.constant 0 : i32
    %c0_i32_1 = arith.constant 0 : i32
    %c0_i32_2 = arith.constant 0 : i32
    return %1, %c0_i32_0, %c0_i32_1 : i32, i32, i32
  }
  func.func @transform_9(%arg0: i32, %arg1: i32) -> (i32, i32) {
    %c0_i32 = arith.constant 0 : i32
    %c0_i32_0 = arith.constant 0 : i32
    %c0_i32_1 = arith.constant 0 : i32
    return %c0_i32, %c0_i32_0 : i32, i32
  }
  func.func @transform_10(%arg0: i32, %arg1: i32) -> (i32, i32) {
    %c0_i32 = arith.constant 0 : i32
    %c0_i32_0 = arith.constant 0 : i32
    %c0_i32_1 = arith.constant 0 : i32
    return %c0_i32, %c0_i32_0 : i32, i32
  }
  func.func @transform_11(%arg0: i32, %arg1: i32) -> (i32, i32) {
    %c2_i32 = arith.constant 2 : i32
    %0 = arith.cmpi eq, %arg0, %c2_i32 : i32
    %c0_i32 = arith.constant 0 : i32
    %1 = arith.select %0, %arg1, %c0_i32 : i32
    %c0_i32_0 = arith.constant 0 : i32
    %c0_i32_1 = arith.constant 0 : i32
    return %1, %c0_i32_0 : i32, i32
  }
}

</mosaic_0001>

<bundles_post_ra>
// kernel: tpu_custom_call.1
= control target key start
LH: loop header
LB: loop body
LE: loop exit
PB: predicated region body
PF: predicated region fallthrough
CT: control target
= control target key end

     0   :  { %s7074_s0 = inlined_call_operand.hbm [shape: f32[2], index: 0, kind: input, shape index: {}]   ;;  %s7075_s1 = inlined_call_operand.hbm [shape: bf16[256,128], index: 1, kind: input, shape index: {}]   ;;  %s7076_s2 = inlined_call_operand.hbm [shape: bf16[256,256], index: 2, kind: input, shape index: {}]   ;;  %s7077_s3 = inlined_call_operand.hbm [shape: bf16[128,128], index: 3, kind: input, shape index: {}]   ;;  %s7078_s4 = inlined_call_operand.vmem [shape: f32[1,128], index: 4, kind: input, shape index: {}]   ;;  %s7079_s5 = inlined_call_operand.hbm [shape: bf16[2,128,128], index: 5, kind: input, shape index: {}]   ;;  %s7080_s6 = inlined_call_operand.vmem [shape: f32[2,1,128], index: 6, kind: input, shape index: {}]   ;;  %s7081_s7 = inlined_call_operand.hbm [shape: bf16[2,128,128], index: 7, kind: input, shape index: {}]   ;;  %s7082_s8 = inlined_call_operand.vmem [shape: f32[2,1,128], index: 8, kind: input, shape index: {}]   ;;  %s7083_s9 = inlined_call_operand.hbm [shape: bf16[128,128], index: 9, kind: input, shape index: {}]   ;;  %s7084_s10 = inlined_call_operand.vmem [shape: f32[1,128], index: 10, kind: input, shape index: {}]   ;;  %s7085_s11 = inlined_call_operand.hbm [shape: f32[256,128], index: 11, kind: output, shape index: {}]  }
   0x1   :  { %7124 = sst [smem:[#allocation29_spill]] %s7077_s3 }
   0x2   :  { %7125 = sst [smem:[#allocation30_spill]] %s7078_s4 }
   0x3   :  { %7126 = sst [smem:[#allocation31_spill]] %s7079_s5 }
   0x4   :  { %7127 = sst [smem:[#allocation32_spill]] %s7080_s6 }
   0x5   :  { %7128 = sst [smem:[#allocation33_spill]] %s7082_s8 }
   0x6   :  { %7129 = sst [smem:[#allocation34_spill]] %s7084_s10 }
   0x7   :  { %7130 = sst [smem:[#allocation35_spill]] %s7085_s11 }
   0x8   :  { %16 = vsyncpa [#allocation7], 0 }
   0x9   :  { %17 = vsyncpa [#allocation5], 0 }
   0xa   :  { %19 = vsyncpa [#allocation5 + $0x1], 0 }
   0xb   :  { %20 = vsyncpa [#allocation10], 0 }
   0xc   :  { %22 = vsyncpa [#allocation10 + $0x1], 0 }
   0xd   :  { %23 = vsyncpa [#allocation13], 0 }
   0xe   :  { %25 = vsyncpa [#allocation13 + $0x1], 0 }
   0xf   :  { %26 = vsyncpa [#allocation16], 0 }
  0x10   :  { %27 = vsyncpa [#allocation6], 0 }
  0x11   :  { %29 = vsyncpa [#allocation6 + $0x1], 0  ;;  %s5727_s17 = smov 0   ;;  %s5729_s18 = smov 0  }
  0x12   :  { %s5731_s19 = smov 0   ;;  %s5733_s20 = smov 0  }
  0x13   :  { %s5735_s21 = smov 0   ;;  %s5737_s22 = smov 0  }
  0x14 LB: > { %7131 = sst [smem:[#allocation25_spill]] %s5639_s19  ;;  %s5756_s23 = sadd.s32 4294967295, %s5651_s22   ;;  %s5651_s22 = sphi %s5737_s22, %s35_s22   ;;  %s5647_s21 = sphi %s5735_s21, %s7219_s21   ;;  %s5643_s20 = sphi %s5733_s20, %s7218_s20   ;;  %s5639_s19 = sphi %s5731_s19, %s7217_s19   ;;  %s5635_s18 = sphi %s5729_s18, %s7221_s18   ;;  %s5631_s17 = sphi %s5727_s17, %s7220_s17  }
  0x15   : > { %7132 = sst [smem:[#allocation26_spill]] %s5647_s21  ;;  %p196_p0 = scmp.ne.s32.totalorder %s5635_s18, %s5631_s17 }
  0x16   : > { %p7086_p1 = scmp.eq.s32.totalorder %s5756_s23, 0  ;;  %p4095_p2 = scmp.ge.s32.totalorder %s5651_s22, 1 }
  0x17   : > { %p375_p3 = scmp.lt.s32.totalorder %s5651_s22, 4  ;;  %s5653_s27 = smov [#allocation11]  }
  0x18   : > { %p5765_p4 = por %p7086_p1, %p196_p0  ;;  %s396_s28 = sshll.u32 %s5653_s27, 4  ;;  %s397_s28 = int_to_ptr.vmem [resolvable:$true] %s396_s28 }
  0x19   : > { %p5769_p5 = pnand %p4095_p2, %p375_p3  ;;  %s7136_s3 = sld [smem:[#allocation29_spill]] }
  0x1a   : > { %s7133_s25 = scalar_select %p5765_p4, 1, 0 }
  0x1b   : > { %s7134_s26 = scalar_select %p5769_p5, 1, 0 }
  0x1c   : > { %p5097_p6 = pneg %p5769_p5 }
  0x1e   : > { %p5777_p7 = pnand %p5097_p6, %p7086_p1 }
  0x1f   : > { %s5366_s13 = scalar_lea.hbm %s7136_s3, 1024 }
  0x20   : > { %s7135_s29 = scalar_select %p5777_p7, 1, 0 }
  0x21   : > { %p5367_p8 = scmp.ne.s32.totalorder %s7136_s3, %s5366_s13  ;;  %p5789_p9 = pneg %p5777_p7 }
  0x22   : > { %p5373_p12 = scmp.lt.u32.totalorder %s5366_s13, %s7136_s3 }
  0x23   : > { %p5369_p10 = pnand %p5789_p9, %p5367_p8 }
  0x25   : > { %p5370_p11 = pneg %p5369_p10 }
  0x27   : > { %p5375_p13 = pnand %p5373_p12, %p5370_p11 }
  0x29   : > { %5378 = shalt.err (!%p5375_p13)
}
  0x2a   : > { %s5379_s30 = scalar_lea.vmem %s397_s28, 1024  ;;  %p5387_p6 = scmp.lt.s32.totalorder %s397_s28, %s397_s28 }
  0x2b   : > { %p5380_p0 = scmp.ne.s32.totalorder %s397_s28, %s5379_s30  ;;  %p5388_p1 = scmp.lt.s32.totalorder %s5379_s30, %s5379_s30 }
  0x2d   : > { %p5382_p2 = pnand %p5380_p0, %p5789_p9  ;;  %p5389_p4 = por %p5388_p1, %p5387_p6 }
  0x2f   : > { %p5383_p3 = pneg %p5382_p2 }
  0x31   : > { %p5390_p5 = pnand %p5389_p4, %p5383_p3 }
  0x33   : > { %5393 = shalt.err (!%p5390_p5)
}
  0x34   : > { %s7089_s12 = smov 64   ;;  %s7091_s13 = smov 4  }
  0x35   : > { %5103 = dma.hbm_to_vmem [thread:$0]  (!%p5777_p7), %s7136_s3, 1024, %s397_s28, [#allocation10], %s7089_s12, %s7089_s12, %s7091_s13  }
  0x36   : > { %s47_s17 = sadd.s32 1, %s5647_s21  ;;  %s4087_s27 = sadd.s32 4294967295, %s5647_s21 }
  0x37   : > { %p49_p1 = scmp.ge.s32.totalorder %s47_s17, 3  ;;  %p175_p4 = scmp.gt.s32.totalorder %s4087_s27, 0 }
  0x38   : > { %s183_s30 = sadd.s32 1, %s5639_s19  ;;  %p190_p5 = scmp.ne.s32.totalorder %s5639_s19, %s5635_s18 }
  0x39   : > { %s7223_s17 = smov (%p49_p1, %s47_s17), 0  ;;  %s7225_s27 = smov (!%p175_p4, %s4087_s27), 0 }
  0x3a   : > { %7138 = sst [smem:[#allocation27_spill]] %s7223_s17  ;;  %s4088_s24 = sadd.s32 4294967295, %s7223_s17 }
  0x3b   : > { %p178_p8 = scmp.gt.s32.totalorder %s4088_s24, 0  ;;  %p7098_p10 = scmp.eq.s32.totalorder %s5651_s22, 0 }
  0x3c   : > { %p7097_p11 = scmp.lt.s32.totalorder %s5651_s22, 3  ;;  %s478_s15 = sand.u32 1, %s5639_s19  }
  0x3d   : > { %s7227_s24 = smov (!%p178_p8, %s4088_s24), 0  ;;  %p192_p12 = por %p7098_p10, %p190_p5 }
  0x3e   : > { %s180_s28 = ssub.s32 %s7225_s27, %s7227_s24  ;;  %s4102_s12 = sshll.u32 %s478_s15, 6 }
  0x3f   : > { %p181_p13 = scmp.eq.s32.totalorder %s180_s28, 0  ;;  %s4287_s13 = sshll.u32 %s7225_s27, 10 }
  0x40   : > { %s7140_s5 = sld [smem:[#allocation31_spill]]  ;;  %s480_s14 = scalar_lea.vmem [#allocation12], %s4102_s12 }
  0x41   : > { %s5823_s3 = scalar_select %p181_p13, %s5639_s19, %s183_s30  }
  0x42   : > { %s490_s10 = sshll.u32 %s480_s14, 4  ;;  %p5834_p0 = pnand %p7097_p11, %p192_p12  ;;  %s5830_s10 = int_to_ptr.vmem [resolvable:$true] %s490_s10 }
  0x43   : > { %7139 = sst [smem:[#allocation28_spill]] %s5823_s3  ;;  %s5841_s11 = scalar_lea.hbm %s7081_s7, %s4287_s13 }
  0x44   : > { %s7141_s24 = scalar_select %p5834_p0, 1, 0 }
  0x45   : > { %s516_s21 = scalar_lea.vmem [#allocation14], %s4102_s12  ;;  %s7142_s15 = sand.u32 1, %s5651_s22  }
  0x46   : > { %s5828_s17 = scalar_lea.hbm %s7140_s5, %s4287_s13  ;;  %s5843_s28 = sshll.u32 %s516_s21, 4  ;;  %s5879_s28 = int_to_ptr.vmem [resolvable:$true] %s5843_s28 }
  0x47   : > { %s5847_s14 = scalar_lea.sflag [#allocation13], %s7142_s15  ;;  %s5394_s3 = scalar_lea.hbm %s5828_s17, 1024 }
  0x48   : > { %p5395_p2 = scmp.ne.s32.totalorder %s5828_s17, %s5394_s3  ;;  %p7101_p3 = pneg %p5834_p0 }
  0x49   : > { %s5399_s30 = scalar_lea.hbm %s7140_s5, 2048  ;;  %p5400_p4 = scmp.lt.u32.totalorder %s5828_s17, %s7140_s5 }
  0x4a   : > { %p5397_p6 = pnand %p7101_p3, %p5395_p2  ;;  %p5401_p5 = scmp.lt.u32.totalorder %s5399_s30, %s5394_s3 }
  0x4b   : > { %p5403_p12 = scmp.lt.u32.totalorder %s5394_s3, %s5828_s17 }
  0x4c   : > { %p5398_p1 = pneg %p5397_p6  ;;  %p5402_p8 = por %p5401_p5, %p5400_p4 }
  0x4e   : > { %p5404_p13 = por %p5403_p12, %p5402_p8 }
  0x50   : > { %p5405_p11 = pnand %p5404_p13, %p5398_p1 }
  0x52   : > { %5408 = shalt.err (!%p5405_p11)
}
  0x53   : > { %s5409_s12 = scalar_lea.vmem %s5830_s10, 1024  ;;  %s5656_s19 = smov [#allocation12]  }
  0x54   : > { %p5410_p2 = scmp.ne.s32.totalorder %s5830_s10, %s5409_s12  ;;  %s5414_s21 = sshll.u32 %s5656_s19, 4  ;;  %s5415_s21 = int_to_ptr.vmem [resolvable:$false] %s5414_s21 }
  0x55   : > { %s5416_s4 = scalar_lea.vmem %s5415_s21, 2048  ;;  %p5417_p7 = scmp.lt.s32.totalorder %s5830_s10, %s5415_s21 }
  0x56   : > { %p5412_p6 = pnand %p5410_p2, %p7101_p3  ;;  %p5418_p4 = scmp.lt.s32.totalorder %s5416_s4, %s5409_s12 }
  0x58   : > { %p5413_p10 = pneg %p5412_p6  ;;  %p5419_p5 = por %p5418_p4, %p5417_p7 }
  0x5a   : > { %p5420_p8 = pnand %p5419_p5, %p5413_p10 }
  0x5c   : > { %5423 = shalt.err (!%p5420_p8)
}
  0x5d   : > { %s7143_s3 = smov 4   ;;  %s7144_s15 = smov 64  }
  0x5e   : > { %5116 = dma.hbm_to_vmem [thread:$0]  (!%p5834_p0), %s5828_s17, 1024, %s5830_s10, %s5847_s14, %s7144_s15, %s7144_s15, %s7143_s3  }
  0x5f   : > { %s5424_s13 = scalar_lea.hbm %s7074_s0, 16 }
  0x60   : > { %p5425_p7 = scmp.ne.s32.totalorder %s7074_s0, %s5424_s13  ;;  %p5431_p1 = scmp.lt.u32.totalorder %s5424_s13, %s7074_s0 }
  0x62   : > { %p5427_p10 = pnand %p5425_p7, %p5789_p9 }
  0x64   : > { %p5428_p11 = pneg %p5427_p10 }
  0x66   : > { %p5433_p12 = pnand %p5431_p1, %p5428_p11 }
  0x68   : > { %5436 = shalt.err (!%p5433_p12)
}
  0x69   : > { %s5657_s10 = smov [#allocation4]   ;;  %p7145_p13 = scmp.ne.s32.totalorder %s7135_s29, 0 }
  0x6a   : > { %s5658_s27 = smov [#allocation15]   ;;  %s5659_s12 = smov [#allocation8]  }
  0x6b   : > { %5100 = dma.hbm_to_smem (!%p7145_p13), %s7074_s0, 16, %s5657_s10, [#allocation7]  }
  0x6c   : > { %s412_s30 = sshll.u32 %s5658_s27, 4  ;;  %s442_s19 = sshll.u32 %s5659_s12, 4  ;;  %s413_s30 = int_to_ptr.vmem [resolvable:$true] %s412_s30  ;;  %s5897_s19 = int_to_ptr.vmem [resolvable:$true] %s442_s19 }
  0x6d   : > { %s5437_s13 = scalar_lea.hbm %s7083_s9, 1024 }
  0x6e   : > { %p5438_p2 = scmp.ne.s32.totalorder %s7083_s9, %s5437_s13  ;;  %p5444_p5 = scmp.lt.u32.totalorder %s5437_s13, %s7083_s9 }
  0x70   : > { %p5440_p6 = pnand %p5438_p2, %p5789_p9 }
  0x72   : > { %p5441_p4 = pneg %p5440_p6 }
  0x74   : > { %p5446_p8 = pnand %p5444_p5, %p5441_p4 }
  0x76   : > { %5449 = shalt.err (!%p5446_p8)
}
  0x77   : > { %s5450_s17 = scalar_lea.vmem %s413_s30, 1024  ;;  %p5458_p1 = scmp.lt.s32.totalorder %s413_s30, %s413_s30 }
  0x78   : > { %p5451_p7 = scmp.ne.s32.totalorder %s413_s30, %s5450_s17  ;;  %p5459_p12 = scmp.lt.s32.totalorder %s5450_s17, %s5450_s17 }
  0x7a   : > { %p5453_p10 = pnand %p5451_p7, %p5789_p9  ;;  %p5460_p3 = por %p5459_p12, %p5458_p1 }
  0x7c   : > { %p5454_p11 = pneg %p5453_p10 }
  0x7e   : > { %p5461_p0 = pnand %p5460_p3, %p5454_p11 }
  0x80   : > { %5464 = shalt.err (!%p5461_p0)
}
  0x81   : > { %5106 = dma.hbm_to_vmem [thread:$0]  (!%p7145_p13), %s7083_s9, 1024, %s413_s30, [#allocation16], %s7144_s15, %s7144_s15, %s7143_s3  }
  0x82   : > { %p7146_p2 = scmp.eq.s32.totalorder %s5651_s22, 0  ;;  %p7147_p6 = scmp.lt.s32.totalorder %s5651_s22, 3 }
  0x83   : > { %s5660_s27 = smov [#allocation9]   ;;  %s5465_s13 = scalar_lea.hbm %s7075_s1, 2048 }
  0x84   : > { %p5924_p9 = pnand %p7147_p6, %p7146_p2  ;;  %s466_s12 = sshll.u32 %s5660_s27, 4  ;;  %s467_s12 = int_to_ptr.vmem [resolvable:$true] %s466_s12 }
  0x85   : > { %p5466_p0 = scmp.ne.s32.totalorder %s7075_s1, %s5465_s13  ;;  %p5472_p5 = scmp.lt.u32.totalorder %s5465_s13, %s7075_s1 }
  0x86   : > { %p5467_p3 = pneg %p5924_p9 }
  0x88   : > { %p5468_p13 = pnand %p5467_p3, %p5466_p0 }
  0x8a   : > { %p5469_p4 = pneg %p5468_p13 }
  0x8c   : > { %p5474_p8 = pnand %p5472_p5, %p5469_p4 }
  0x8e   : > { %5477 = shalt.err (!%p5474_p8)
}
  0x8f   : > { %s5478_s17 = scalar_lea.vmem %s5897_s19, 2048  ;;  %s5485_s6 = scalar_lea.vmem %s5897_s19, 4096 }
  0x90   : > { %p5479_p7 = scmp.ne.s32.totalorder %s5897_s19, %s5478_s17  ;;  %p5486_p1 = scmp.lt.s32.totalorder %s5897_s19, %s5897_s19 }
  0x91   : > { %p5487_p12 = scmp.lt.s32.totalorder %s5485_s6, %s5478_s17 }
  0x92   : > { %p5481_p10 = pnand %p5479_p7, %p5467_p3 }
  0x93   : > { %p5488_p2 = por %p5487_p12, %p5486_p1 }
  0x94   : > { %p5482_p11 = pneg %p5481_p10 }
  0x96   : > { %p5489_p6 = pnand %p5488_p2, %p5482_p11 }
  0x98   : > { %5492 = shalt.err (!%p5489_p6)
}
  0x99   : > { %5110 = dma.hbm_to_vmem [thread:$0]  (!%p5924_p9), %s7075_s1, 2048, %s5897_s19, [#allocation5], %s7144_s15, %s7144_s15, %s7143_s3  }
  0x9a   : > { %s7149_s29 = sand.u32 1, %s5651_s22   ;;  %s5493_s5 = scalar_lea.hbm %s7076_s2, 4096 }
  0x9b   : > { %s453_s21 = scalar_lea.sflag [#allocation10], %s7149_s29  ;;  %p5494_p0 = scmp.ne.s32.totalorder %s7076_s2, %s5493_s5 }
  0x9c   : > { %p5500_p5 = scmp.lt.u32.totalorder %s5493_s5, %s7076_s2 }
  0x9d   : > { %p5496_p13 = pnand %p5494_p0, %p5467_p3 }
  0x9f   : > { %p5497_p4 = pneg %p5496_p13 }
  0xa1   : > { %p5502_p8 = pnand %p5500_p5, %p5497_p4 }
  0xa3   : > { %5505 = shalt.err (!%p5502_p8)
}
  0xa4   : > { %s5506_s19 = scalar_lea.vmem %s467_s12, 4096  ;;  %s5513_s8 = scalar_lea.vmem %s467_s12, 8192 }
  0xa5   : > { %p5507_p7 = scmp.ne.s32.totalorder %s467_s12, %s5506_s19  ;;  %p5514_p1 = scmp.lt.s32.totalorder %s467_s12, %s467_s12 }
  0xa6   : > { %p5515_p12 = scmp.lt.s32.totalorder %s5513_s8, %s5506_s19 }
  0xa7   : > { %p5509_p10 = pnand %p5507_p7, %p5467_p3 }
  0xa8   : > { %p5516_p2 = por %p5515_p12, %p5514_p1 }
  0xa9   : > { %p5510_p11 = pneg %p5509_p10 }
  0xab   : > { %p5517_p6 = pnand %p5516_p2, %p5510_p11 }
  0xad   : > { %5520 = shalt.err (!%p5517_p6)
}
  0xae   : > { %s5661_s27 = smov 128   ;;  %s5662_s29 = smov 8  }
  0xaf   : > { %5113 = dma.hbm_to_vmem [thread:$0]  (!%p5924_p9), %s7076_s2, 4096, %s467_s12, %s453_s21, %s5661_s27, %s5661_s27, %s5662_s29  }
  0xb0   : > { %s5521_s5 = scalar_lea.hbm %s5841_s11, 1024  ;;  %p7150_p0 = scmp.ne.s32.totalorder %s7141_s24, 0 }
  0xb1   : > { %p5522_p3 = scmp.ne.s32.totalorder %s5841_s11, %s5521_s5  ;;  %s5526_s17 = scalar_lea.hbm %s7081_s7, 2048 }
  0xb2   : > { %p7151_p13 = pneg %p7150_p0  ;;  %p5527_p8 = scmp.lt.u32.totalorder %s5841_s11, %s7081_s7 }
  0xb3   : > { %p5528_p7 = scmp.lt.u32.totalorder %s5526_s17, %s5521_s5  ;;  %p5530_p11 = scmp.lt.u32.totalorder %s5521_s5, %s5841_s11 }
  0xb4   : > { %p5524_p4 = pnand %p5522_p3, %p7151_p13 }
  0xb5   : > { %p5529_p10 = por %p5528_p7, %p5527_p8 }
  0xb6   : > { %p5525_p5 = pneg %p5524_p4 }
  0xb7   : > { %p5531_p1 = por %p5530_p11, %p5529_p10 }
  0xb9   : > { %p5532_p12 = pnand %p5531_p1, %p5525_p5 }
  0xbb   : > { %5535 = shalt.err (!%p5532_p12)
}
  0xbc   : > { %s5536_s16 = scalar_lea.vmem %s5879_s28, 1024  ;;  %p7152_p2 = pmov %p7151_p13 }
  0xbd   : > { %p5537_p9 = scmp.ne.s32.totalorder %s5879_s28, %s5536_s16  ;;  %s5663_s12 = smov [#allocation14]  }
  0xbe   : > { %s5541_s21 = sshll.u32 %s5663_s12, 4  ;;  %s5542_s21 = int_to_ptr.vmem [resolvable:$false] %s5541_s21 }
  0xbf   : > { %p5539_p6 = pnand %p5537_p9, %p7152_p2  ;;  %s5543_s8 = scalar_lea.vmem %s5542_s21, 2048 }
  0xc0   : > { %p5544_p13 = scmp.lt.s32.totalorder %s5879_s28, %s5542_s21  ;;  %p5545_p4 = scmp.lt.s32.totalorder %s5543_s8, %s5536_s16 }
  0xc1   : > { %p5540_p3 = pneg %p5539_p6 }
  0xc2   : > { %p5546_p8 = por %p5545_p4, %p5544_p13 }
  0xc4   : > { %p5547_p7 = pnand %p5546_p8, %p5540_p3 }
  0xc6   : > { %5550 = shalt.err (!%p5547_p7)
}
  0xc7   : > { %5119 = dma.hbm_to_vmem [thread:$0]  (!%p7150_p0), %s5841_s11, 1024, %s5879_s28, %s5847_s14, %s7144_s15, %s7144_s15, %s7143_s3  }
  0xc8   : > { %p7153_p5 = scmp.ne.s32.totalorder %s7134_s26, 0 }
  0xc9   : > { %p7154_p10 = scmp.eq.s32.totalorder (!%p7153_p5), %s5756_s23, 0 }
  0xca   : > { %550 = sbr.rel (%p7153_p5) target bundleno = 2747 (0xabb), region = 64 }
  0xd1   : > { %5602 = dma.done.wait (%p7154_p10), [#allocation7], 16   ;;  %p7155_p11 = pmov %p7154_p10 }
  0xd2   : > { %p7156_p1 = pmov %p7154_p10 }
  0xd3   : > { %5604 = vsyncadd (%p7155_p11), [#allocation7], 4294967280 }
  0xd4   : > { %5606 = dma.done.wait (%p7156_p1), [#allocation5], 2048   ;;  %p7157_p12 = pmov %p7156_p1 }
  0xd5   : > { %s565_s24 = sand.u32 1, %s5756_s23   ;;  %p7158_p0 = pmov %p7156_p1 }
  0xd6   : > { %5608 = vsyncadd (%p7157_p12), [#allocation5], 4294965248  ;;  %s566_s27 = scalar_lea.sflag [#allocation10], %s565_s24 }
  0xd7   : > { %5610 = dma.done.wait (%p7158_p0), %s566_s27, 4096   ;;  %p7159_p9 = pmov %p7158_p0 }
  0xd8   : > { %p7160_p2 = pmov %p7158_p0 }
  0xd9   : > { %5612 = vsyncadd (%p7159_p9), %s566_s27, 4294963200 }
  0xda   : > { %5614 = dma.done.wait (%p7160_p2), [#allocation10], 1024   ;;  %p7161_p6 = pmov %p7158_p0 }
  0xdb   : > { %s580_s26 = sand.u32 1, %s5635_s18   ;;  %s579_s28 = scalar_lea.sflag [#allocation13], %s565_s24 }
  0xdc   : > { %5616 = vsyncadd (%p7161_p6), [#allocation10], 4294966272  ;;  %s4115_s11 = sshll.u32 %s580_s26, 6  ;;  %p7162_p3 = scmp.ne.s32.totalorder %s7133_s25, 0 }
  0xdd   : > { %s6028_s14 = scalar_lea.vmem [#allocation12], %s4115_s11 }
  0xde   : > { %5618 = dma.done.wait (%p7162_p3), %s579_s28, 2048  }
  0xdf   : > { %5620 = vsyncadd (%p7162_p3), %s579_s28, 4294965248  ;;  %s6034_s3 = scalar_lea.vmem [#allocation14], %s4115_s11  ;;  %p7163_p13 = pmov %p7158_p0 }
  0xe0   : > { %p7164_p4 = pmov %p7158_p0 }
  0xe1   : > { %5622 = dma.done.wait (%p7163_p13), [#allocation16], 1024  }
  0xe2   : > { %5624 = vsyncadd (%p7164_p4), [#allocation16], 4294966272 }
  0xe3   : > { %600 = sfence }
  0xe4   : > { %s6041_s15 = sadd.s32 4294967295, %s5643_s20  ;;  %s7165_s4 = sld [smem:[#allocation32_spill]] }
  0xe5   : > { %p672_p8 = scmp.gt.s32.totalorder %s6041_s15, 0  ;;  %p4119_p7 = scmp.lt.s32.totalorder %s6041_s15, 1 }
  0xe6   : > { %s7166_s17 = sld [smem:[#allocation33_spill]]  ;;  %p4130_p5 = scmp.ne.s32.totalorder %s5643_s20, 0 }
  0xe7   : > { %s673_s29 = scalar_select %p672_p8, %s6041_s15, 0 }
  0xe8   : > { %700 = sbr.rel (%p4130_p5) target bundleno = 509 (0x1fd), region = 96  ;;  %v5198_v0 = vld [vmem:[#allocation11] sm:$0xff] (!%p4130_p5)   ;;  %v5199_v1 = vld [vmem:[#allocation11 + $0x8] sm:$0xff] (!%p4130_p5)   ;;  %v5200_v2 = vld [vmem:[#allocation11 + $0x10] sm:$0xff] (!%p4130_p5)   ;;  %s7167_s12 = sld [smem:[#allocation30_spill]] (!%p4130_p5) }
  0xe9   : > { %s7229_s29 = smov (!%p4119_p7, %s673_s29), 1  ;;  %4685 = vmatprep.subr.bf16.mxu0 (!%p4130_p5), %v5198_v0  ;;  %5021 = vmatprep.subr.bf16.mxu1 (!%p4130_p5), %v5198_v0  ;;  %v5201_v3 = vld [vmem:[#allocation11 + $0x18] sm:$0xff] (!%p4130_p5)   ;;  %v5206_v4 = vld [vmem:[#allocation8] sm:$0xff] (!%p4130_p5)   ;;  %v5203_v7 = vld [vmem:[#allocation11 + $0x28] sm:$0xff] (!%p4130_p5)  }
  0xea   : > { %s6049_s5 = scalar_lea.vmem %s7165_s4, %s7229_s29  ;;  %4686 = vmatpush3.bf16.msra.mxu0 (!%p4130_p5), %v5198_v0  ;;  %5029 = vmatpush3.bf16.msra.mxu1 (!%p4130_p5), %v5198_v0  ;;  %v5207_v5 = vld [vmem:[#allocation8 + $0x40] sm:$0xff] (!%p4130_p5)   ;;  %v5204_v8 = vld [vmem:[#allocation11 + $0x30] sm:$0xff] (!%p4130_p5)   ;;  %v5205_v9 = vld [vmem:[#allocation11 + $0x38] sm:$0xff] (!%p4130_p5)  }
  0xeb   : > { %4687 = vmatprep.subr.bf16.mxu0 (!%p4130_p5), %v5199_v1  ;;  %5022 = vmatprep.subr.bf16.mxu1 (!%p4130_p5), %v5199_v1  ;;  %v5202_v6 = vld [vmem:[#allocation11 + $0x20] sm:$0xff] (!%p4130_p5)   ;;  %v5208_v10 = vld [vmem:[#allocation8 + $0x8] sm:$0xff] (!%p4130_p5)   ;;  %v5210_v12 = vld [vmem:[#allocation8 + $0x10] sm:$0xff] (!%p4130_p5)  }
  0xec   : > { %s6054_s6 = scalar_lea.vmem %s7166_s17, %s7229_s29  ;;  %4701 = vmatprep.mubr.bf16.mxu0 (!%p4130_p5), %v5206_v4  ;;  %4717 = vmatprep.mubr.bf16.mxu1 (!%p4130_p5), %v5207_v5  ;;  %v5209_v11 = vld [vmem:[#allocation8 + $0x48] sm:$0xff] (!%p4130_p5)   ;;  %v5211_v13 = vld [vmem:[#allocation8 + $0x50] sm:$0xff] (!%p4130_p5)   ;;  %v5212_v14 = vld [vmem:[#allocation8 + $0x18] sm:$0xff] (!%p4130_p5)  }
  0xed   : > { %v5213_v15 = vld [vmem:[#allocation8 + $0x58] sm:$0xff] (!%p4130_p5)   ;;  %v5214_v16 = vld [vmem:[#allocation8 + $0x20] sm:$0xff] (!%p4130_p5)   ;;  %v5216_v18 = vld [vmem:[#allocation8 + $0x28] sm:$0xff] (!%p4130_p5)  }
  0xee   : > { %4688 = vmatpush3.bf16.msra.mxu0 (!%p4130_p5), %v5199_v1  ;;  %5030 = vmatpush3.bf16.msra.mxu1 (!%p4130_p5), %v5199_v1  ;;  %v5215_v17 = vld [vmem:[#allocation8 + $0x60] sm:$0xff] (!%p4130_p5)   ;;  %v5217_v19 = vld [vmem:[#allocation8 + $0x68] sm:$0xff] (!%p4130_p5)   ;;  %v5218_v20 = vld [vmem:[#allocation8 + $0x30] sm:$0xff] (!%p4130_p5)  }
  0xef   : > { %4689 = vmatprep.subr.bf16.mxu0 %v5200_v2  ;;  %5023 = vmatprep.subr.bf16.mxu1 %v5200_v2  ;;  %v5219_v21 = vld [vmem:[#allocation8 + $0x70] sm:$0xff]   ;;  %v5220_v22 = vld [vmem:[#allocation8 + $0x38] sm:$0xff]  }
  0xf0   : > { %v5221_v23 = vld [vmem:[#allocation8 + $0x78] sm:$0xff]   ;;  %v6060_v25 = vld [vmem:[%s7167_s12] ss:$0 sm:$0xff] }
  0xf2   : > { %4690 = vmatpush3.bf16.msra.mxu0 %v5200_v2  ;;  %5031 = vmatpush3.bf16.msra.mxu1 %v5200_v2 }
  0xf3   : > { %4691 = vmatprep.subr.bf16.mxu0 %v5201_v3  ;;  %5024 = vmatprep.subr.bf16.mxu1 %v5201_v3 }
  0xf6   : > { %4692 = vmatpush3.bf16.msra.mxu0 %v5201_v3  ;;  %5032 = vmatpush3.bf16.msra.mxu1 %v5201_v3 }
  0xf7   : > { %4693 = vmatprep.subr.bf16.mxu0 %v5202_v6  ;;  %5025 = vmatprep.subr.bf16.mxu1 %v5202_v6 }
  0xfa   : > { %4694 = vmatpush3.bf16.msra.mxu0 %v5202_v6  ;;  %5033 = vmatpush3.bf16.msra.mxu1 %v5202_v6 }
  0xfb   : > { %4695 = vmatprep.subr.bf16.mxu0 %v5203_v7  ;;  %5026 = vmatprep.subr.bf16.mxu1 %v5203_v7 }
  0xfe   : > { %4696 = vmatpush3.bf16.msra.mxu0 %v5203_v7  ;;  %5034 = vmatpush3.bf16.msra.mxu1 %v5203_v7 }
  0xff   : > { %4697 = vmatprep.subr.bf16.mxu0 %v5204_v8  ;;  %5027 = vmatprep.subr.bf16.mxu1 %v5204_v8 }
 0x102   : > { %4698 = vmatpush3.bf16.msra.mxu0 %v5204_v8  ;;  %5035 = vmatpush3.bf16.msra.mxu1 %v5204_v8 }
 0x103   : > { %4699 = vmatprep.subr.bf16.mxu0 %v5205_v9  ;;  %5028 = vmatprep.subr.bf16.mxu1 %v5205_v9 }
 0x106   : > { %4700 = vmatpush3.bf16.msra.mxu0 %v5205_v9  ;;  %5036 = vmatpush3.bf16.msra.mxu1 %v5205_v9 }
 0x109   : > { %4702 = vmatmul.mubr.bf16.vlgmr.msra.gmra.mrb[0].mxu0 %v5208_v10  ;;  %4718 = vmatmul.mubr.bf16.vlgmr.msra.gmra.mrb[0].mxu1 %v5209_v11 }
 0x10a   : > { %4705 = vmatprep.mubr.bf16.mxu0 %v5210_v12  ;;  %4721 = vmatprep.mubr.bf16.mxu1 %v5211_v13 }
 0x111   : > { %4706 = vmatmul.mubr.bf16.gmra.mrb[4].mxu0 %v5212_v14  ;;  %4722 = vmatmul.mubr.bf16.gmra.mrb[4].mxu1 %v5213_v15 }
 0x112   : > { %4709 = vmatprep.mubr.bf16.mxu0 %v5214_v16  ;;  %4725 = vmatprep.mubr.bf16.mxu1 %v5215_v17 }
 0x119   : > { %4710 = vmatmul.mubr.bf16.gmra.mrb[8].mxu0 %v5216_v18  ;;  %4726 = vmatmul.mubr.bf16.gmra.mrb[8].mxu1 %v5217_v19 }
 0x11a   : > { %4713 = vmatprep.mubr.bf16.mxu0 %v5218_v20  ;;  %4729 = vmatprep.mubr.bf16.mxu1 %v5219_v21 }
 0x121   : > { %4714 = vmatmul.mubr.bf16.gmra.mrb[12].mxu0 %v5220_v22  ;;  %4730 = vmatmul.mubr.bf16.gmra.mrb[12].mxu1 %v5221_v23 }
 0x1dc   : > { %v4703_v24 = vpop.f32.mrb[0].mxu0  ;;  %v4719_v26 = vpop.f32.mrb[0].mxu1 }
 0x1dd   : > { %v934_v27 = vpop.f32.mrb[1].mxu0  ;;  %v998_v28 = vpop.f32.mrb[1].mxu1  ;;  %v943_v31 = vadd.f32 %v4703_v24, %v6060_v25  ;;  %v1007_v32 = vadd.f32 %v4719_v26, %v6060_v25 }
 0x1de   : > { %v4704_v29 = vpop.f32.mrb[2].mxu0  ;;  %v4720_v30 = vpop.f32.mrb[2].mxu1  ;;  %v935_v37 = vadd.f32 %v6060_v25, %v934_v27  ;;  %v999_v38 = vadd.f32 %v6060_v25, %v998_v28 }
 0x1df   : > { %v946_v33 = vadd.f32 %v4704_v29, %v6060_v25  ;;  %v1010_v34 = vadd.f32 %v4720_v30, %v6060_v25  ;;  %v937_v35 = vpop.f32.mrb[3].mxu0  ;;  %v1001_v36 = vpop.f32.mrb[3].mxu1 }
 0x1e0   : > { %v938_v39 = vadd.f32 %v6060_v25, %v937_v35  ;;  %v1002_v40 = vadd.f32 %v6060_v25, %v1001_v36 }
 0x1e1   : > { %v1062_v41 = vpack.c.bf16 %v946_v33, %v943_v31  ;;  %v1070_v42 = vpack.c.bf16 %v1010_v34, %v1007_v32 }
 0x1e2   : > { %v1061_v43 = vpack.c.bf16 %v938_v39, %v935_v37  ;;  %v1069_v44 = vpack.c.bf16 %v1002_v40, %v999_v38 }
 0x1e3   : > { %1082 = vst [vmem:[#allocation2 + $0x8] sm:$0xff] %v1062_v41  ;;  %1090 = vst [vmem:[#allocation2 + $0x48] sm:$0xff] %v1070_v42 }
 0x1e4   : > { %1081 = vst [vmem:[#allocation2] sm:$0xff] %v1061_v43  ;;  %1089 = vst [vmem:[#allocation2 + $0x40] sm:$0xff] %v1069_v44  ;;  %v4707_v45 = vpop.f32.mrb[4].mxu0  ;;  %v4723_v46 = vpop.f32.mrb[4].mxu1 }
 0x1e5   : > { %v950_v47 = vpop.f32.mrb[5].mxu0  ;;  %v1014_v48 = vpop.f32.mrb[5].mxu1  ;;  %v959_v51 = vadd.f32 %v4707_v45, %v6060_v25  ;;  %v1023_v52 = vadd.f32 %v4723_v46, %v6060_v25 }
 0x1e6   : > { %v4708_v49 = vpop.f32.mrb[6].mxu0  ;;  %v4724_v50 = vpop.f32.mrb[6].mxu1  ;;  %v951_v57 = vadd.f32 %v6060_v25, %v950_v47  ;;  %v1015_v58 = vadd.f32 %v6060_v25, %v1014_v48 }
 0x1e7   : > { %v962_v53 = vadd.f32 %v4708_v49, %v6060_v25  ;;  %v1026_v54 = vadd.f32 %v4724_v50, %v6060_v25  ;;  %v953_v55 = vpop.f32.mrb[7].mxu0  ;;  %v1017_v56 = vpop.f32.mrb[7].mxu1 }
 0x1e8   : > { %v954_v59 = vadd.f32 %v6060_v25, %v953_v55  ;;  %v1018_v60 = vadd.f32 %v6060_v25, %v1017_v56 }
 0x1e9   : > { %v1064_v61 = vpack.c.bf16 %v962_v53, %v959_v51  ;;  %v1072_v62 = vpack.c.bf16 %v1026_v54, %v1023_v52 }
 0x1ea   : > { %v1063_v63 = vpack.c.bf16 %v954_v59, %v951_v57  ;;  %v1071_v0 = vpack.c.bf16 %v1018_v60, %v1015_v58 }
 0x1eb   : > { %1084 = vst [vmem:[#allocation2 + $0x18] sm:$0xff] %v1064_v61  ;;  %1092 = vst [vmem:[#allocation2 + $0x58] sm:$0xff] %v1072_v62 }
 0x1ec   : > { %1083 = vst [vmem:[#allocation2 + $0x10] sm:$0xff] %v1063_v63  ;;  %1091 = vst [vmem:[#allocation2 + $0x50] sm:$0xff] %v1071_v0  ;;  %v4711_v1 = vpop.f32.mrb[8].mxu0  ;;  %v4727_v2 = vpop.f32.mrb[8].mxu1 }
 0x1ed   : > { %v966_v3 = vpop.f32.mrb[9].mxu0  ;;  %v1030_v4 = vpop.f32.mrb[9].mxu1  ;;  %v975_v7 = vadd.f32 %v4711_v1, %v6060_v25  ;;  %v1039_v8 = vadd.f32 %v4727_v2, %v6060_v25 }
 0x1ee   : > { %v4712_v5 = vpop.f32.mrb[10].mxu0  ;;  %v4728_v6 = vpop.f32.mrb[10].mxu1  ;;  %v967_v13 = vadd.f32 %v6060_v25, %v966_v3  ;;  %v1031_v14 = vadd.f32 %v6060_v25, %v1030_v4 }
 0x1ef   : > { %v978_v9 = vadd.f32 %v4712_v5, %v6060_v25  ;;  %v1042_v10 = vadd.f32 %v4728_v6, %v6060_v25  ;;  %v969_v11 = vpop.f32.mrb[11].mxu0  ;;  %v1033_v12 = vpop.f32.mrb[11].mxu1 }
 0x1f0   : > { %v970_v15 = vadd.f32 %v6060_v25, %v969_v11  ;;  %v1034_v16 = vadd.f32 %v6060_v25, %v1033_v12 }
 0x1f1   : > { %v1066_v17 = vpack.c.bf16 %v978_v9, %v975_v7  ;;  %v1074_v18 = vpack.c.bf16 %v1042_v10, %v1039_v8 }
 0x1f2   : > { %v1065_v19 = vpack.c.bf16 %v970_v15, %v967_v13  ;;  %v1073_v20 = vpack.c.bf16 %v1034_v16, %v1031_v14 }
 0x1f3   : > { %1086 = vst [vmem:[#allocation2 + $0x28] sm:$0xff] %v1066_v17  ;;  %1094 = vst [vmem:[#allocation2 + $0x68] sm:$0xff] %v1074_v18 }
 0x1f4   : > { %1085 = vst [vmem:[#allocation2 + $0x20] sm:$0xff] %v1065_v19  ;;  %1093 = vst [vmem:[#allocation2 + $0x60] sm:$0xff] %v1073_v20  ;;  %v4715_v21 = vpop.f32.mrb[12].mxu0  ;;  %v4731_v22 = vpop.f32.mrb[12].mxu1 }
 0x1f5   : > { %v982_v23 = vpop.f32.mrb[13].mxu0  ;;  %v1046_v24 = vpop.f32.mrb[13].mxu1  ;;  %v991_v28 = vadd.f32 %v4715_v21, %v6060_v25  ;;  %v1055_v29 = vadd.f32 %v4731_v22, %v6060_v25 }
 0x1f6   : > { %v4716_v26 = vpop.f32.mrb[14].mxu0  ;;  %v4732_v27 = vpop.f32.mrb[14].mxu1  ;;  %v983_v34 = vadd.f32 %v6060_v25, %v982_v23  ;;  %v1047_v35 = vadd.f32 %v6060_v25, %v1046_v24 }
 0x1f7   : > { %v994_v30 = vadd.f32 %v4716_v26, %v6060_v25  ;;  %v1058_v31 = vadd.f32 %v4732_v27, %v6060_v25  ;;  %v985_v32 = vpop.f32.mrb[15].mxu0  ;;  %v1049_v33 = vpop.f32.mrb[15].mxu1 }
 0x1f8   : > { %v986_v36 = vadd.f32 %v6060_v25, %v985_v32  ;;  %v1050_v37 = vadd.f32 %v6060_v25, %v1049_v33 }
 0x1f9   : > { %v1068_v38 = vpack.c.bf16 %v994_v30, %v991_v28  ;;  %v1076_v39 = vpack.c.bf16 %v1058_v31, %v1055_v29 }
 0x1fa   : > { %v1067_v40 = vpack.c.bf16 %v986_v36, %v983_v34  ;;  %v1075_v41 = vpack.c.bf16 %v1050_v37, %v1047_v35 }
 0x1fb   : > { %1088 = vst [vmem:[#allocation2 + $0x38] sm:$0xff] %v1068_v38  ;;  %1096 = vst [vmem:[#allocation2 + $0x78] sm:$0xff] %v1076_v39 }
 0x1fc   : > { %1087 = vst [vmem:[#allocation2 + $0x30] sm:$0xff] %v1067_v40  ;;  %1095 = vst [vmem:[#allocation2 + $0x70] sm:$0xff] %v1075_v41 }
 0x1fd PF: > { %p1098_p10 = scmp.lt.s32.totalorder %s5643_s20, 0  ;;  %s1099_s21 = ssub.s32 0, %s5643_s20 }
 0x1fe   : > { %s4156_s8 = smin.u32 %s5643_s20, %s1099_s21  ;;  %p1097_p1 = scmp.ge.s32.totalorder %s5643_s20, 1 }
 0x1ff   : > { %s1101_s24 = sand.u32 1, %s4156_s8  }
 0x200   : > { %s1102_s27 = ssub.s32 0, %s1101_s24 }
 0x201   : > { %s7231_s27 = smov (!%p1098_p10, %s1102_s27), %s1101_s24 }
 0x202   : > { %p4158_p11 = scmp.lt.s32.totalorder %s7231_s27, 0  ;;  %s1108_s26 = sadd.s32 2, %s7231_s27 }
 0x204   : > { %s7233_s26 = smov (!%p4158_p11, %s1108_s26), %s7231_s27 }
 0x205   : > { %p1110_p12 = scmp.eq.s32.totalorder %s7233_s26, 1 }
 0x207   : > { %p1111_p0 = pnand %p1110_p12, %p1097_p1 }
 0x208   : > { %v6101_v25 = vld [vmem:[#allocation2 + $0x40] sm:$0xff] (!%p1111_p0)  ;;  %v6105_v43 = vld [vmem:[#allocation2 + $0x48] sm:$0xff] (!%p1111_p0)  ;;  %v6112_v45 = vld [vmem:[#allocation2 + $0x50] sm:$0xff] (!%p1111_p0)  ;;  %s1485_s11 = sld [smem:[#allocation4 + %s6041_s15]] (!%p1111_p0)  ;;  %p4210_p9 = scmp.ne.s32.totalorder (!%p1111_p0), %s5643_s20, 2 }
 0x209   : > { %1114 = sbr.rel (%p1111_p0) target bundleno = 1617 (0x651), region = 100  ;;  %v6103_v42 = vld [vmem:[#allocation2] sm:$0xff] (!%p1111_p0)  ;;  %4317 = vmatprep.subr.bf16.mxu0 (!%p1111_p0), %v6101_v25  ;;  %v6110_v44 = vld [vmem:[#allocation2 + $0x8] sm:$0xff] (!%p1111_p0)  ;;  %v6116_v47 = vld [vmem:[#allocation2 + $0x10] sm:$0xff] (!%p1111_p0) }
 0x20a   : > { %4318 = vmatpush3.bf16.msra.mxu0 (!%p1111_p0), %v6103_v42  ;;  %v5224_v46 = vld [vmem:[#allocation9 + $0x4] ss:$8 sps:$4 sm:$0xff] (!%p1111_p0)   ;;  %v6118_v48 = vld [vmem:[#allocation2 + $0x58] sm:$0xff] (!%p1111_p0)  ;;  %v6136_v54 = vld [vmem:[#allocation2 + $0x70] sm:$0xff] (!%p1111_p0)  ;;  %v1507_v34 = vunpack.c.l.bf16 (!%p1111_p0), %v6103_v42  ;;  %v1508_v35 = vunpack.c.h.bf16 (!%p1111_p0), %v6103_v42  ;;  %v1510_v42 = vunpack.c.h.bf16 (!%p1111_p0), %v6110_v44 }
 0x20b   : > { %4319 = vmatprep.subr.bf16.mxu0 (!%p1111_p0), %v6105_v43  ;;  %1356 = vmatprep.mubr.bf16.mxu0 (!%p1111_p0), %v5224_v46  ;;  %v6122_v49 = vld [vmem:[#allocation2 + $0x18] sm:$0xff] (!%p1111_p0)  ;;  %v6124_v50 = vld [vmem:[#allocation2 + $0x60] sm:$0xff] (!%p1111_p0)  ;;  %v6130_v52 = vld [vmem:[#allocation2 + $0x68] sm:$0xff] (!%p1111_p0) }
 0x20c   : > { %v6128_v51 = vld [vmem:[#allocation2 + $0x20] sm:$0xff] (!%p1111_p0)  ;;  %v6134_v53 = vld [vmem:[#allocation2 + $0x28] sm:$0xff] (!%p1111_p0)  ;;  %v6140_v55 = vld [vmem:[#allocation2 + $0x30] sm:$0xff] (!%p1111_p0) }
 0x20d   : > { %v6142_v56 = vld [vmem:[#allocation2 + $0x78] sm:$0xff] (!%p1111_p0)  ;;  %v5222_v58 = vld [vmem:[#allocation9] ss:$8 sps:$4 sm:$0xff] (!%p1111_p0)   ;;  %v5272_v62 = vld [vmem:[%s6028_s14 + $0x10] sm:$0xff] (!%p1111_p0)  }
 0x20e   : > { %4320 = vmatpush3.bf16.msra.mxu0 (!%p1111_p0), %v6110_v44  ;;  %v6145_v57 = vld [vmem:[#allocation2 + $0x38] sm:$0xff] (!%p1111_p0)  ;;  %v5270_v59 = vld [vmem:[%s6028_s14] sm:$0xff] (!%p1111_p0)   ;;  %v5271_v60 = vld [vmem:[%s6028_s14 + $0x8] sm:$0xff] (!%p1111_p0)   ;;  %s1486_s28 = sadd.f32 (!%p1111_p0), 1.0, %s1485_s11 }
 0x20f   : > { %4321 = vmatprep.subr.bf16.mxu0 (!%p1111_p0), %v6112_v45  ;;  %v5225_v61 = vld [vmem:[#allocation9 + $0x14] ss:$8 sps:$4 sm:$0xff] (!%p1111_p0)   ;;  %4733 = vmatprep.subr.bf16.mxu1 (!%p1111_p0), %v5270_v59  ;;  %v5227_v0 = vld [vmem:[#allocation9 + $0x10] ss:$8 sps:$4 sm:$0xff] (!%p1111_p0)   ;;  %v5228_v1 = vld [vmem:[#allocation9 + $0x24] ss:$8 sps:$4 sm:$0xff] (!%p1111_p0)  }
 0x210   : > { %4734 = vmatpush3.bf16.msra.mxu1 %v5270_v59  ;;  %v5273_v63 = vld [vmem:[%s6028_s14 + $0x18] sm:$0xff]   ;;  %v5230_v2 = vld [vmem:[#allocation9 + $0x20] ss:$8 sps:$4 sm:$0xff]   ;;  %v5234_v5 = vld [vmem:[#allocation9 + $0x44] ss:$8 sps:$4 sm:$0xff]   ;;  %v6160_v36 = vstv %s1486_s28  ;;  %s7174_s13 = sld [smem:[#allocation34_spill]] (!%p4210_p9) }
 0x211   : > { %4735 = vmatprep.subr.bf16.mxu1 %v5271_v60  ;;  %v5231_v3 = vld [vmem:[#allocation9 + $0x34] ss:$8 sps:$4 sm:$0xff]   ;;  %v5233_v4 = vld [vmem:[#allocation9 + $0x30] ss:$8 sps:$4 sm:$0xff]   ;;  %v5236_v6 = vld [vmem:[#allocation9 + $0x40] ss:$8 sps:$4 sm:$0xff]   ;;  %v1540_v41 = vmul.f32 %v6160_v36, %v1507_v34  ;;  %v1541_v46 = vmul.f32 %v6160_v36, %v1508_v35 }
 0x212   : > { %4322 = vmatpush3.bf16.msra.mxu0 %v6116_v47  ;;  %v5237_v7 = vld [vmem:[#allocation9 + $0x54] ss:$8 sps:$4 sm:$0xff]   ;;  %v5239_v8 = vld [vmem:[#allocation9 + $0x50] ss:$8 sps:$4 sm:$0xff]   ;;  %v5240_v9 = vld [vmem:[#allocation9 + $0x64] ss:$8 sps:$4 sm:$0xff]  }
 0x213   : > { %4323 = vmatprep.subr.bf16.mxu0 %v6118_v48  ;;  %v5242_v10 = vld [vmem:[#allocation9 + $0x60] ss:$8 sps:$4 sm:$0xff]   ;;  %v5243_v11 = vld [vmem:[#allocation9 + $0x74] ss:$8 sps:$4 sm:$0xff]   ;;  %v5245_v12 = vld [vmem:[#allocation9 + $0x70] ss:$8 sps:$4 sm:$0xff]  }
 0x214   : > { %4736 = vmatpush3.bf16.msra.mxu1 %v5271_v60  ;;  %v5246_v13 = vld [vmem:[#allocation9 + $0x84] ss:$8 sps:$4 sm:$0xff]   ;;  %v5248_v14 = vld [vmem:[#allocation9 + $0x80] ss:$8 sps:$4 sm:$0xff]   ;;  %v5249_v15 = vld [vmem:[#allocation9 + $0x94] ss:$8 sps:$4 sm:$0xff]  }
 0x215   : > { %4737 = vmatprep.subr.bf16.mxu1 %v5272_v62  ;;  %v5251_v16 = vld [vmem:[#allocation9 + $0x90] ss:$8 sps:$4 sm:$0xff]   ;;  %v5252_v17 = vld [vmem:[#allocation9 + $0xa4] ss:$8 sps:$4 sm:$0xff]   ;;  %v5254_v18 = vld [vmem:[#allocation9 + $0xa0] ss:$8 sps:$4 sm:$0xff]  }
 0x216   : > { %4324 = vmatpush3.bf16.msra.mxu0 %v6122_v49  ;;  %v5255_v19 = vld [vmem:[#allocation9 + $0xb4] ss:$8 sps:$4 sm:$0xff]   ;;  %v5274_v20 = vld [vmem:[%s6028_s14 + $0x20] sm:$0xff]   ;;  %v5257_v21 = vld [vmem:[#allocation9 + $0xb0] ss:$8 sps:$4 sm:$0xff]  }
 0x217   : > { %4325 = vmatprep.subr.bf16.mxu0 %v6124_v50  ;;  %v5258_v22 = vld [vmem:[#allocation9 + $0xc4] ss:$8 sps:$4 sm:$0xff]   ;;  %v5276_v24 = vld [vmem:[%s6028_s14 + $0x30] sm:$0xff]   ;;  %v5260_v26 = vld [vmem:[#allocation9 + $0xc0] ss:$8 sps:$4 sm:$0xff]  }
 0x218   : > { %4738 = vmatpush3.bf16.msra.mxu1 %v5272_v62  ;;  %v5275_v23 = vld [vmem:[%s6028_s14 + $0x28] sm:$0xff]   ;;  %v5261_v27 = vld [vmem:[#allocation9 + $0xd4] ss:$8 sps:$4 sm:$0xff]   ;;  %v5263_v29 = vld [vmem:[#allocation9 + $0xd0] ss:$8 sps:$4 sm:$0xff]  }
 0x219   : > { %4739 = vmatprep.subr.bf16.mxu1 %v5273_v63  ;;  %v5277_v28 = vld [vmem:[%s6028_s14 + $0x38] sm:$0xff]   ;;  %v5264_v30 = vld [vmem:[#allocation9 + $0xe4] ss:$8 sps:$4 sm:$0xff]   ;;  %v5266_v31 = vld [vmem:[#allocation9 + $0xe0] ss:$8 sps:$4 sm:$0xff]  }
 0x21a   : > { %4326 = vmatpush3.bf16.msra.mxu0 %v6128_v51  ;;  %v5267_v32 = vld [vmem:[#allocation9 + $0xf4] ss:$8 sps:$4 sm:$0xff]   ;;  %v5269_v33 = vld [vmem:[#allocation9 + $0xf0] ss:$8 sps:$4 sm:$0xff]  }
 0x21b   : > { %4327 = vmatprep.subr.bf16.mxu0 %v6130_v52 }
 0x21c   : > { %4740 = vmatpush3.bf16.msra.mxu1 %v5273_v63 }
 0x21d   : > { %4741 = vmatprep.subr.bf16.mxu1 %v5274_v20 }
 0x21e   : > { %4328 = vmatpush3.bf16.msra.mxu0 %v6134_v53 }
 0x21f   : > { %4329 = vmatprep.subr.bf16.mxu0 %v6136_v54 }
 0x220   : > { %4742 = vmatpush3.bf16.msra.mxu1 %v5274_v20 }
 0x221   : > { %4743 = vmatprep.subr.bf16.mxu1 %v5275_v23 }
 0x222   : > { %4330 = vmatpush3.bf16.msra.mxu0 %v6140_v55 }
 0x223   : > { %4331 = vmatprep.subr.bf16.mxu0 %v6142_v56 }
 0x224   : > { %4744 = vmatpush3.bf16.msra.mxu1 %v5275_v23 }
 0x225   : > { %4745 = vmatprep.subr.bf16.mxu1 %v5276_v24 }
 0x226   : > { %4332 = vmatpush3.bf16.msra.mxu0 %v6145_v57 }
 0x228   : > { %4746 = vmatpush3.bf16.msra.mxu1 %v5276_v24 }
 0x229   : > { %1357 = vmatmul.mubr.bf16.vlgmr.msra.gmra.mrb[0].mxu0 %v5222_v58  ;;  %4747 = vmatprep.subr.bf16.mxu1 %v5277_v28  ;;  %v5278_v58 = vld [vmem:[%s6034_s3] sm:$0xff]  }
 0x22a   : > { %1364 = vmatprep.mubr.bf16.mxu0 %v5225_v61  ;;  %v1509_v61 = vunpack.c.l.bf16 %v6110_v44  ;;  %v1512_v44 = vunpack.c.h.bf16 %v6116_v47 }
 0x22c   : > { %4748 = vmatpush3.bf16.msra.mxu1 %v5277_v28 }
 0x22d   : > { %4781 = vmatprep.subr.bf16.mxu1 %v5278_v58 }
 0x231   : > { %1365 = vmatmul.mubr.bf16.gmra.mrb[4].mxu0 %v5227_v0 }
 0x232   : > { %1372 = vmatprep.mubr.bf16.mxu0 %v5228_v1 }
 0x239   : > { %1373 = vmatmul.mubr.bf16.gmra.mrb[8].mxu0 %v5230_v2 }
 0x23a   : > { %1380 = vmatprep.mubr.bf16.mxu0 %v5231_v3 }
 0x241   : > { %1381 = vmatmul.mubr.bf16.gmra.mrb[12].mxu0 %v5233_v4  ;;  %v1542_v4 = vmul.f32 %v6160_v36, %v1509_v61 }
 0x242   : > { %1388 = vmatprep.mubr.bf16.mxu0 %v5234_v5 }
 0x249   : > { %1389 = vmatmul.mubr.bf16.gmra.mrb[16].mxu0 %v5236_v6  ;;  %v1543_v6 = vmul.f32 %v6160_v36, %v1510_v42 }
 0x24a   : > { %1396 = vmatprep.mubr.bf16.mxu0 %v5237_v7 }
 0x251   : > { %1397 = vmatmul.mubr.bf16.gmra.mrb[20].mxu0 %v5239_v8 }
 0x252   : > { %1404 = vmatprep.mubr.bf16.mxu0 %v5240_v9 }
 0x259   : > { %1405 = vmatmul.mubr.bf16.gmra.mrb[24].mxu0 %v5242_v10 }
 0x25a   : > { %1412 = vmatprep.mubr.bf16.mxu0 %v5243_v11  ;;  %v1511_v11 = vunpack.c.l.bf16 %v6116_v47  ;;  %v1513_v47 = vunpack.c.l.bf16 %v6122_v49 }
 0x261   : > { %1413 = vmatmul.mubr.bf16.gmra.mrb[28].mxu0 %v5245_v12 }
 0x262   : > { %1420 = vmatprep.mubr.bf16.mxu0 %v5246_v13 }
 0x269   : > { %1421 = vmatmul.mubr.bf16.gmra.mrb[32].mxu0 %v5248_v14  ;;  %v5279_v14 = vld [vmem:[%s6034_s3 + $0x8] sm:$0xff]  }
 0x26a   : > { %1428 = vmatprep.mubr.bf16.mxu0 %v5249_v15 }
 0x271   : > { %1429 = vmatmul.mubr.bf16.gmra.mrb[36].mxu0 %v5251_v16 }
 0x272   : > { %1436 = vmatprep.mubr.bf16.mxu0 %v5252_v17  ;;  %v1544_v17 = vmul.f32 %v6160_v36, %v1511_v11 }
 0x279   : > { %1437 = vmatmul.mubr.bf16.gmra.mrb[40].mxu0 %v5254_v18 }
 0x27a   : > { %1444 = vmatprep.mubr.bf16.mxu0 %v5255_v19  ;;  %v1545_v19 = vmul.f32 %v6160_v36, %v1512_v44 }
 0x281   : > { %1445 = vmatmul.mubr.bf16.gmra.mrb[44].mxu0 %v5257_v21 }
 0x282   : > { %1452 = vmatprep.mubr.bf16.mxu0 %v5258_v22  ;;  %v5280_v22 = vld [vmem:[%s6034_s3 + $0x10] sm:$0xff]  }
 0x289   : > { %1453 = vmatmul.mubr.bf16.gmra.mrb[48].mxu0 %v5260_v26  ;;  %v1514_v26 = vunpack.c.h.bf16 %v6122_v49  ;;  %v5282_v49 = vld [vmem:[%s6034_s3 + $0x20] sm:$0xff]  }
 0x28a   : > { %1460 = vmatprep.mubr.bf16.mxu0 %v5261_v27 }
 0x28b   : > { %v1547_v34 = vmul.f32 %v6160_v36, %v1514_v26 }
 0x291   : > { %1461 = vmatmul.mubr.bf16.gmra.mrb[52].mxu0 %v5263_v29  ;;  %v5281_v29 = vld [vmem:[%s6034_s3 + $0x18] sm:$0xff]  }
 0x292   : > { %1468 = vmatprep.mubr.bf16.mxu0 %v5264_v30 }
 0x299   : > { %1469 = vmatmul.mubr.bf16.gmra.mrb[56].mxu0 %v5266_v31 }
 0x29a   : > { %1476 = vmatprep.mubr.bf16.mxu0 %v5267_v32  ;;  %v1546_v32 = vmul.f32 %v6160_v36, %v1513_v47 }
 0x2a1   : > { %1477 = vmatmul.mubr.bf16.gmra.mrb[60].mxu0 %v5269_v33 }
 0x2fc   : > { %v4333_v37 = vpop.f32.mrb[0].mxu0 }
 0x2fd   : > { %v4334_v38 = vpop.f32.mrb[1].mxu0 }
 0x2fe   : > { %v4335_v39 = vadd.f32 %v4334_v38, %v4333_v37  ;;  %v4336_v40 = vpop.f32.mrb[2].mxu0 }
 0x2ff   : > { %v4337_v59 = vpop.f32.mrb[3].mxu0 }
 0x300   : > { %v4338_v60 = vadd.f32 %v4337_v59, %v4336_v40  ;;  %v1572_v62 = vadd.f32 %v4335_v39, %v1540_v41  ;;  %v1515_v40 = vunpack.c.l.bf16 %v6128_v51  ;;  %v1516_v41 = vunpack.c.h.bf16 %v6128_v51  ;;  %v5283_v59 = vld [vmem:[%s6034_s3 + $0x28] sm:$0xff]  }
 0x301   : > { %v1517_v51 = vunpack.c.l.bf16 %v6134_v53 }
 0x302   : > { %v1573_v63 = vadd.f32 %v4338_v60, %v1541_v46  ;;  %v1549_v42 = vmul.f32 %v6160_v36, %v1516_v41 }
 0x304   : > { %v4339_v0 = vpop.f32.mrb[4].mxu0  ;;  %v1604_v1 = vpack.c.bf16 %v1573_v63, %v1572_v62  ;;  %v1548_v62 = vmul.f32 %v6160_v36, %v1515_v40  ;;  %v1524_v40 = vunpack.c.h.bf16 %v6101_v25 }
 0x305   : > { %v4340_v2 = vpop.f32.mrb[5].mxu0 }
 0x306   : > { %v4341_v3 = vadd.f32 %v4340_v2, %v4339_v0  ;;  %v4342_v5 = vpop.f32.mrb[6].mxu0  ;;  %4749 = vmatprep.mubr.bf16.mxu1 %v1604_v1 }
 0x307   : > { %v4343_v7 = vpop.f32.mrb[7].mxu0 }
 0x308   : > { %v4344_v8 = vadd.f32 %v4343_v7, %v4342_v5  ;;  %v1574_v9 = vadd.f32 %v4341_v3, %v1542_v4  ;;  %v1518_v4 = vunpack.c.h.bf16 %v6134_v53 }
 0x30a   : > { %v1575_v10 = vadd.f32 %v4344_v8, %v1543_v6  ;;  %v1551_v11 = vmul.f32 %v6160_v36, %v1518_v4 }
 0x30c   : > { %v4345_v12 = vpop.f32.mrb[8].mxu0  ;;  %v1605_v13 = vpack.c.bf16 %v1575_v10, %v1574_v9  ;;  %v1550_v9 = vmul.f32 %v6160_v36, %v1517_v51 }
 0x30d   : > { %v4346_v15 = vpop.f32.mrb[9].mxu0 }
 0x30e   : > { %v4347_v16 = vadd.f32 %v4346_v15, %v4345_v12  ;;  %v4348_v18 = vpop.f32.mrb[10].mxu0  ;;  %4750 = vmatmul.mubr.bf16.vlgmr.msra.gmra.mrb[0].mxu1 %v1605_v13  ;;  %v1519_v15 = vunpack.c.l.bf16 %v6140_v55 }
 0x30f   : > { %v4349_v20 = vpop.f32.mrb[11].mxu0  ;;  %4782 = vmatpush3.bf16.msra.mxu1 %v5278_v58 }
 0x310   : > { %v4350_v21 = vadd.f32 %v4349_v20, %v4348_v18  ;;  %4783 = vmatprep.subr.bf16.mxu1 %v5279_v14  ;;  %v1576_v23 = vadd.f32 %v4347_v16, %v1544_v17  ;;  %v1520_v16 = vunpack.c.h.bf16 %v6140_v55  ;;  %v1552_v20 = vmul.f32 %v6160_v36, %v1519_v15 }
 0x312   : > { %v1577_v24 = vadd.f32 %v4350_v21, %v1545_v19 }
 0x313   : > { %4784 = vmatpush3.bf16.msra.mxu1 %v5279_v14 }
 0x314   : > { %v4351_v27 = vpop.f32.mrb[12].mxu0  ;;  %v1606_v28 = vpack.c.bf16 %v1577_v24, %v1576_v23  ;;  %4785 = vmatprep.subr.bf16.mxu1 %v5280_v22 }
 0x315   : > { %v4352_v30 = vpop.f32.mrb[13].mxu0 }
 0x316   : > { %v4353_v31 = vadd.f32 %v4352_v30, %v4351_v27  ;;  %v4354_v33 = vpop.f32.mrb[14].mxu0  ;;  %4753 = vmatprep.mubr.bf16.mxu1 %v1606_v28  ;;  %v1521_v27 = vunpack.c.l.bf16 %v6145_v57  ;;  %v1522_v28 = vunpack.c.h.bf16 %v6145_v57 }
 0x317   : > { %v4355_v35 = vpop.f32.mrb[15].mxu0  ;;  %4786 = vmatpush3.bf16.msra.mxu1 %v5280_v22  ;;  %v1553_v22 = vmul.f32 %v6160_v36, %v1520_v16 }
 0x318   : > { %v4356_v37 = vadd.f32 %v4355_v35, %v4354_v33  ;;  %4787 = vmatprep.subr.bf16.mxu1 %v5281_v29  ;;  %v1578_v38 = vadd.f32 %v4353_v31, %v1546_v32  ;;  %v1554_v32 = vmul.f32 %v6160_v36, %v1521_v27 }
 0x31a   : > { %v1579_v39 = vadd.f32 %v4356_v37, %v1547_v34  ;;  %v1555_v34 = vmul.f32 %v6160_v36, %v1522_v28 }
 0x31b   : > { %4788 = vmatpush3.bf16.msra.mxu1 %v5281_v29 }
 0x31c   : > { %v4357_v46 = vpop.f32.mrb[16].mxu0  ;;  %v1607_v58 = vpack.c.bf16 %v1579_v39, %v1578_v38  ;;  %4789 = vmatprep.subr.bf16.mxu1 %v5282_v49  ;;  %v1523_v39 = vunpack.c.l.bf16 %v6101_v25 }
 0x31d   : > { %v4358_v60 = vpop.f32.mrb[17].mxu0 }
 0x31e   : > { %v4359_v61 = vadd.f32 %v4358_v60, %v4357_v46  ;;  %v4360_v63 = vpop.f32.mrb[18].mxu0  ;;  %4754 = vmatmul.mubr.bf16.gmra.mrb[4].mxu1 %v1607_v58 }
 0x31f   : > { %v4361_v0 = vpop.f32.mrb[19].mxu0  ;;  %4790 = vmatpush3.bf16.msra.mxu1 %v5282_v49 }
 0x320   : > { %v4362_v1 = vadd.f32 %v4361_v0, %v4360_v63  ;;  %4791 = vmatprep.subr.bf16.mxu1 %v5283_v59  ;;  %v1580_v2 = vadd.f32 %v4359_v61, %v1548_v62  ;;  %v1557_v61 = vmul.f32 %v6160_v36, %v1524_v40 }
 0x322   : > { %v1581_v3 = vadd.f32 %v4362_v1, %v1549_v42  ;;  %v1525_v1 = vunpack.c.l.bf16 %v6105_v43 }
 0x323   : > { %4792 = vmatpush3.bf16.msra.mxu1 %v5283_v59  ;;  %v1556_v59 = vmul.f32 %v6160_v36, %v1523_v39 }
 0x324   : > { %v4363_v5 = vpop.f32.mrb[20].mxu0  ;;  %v1608_v6 = vpack.c.bf16 %v1581_v3, %v1580_v2  ;;  %v1526_v2 = vunpack.c.h.bf16 %v6105_v43 }
 0x325   : > { %v4364_v7 = vpop.f32.mrb[21].mxu0 }
 0x326   : > { %v4365_v8 = vadd.f32 %v4364_v7, %v4363_v5  ;;  %v4366_v10 = vpop.f32.mrb[22].mxu0  ;;  %4757 = vmatprep.mubr.bf16.mxu1 %v1608_v6  ;;  %v1558_v5 = vmul.f32 %v6160_v36, %v1525_v1  ;;  %v1559_v7 = vmul.f32 %v6160_v36, %v1526_v2 }
 0x327   : > { %v4367_v44 = vpop.f32.mrb[23].mxu0 }
 0x328   : > { %v4368_v12 = vadd.f32 %v4367_v44, %v4366_v10  ;;  %v1582_v13 = vadd.f32 %v4365_v8, %v1550_v9  ;;  %v1527_v44 = vunpack.c.l.bf16 %v6112_v45 }
 0x32a   : > { %v1583_v14 = vadd.f32 %v4368_v12, %v1551_v11  ;;  %v1528_v12 = vunpack.c.h.bf16 %v6112_v45  ;;  %v1560_v16 = vmul.f32 %v6160_v36, %v1527_v44 }
 0x32c   : > { %v4369_v53 = vpop.f32.mrb[24].mxu0  ;;  %v1609_v17 = vpack.c.bf16 %v1583_v14, %v1582_v13 }
 0x32d   : > { %v4370_v18 = vpop.f32.mrb[25].mxu0 }
 0x32e   : > { %v4371_v19 = vadd.f32 %v4370_v18, %v4369_v53  ;;  %v4372_v21 = vpop.f32.mrb[26].mxu0  ;;  %4758 = vmatmul.mubr.bf16.gmra.mrb[8].mxu1 %v1609_v17  ;;  %v1561_v17 = vmul.f32 %v6160_v36, %v1528_v12 }
 0x32f   : > { %v4373_v23 = vpop.f32.mrb[27].mxu0 }
 0x330   : > { %v4374_v24 = vadd.f32 %v4373_v23, %v4372_v21  ;;  %v1584_v47 = vadd.f32 %v4371_v19, %v1552_v20  ;;  %v1530_v23 = vunpack.c.h.bf16 %v6118_v48 }
 0x332   : > { %v1585_v26 = vadd.f32 %v4374_v24, %v1553_v22  ;;  %v1529_v22 = vunpack.c.l.bf16 %v6118_v48 }
 0x334   : > { %v4375_v29 = vpop.f32.mrb[28].mxu0  ;;  %v1610_v55 = vpack.c.bf16 %v1585_v26, %v1584_v47  ;;  %v1562_v27 = vmul.f32 %v6160_v36, %v1529_v22 }
 0x335   : > { %v4376_v30 = vpop.f32.mrb[29].mxu0 }
 0x336   : > { %v4377_v31 = vadd.f32 %v4376_v30, %v4375_v29  ;;  %v4378_v33 = vpop.f32.mrb[30].mxu0  ;;  %4761 = vmatprep.mubr.bf16.mxu1 %v1610_v55  ;;  %v1563_v29 = vmul.f32 %v6160_v36, %v1530_v23 }
 0x337   : > { %v4379_v35 = vpop.f32.mrb[31].mxu0 }
 0x338   : > { %v4380_v37 = vadd.f32 %v4379_v35, %v4378_v33  ;;  %v1586_v49 = vadd.f32 %v4377_v31, %v1554_v32  ;;  %v1531_v33 = vunpack.c.l.bf16 %v6124_v50 }
 0x33a   : > { %v1587_v38 = vadd.f32 %v4380_v37, %v1555_v34  ;;  %v1532_v34 = vunpack.c.h.bf16 %v6124_v50  ;;  %v5284_v50 = vld [vmem:[%s6034_s3 + $0x30] sm:$0xff]  }
 0x33b   : > { %4793 = vmatprep.subr.bf16.mxu1 %v5284_v50 }
 0x33c   : > { %v4381_v41 = vpop.f32.mrb[32].mxu0  ;;  %v1611_v57 = vpack.c.bf16 %v1587_v38, %v1586_v49  ;;  %v1564_v38 = vmul.f32 %v6160_v36, %v1531_v33  ;;  %v1565_v40 = vmul.f32 %v6160_v36, %v1532_v34  ;;  %4794 = vmatpush3.bf16.msra.mxu1 %v5284_v50 }
 0x33d   : > { %v4382_v46 = vpop.f32.mrb[33].mxu0 }
 0x33e   : > { %v4383_v58 = vadd.f32 %v4382_v46, %v4381_v41  ;;  %v4384_v60 = vpop.f32.mrb[34].mxu0  ;;  %4762 = vmatmul.mubr.bf16.gmra.mrb[12].mxu1 %v1611_v57 }
 0x33f   : > { %v4385_v62 = vpop.f32.mrb[35].mxu0 }
 0x340   : > { %v4386_v63 = vadd.f32 %v4385_v62, %v4384_v60  ;;  %v1588_v42 = vadd.f32 %v4383_v58, %v1556_v59  ;;  %v1533_v59 = vunpack.c.l.bf16 %v6130_v52  ;;  %v1534_v60 = vunpack.c.h.bf16 %v6130_v52 }
 0x342   : > { %v1589_v0 = vadd.f32 %v4386_v63, %v1557_v61  ;;  %v1567_v2 = vmul.f32 %v6160_v36, %v1534_v60 }
 0x344   : > { %v4387_v3 = vpop.f32.mrb[36].mxu0  ;;  %v1612_v25 = vpack.c.bf16 %v1589_v0, %v1588_v42  ;;  %v1566_v0 = vmul.f32 %v6160_v36, %v1533_v59 }
 0x345   : > { %v4388_v51 = vpop.f32.mrb[37].mxu0 }
 0x346   : > { %v4389_v4 = vadd.f32 %v4388_v51, %v4387_v3  ;;  %v4390_v6 = vpop.f32.mrb[38].mxu0  ;;  %4765 = vmatprep.mubr.bf16.mxu1 %v1612_v25  ;;  %v5285_v3 = vld [vmem:[%s6034_s3 + $0x38] sm:$0xff]  }
 0x347   : > { %v4391_v8 = vpop.f32.mrb[39].mxu0  ;;  %4795 = vmatprep.subr.bf16.mxu1 %v5285_v3 }
 0x348   : > { %v4392_v9 = vadd.f32 %v4391_v8, %v4390_v6  ;;  %v1590_v10 = vadd.f32 %v4389_v4, %v1558_v5  ;;  %4796 = vmatpush3.bf16.msra.mxu1 %v5285_v3  ;;  %v1535_v5 = vunpack.c.l.bf16 %v6136_v54  ;;  %v1536_v6 = vunpack.c.h.bf16 %v6136_v54 }
 0x34a   : > { %v1591_v11 = vadd.f32 %v4392_v9, %v1559_v7  ;;  %v1569_v12 = vmul.f32 %v6160_v36, %v1536_v6 }
 0x34c   : > { %v4393_v13 = vpop.f32.mrb[40].mxu0  ;;  %v1613_v43 = vpack.c.bf16 %v1591_v11, %v1590_v10  ;;  %v1568_v11 = vmul.f32 %v6160_v36, %v1535_v5 }
 0x34d   : > { %v4394_v14 = vpop.f32.mrb[41].mxu0 }
 0x34e   : > { %v4395_v15 = vadd.f32 %v4394_v14, %v4393_v13  ;;  %v4396_v53 = vpop.f32.mrb[42].mxu0  ;;  %4766 = vmatmul.mubr.bf16.gmra.mrb[16].mxu1 %v1613_v43 }
 0x34f   : > { %v4397_v18 = vpop.f32.mrb[43].mxu0 }
 0x350   : > { %v4398_v19 = vadd.f32 %v4397_v18, %v4396_v53  ;;  %v1592_v20 = vadd.f32 %v4395_v15, %v1560_v16  ;;  %v1537_v16 = vunpack.c.l.bf16 %v6142_v56  ;;  %v1538_v53 = vunpack.c.h.bf16 %v6142_v56 }
 0x352   : > { %v1593_v21 = vadd.f32 %v4398_v19, %v1561_v17  ;;  %v1571_v22 = vmul.f32 %v6160_v36, %v1538_v53 }
 0x354   : > { %v4399_v24 = vpop.f32.mrb[44].mxu0  ;;  %v1614_v45 = vpack.c.bf16 %v1593_v21, %v1592_v20  ;;  %v1570_v20 = vmul.f32 %v6160_v36, %v1537_v16 }
 0x355   : > { %v4400_v47 = vpop.f32.mrb[45].mxu0 }
 0x356   : > { %v4401_v26 = vadd.f32 %v4400_v47, %v4399_v24  ;;  %v4402_v28 = vpop.f32.mrb[46].mxu0  ;;  %4769 = vmatprep.mubr.bf16.mxu1 %v1614_v45 }
 0x357   : > { %v4403_v55 = vpop.f32.mrb[47].mxu0 }
 0x358   : > { %v4404_v30 = vadd.f32 %v4403_v55, %v4402_v28  ;;  %v1594_v31 = vadd.f32 %v4401_v26, %v1562_v27  ;;  %v6233_v27 = vld [vmem:[%s6049_s5] ss:$0 sm:$0xff] }
 0x35a   : > { %v1595_v32 = vadd.f32 %v4404_v30, %v1563_v29 }
 0x35c   : > { %v4405_v48 = vpop.f32.mrb[48].mxu0  ;;  %v1615_v35 = vpack.c.bf16 %v1595_v32, %v1594_v31 }
 0x35d   : > { %v4406_v37 = vpop.f32.mrb[49].mxu0 }
 0x35e   : > { %v4407_v49 = vadd.f32 %v4406_v37, %v4405_v48  ;;  %v4408_v39 = vpop.f32.mrb[50].mxu0  ;;  %4770 = vmatmul.mubr.bf16.gmra.mrb[20].mxu1 %v1615_v35 }
 0x35f   : > { %v4409_v41 = vpop.f32.mrb[51].mxu0 }
 0x360   : > { %v4410_v57 = vadd.f32 %v4409_v41, %v4408_v39  ;;  %v1596_v46 = vadd.f32 %v4407_v49, %v1564_v38 }
 0x362   : > { %v1597_v58 = vadd.f32 %v4410_v57, %v1565_v40 }
 0x364   : > { %v4411_v61 = vpop.f32.mrb[52].mxu0  ;;  %v1616_v62 = vpack.c.bf16 %v1597_v58, %v1596_v46 }
 0x365   : > { %v4412_v63 = vpop.f32.mrb[53].mxu0 }
 0x366   : > { %v4413_v42 = vadd.f32 %v4412_v63, %v4411_v61  ;;  %v4414_v1 = vpop.f32.mrb[54].mxu0  ;;  %4773 = vmatprep.mubr.bf16.mxu1 %v1616_v62 }
 0x367   : > { %v4415_v25 = vpop.f32.mrb[55].mxu0 }
 0x368   : > { %v4416_v51 = vadd.f32 %v4415_v25, %v4414_v1  ;;  %v1598_v4 = vadd.f32 %v4413_v42, %v1566_v0 }
 0x36a   : > { %v1599_v52 = vadd.f32 %v4416_v51, %v1567_v2 }
 0x36c   : > { %v4417_v7 = vpop.f32.mrb[56].mxu0  ;;  %v1617_v8 = vpack.c.bf16 %v1599_v52, %v1598_v4 }
 0x36d   : > { %v4418_v9 = vpop.f32.mrb[57].mxu0 }
 0x36e   : > { %v4419_v10 = vadd.f32 %v4418_v9, %v4417_v7  ;;  %v4420_v44 = vpop.f32.mrb[58].mxu0  ;;  %4774 = vmatmul.mubr.bf16.gmra.mrb[24].mxu1 %v1617_v8 }
 0x36f   : > { %v4421_v13 = vpop.f32.mrb[59].mxu0 }
 0x370   : > { %v4422_v43 = vadd.f32 %v4421_v13, %v4420_v44  ;;  %v1600_v14 = vadd.f32 %v4419_v10, %v1568_v11 }
 0x372   : > { %v1601_v15 = vadd.f32 %v4422_v43, %v1569_v12 }
 0x374   : > { %v4423_v54 = vpop.f32.mrb[60].mxu0  ;;  %v1618_v17 = vpack.c.bf16 %v1601_v15, %v1600_v14 }
 0x375   : > { %v4424_v18 = vpop.f32.mrb[61].mxu0 }
 0x376   : > { %v4425_v19 = vadd.f32 %v4424_v18, %v4423_v54  ;;  %v4426_v21 = vpop.f32.mrb[62].mxu0  ;;  %4777 = vmatprep.mubr.bf16.mxu1 %v1618_v17 }
 0x377   : > { %v4427_v23 = vpop.f32.mrb[63].mxu0 }
 0x378   : > { %v4428_v24 = vadd.f32 %v4427_v23, %v4426_v21  ;;  %v1602_v45 = vadd.f32 %v4425_v19, %v1570_v20 }
 0x37a   : > { %v1603_v47 = vadd.f32 %v4428_v24, %v1571_v22 }
 0x37c   : > { %v1619_v26 = vpack.c.bf16 %v1603_v47, %v1602_v45 }
 0x37e   : > { %4778 = vmatmul.mubr.bf16.gmra.mrb[28].mxu1 %v1619_v26 }
 0x3e1   : > { %v4751_v28 = vpop.f32.mrb[0].mxu1 }
 0x3e2   : > { %v1734_v56 = vadd.f32 %v4751_v28, %v6233_v27  ;;  %v1725_v29 = vpop.f32.mrb[1].mxu1 }
 0x3e3   : > { %v1726_v55 = vadd.f32 %v6233_v27, %v1725_v29  ;;  %v4752_v30 = vpop.f32.mrb[2].mxu1 }
 0x3e4   : > { %v1737_v31 = vadd.f32 %v4752_v30, %v6233_v27  ;;  %v1728_v32 = vpop.f32.mrb[3].mxu1  ;;  %v1854_v33 = vmax.f32 %v1734_v56, 0.0 }
 0x3e5   : > { %v1729_v36 = vadd.f32 %v6233_v27, %v1728_v32  ;;  %v1852_v48 = vmax.f32 %v1726_v55, 0.0 }
 0x3e6   : > { %v1855_v34 = vmax.f32 %v1737_v31, 0.0 }
 0x3e7   : > { %v1853_v35 = vmax.f32 %v1729_v36, 0.0 }
 0x3e8   : > { %v1885_v37 = vpack.c.bf16 %v1855_v34, %v1854_v33 }
 0x3e9   : > { %v1884_v49 = vpack.c.bf16 %v1853_v35, %v1852_v48 }
 0x3eb   : > { %4797 = vmatprep.mubr.bf16.mxu1 %v1884_v49 }
 0x3ec   : > { %4798 = vmatmul.mubr.bf16.vlgmr.msra.gmra.mrb[32].mxu1 %v1885_v37 }
 0x3f1   : > { %v4755_v38 = vpop.f32.mrb[4].mxu1 }
 0x3f2   : > { %v1750_v39 = vadd.f32 %v4755_v38, %v6233_v27  ;;  %v1741_v40 = vpop.f32.mrb[5].mxu1 }
 0x3f3   : > { %v1742_v41 = vadd.f32 %v6233_v27, %v1741_v40  ;;  %v4756_v57 = vpop.f32.mrb[6].mxu1 }
 0x3f4   : > { %v1753_v46 = vadd.f32 %v4756_v57, %v6233_v27  ;;  %v1744_v58 = vpop.f32.mrb[7].mxu1  ;;  %v1858_v60 = vmax.f32 %v1750_v39, 0.0 }
 0x3f5   : > { %v1745_v59 = vadd.f32 %v6233_v27, %v1744_v58  ;;  %v1856_v61 = vmax.f32 %v1742_v41, 0.0 }
 0x3f6   : > { %v1859_v50 = vmax.f32 %v1753_v46, 0.0 }
 0x3f7   : > { %v1857_v62 = vmax.f32 %v1745_v59, 0.0 }
 0x3f8   : > { %v1887_v63 = vpack.c.bf16 %v1859_v50, %v1858_v60 }
 0x3f9   : > { %v1886_v42 = vpack.c.bf16 %v1857_v62, %v1856_v61 }
 0x3fb   : > { %4801 = vmatprep.mubr.bf16.mxu1 %v1886_v42 }
 0x3fc   : > { %4802 = vmatmul.mubr.bf16.gmra.mrb[36].mxu1 %v1887_v63 }
 0x401   : > { %v4759_v0 = vpop.f32.mrb[8].mxu1 }
 0x402   : > { %v1766_v1 = vadd.f32 %v4759_v0, %v6233_v27  ;;  %v1757_v2 = vpop.f32.mrb[9].mxu1 }
 0x403   : > { %v1758_v3 = vadd.f32 %v6233_v27, %v1757_v2  ;;  %v4760_v25 = vpop.f32.mrb[10].mxu1 }
 0x404   : > { %v1769_v51 = vadd.f32 %v4760_v25, %v6233_v27  ;;  %v1760_v4 = vpop.f32.mrb[11].mxu1  ;;  %v1862_v5 = vmax.f32 %v1766_v1, 0.0 }
 0x405   : > { %v1761_v52 = vadd.f32 %v6233_v27, %v1760_v4  ;;  %v1860_v7 = vmax.f32 %v1758_v3, 0.0 }
 0x406   : > { %v1863_v6 = vmax.f32 %v1769_v51, 0.0 }
 0x407   : > { %v1861_v8 = vmax.f32 %v1761_v52, 0.0 }
 0x408   : > { %v1889_v9 = vpack.c.bf16 %v1863_v6, %v1862_v5 }
 0x409   : > { %v1888_v10 = vpack.c.bf16 %v1861_v8, %v1860_v7 }
 0x40b   : > { %4805 = vmatprep.mubr.bf16.mxu1 %v1888_v10 }
 0x40c   : > { %4806 = vmatmul.mubr.bf16.gmra.mrb[40].mxu1 %v1889_v9 }
 0x411   : > { %v4763_v11 = vpop.f32.mrb[12].mxu1 }
 0x412   : > { %v1782_v44 = vadd.f32 %v4763_v11, %v6233_v27  ;;  %v1773_v12 = vpop.f32.mrb[13].mxu1 }
 0x413   : > { %v1774_v13 = vadd.f32 %v6233_v27, %v1773_v12  ;;  %v4764_v43 = vpop.f32.mrb[14].mxu1 }
 0x414   : > { %v1785_v14 = vadd.f32 %v4764_v43, %v6233_v27  ;;  %v1776_v15 = vpop.f32.mrb[15].mxu1  ;;  %v1866_v53 = vmax.f32 %v1782_v44, 0.0 }
 0x415   : > { %v1777_v16 = vadd.f32 %v6233_v27, %v1776_v15  ;;  %v1864_v17 = vmax.f32 %v1774_v13, 0.0 }
 0x416   : > { %v1867_v54 = vmax.f32 %v1785_v14, 0.0 }
 0x417   : > { %v1865_v18 = vmax.f32 %v1777_v16, 0.0  ;;  %v6268_v16 = vld [vmem:[%s6054_s6] ss:$0 sm:$0xff] }
 0x418   : > { %v1891_v19 = vpack.c.bf16 %v1867_v54, %v1866_v53 }
 0x419   : > { %v1890_v20 = vpack.c.bf16 %v1865_v18, %v1864_v17 }
 0x41b   : > { %4809 = vmatprep.mubr.bf16.mxu1 %v1890_v20 }
 0x41c   : > { %4810 = vmatmul.mubr.bf16.gmra.mrb[44].mxu1 %v1891_v19 }
 0x421   : > { %v4767_v21 = vpop.f32.mrb[16].mxu1 }
 0x422   : > { %v1798_v22 = vadd.f32 %v4767_v21, %v6233_v27  ;;  %v1789_v23 = vpop.f32.mrb[17].mxu1 }
 0x423   : > { %v1790_v24 = vadd.f32 %v6233_v27, %v1789_v23  ;;  %v4768_v45 = vpop.f32.mrb[18].mxu1 }
 0x424   : > { %v1801_v47 = vadd.f32 %v4768_v45, %v6233_v27  ;;  %v1792_v26 = vpop.f32.mrb[19].mxu1  ;;  %v1870_v56 = vmax.f32 %v1798_v22, 0.0 }
 0x425   : > { %v1793_v28 = vadd.f32 %v6233_v27, %v1792_v26  ;;  %v1868_v55 = vmax.f32 %v1790_v24, 0.0 }
 0x426   : > { %v1871_v29 = vmax.f32 %v1801_v47, 0.0 }
 0x427   : > { %v1869_v30 = vmax.f32 %v1793_v28, 0.0 }
 0x428   : > { %v1893_v31 = vpack.c.bf16 %v1871_v29, %v1870_v56 }
 0x429   : > { %v1892_v32 = vpack.c.bf16 %v1869_v30, %v1868_v55 }
 0x42b   : > { %4813 = vmatprep.mubr.bf16.mxu1 %v1892_v32 }
 0x42c   : > { %4814 = vmatmul.mubr.bf16.gmra.mrb[48].mxu1 %v1893_v31 }
 0x431   : > { %v4771_v36 = vpop.f32.mrb[20].mxu1 }
 0x432   : > { %v1814_v33 = vadd.f32 %v4771_v36, %v6233_v27  ;;  %v1805_v34 = vpop.f32.mrb[21].mxu1 }
 0x433   : > { %v1806_v48 = vadd.f32 %v6233_v27, %v1805_v34  ;;  %v4772_v35 = vpop.f32.mrb[22].mxu1 }
 0x434   : > { %v1817_v37 = vadd.f32 %v4772_v35, %v6233_v27  ;;  %v1808_v49 = vpop.f32.mrb[23].mxu1  ;;  %v1874_v39 = vmax.f32 %v1814_v33, 0.0 }
 0x435   : > { %v1809_v38 = vadd.f32 %v6233_v27, %v1808_v49  ;;  %v1872_v41 = vmax.f32 %v1806_v48, 0.0 }
 0x436   : > { %v1875_v40 = vmax.f32 %v1817_v37, 0.0 }
 0x437   : > { %v1873_v57 = vmax.f32 %v1809_v38, 0.0 }
 0x438   : > { %v1895_v46 = vpack.c.bf16 %v1875_v40, %v1874_v39 }
 0x439   : > { %v1894_v58 = vpack.c.bf16 %v1873_v57, %v1872_v41 }
 0x43b   : > { %4817 = vmatprep.mubr.bf16.mxu1 %v1894_v58 }
 0x43c   : > { %4818 = vmatmul.mubr.bf16.gmra.mrb[52].mxu1 %v1895_v46 }
 0x441   : > { %v4775_v59 = vpop.f32.mrb[24].mxu1 }
 0x442   : > { %v1830_v60 = vadd.f32 %v4775_v59, %v6233_v27  ;;  %v1821_v50 = vpop.f32.mrb[25].mxu1 }
 0x443   : > { %v1822_v61 = vadd.f32 %v6233_v27, %v1821_v50  ;;  %v4776_v62 = vpop.f32.mrb[26].mxu1 }
 0x444   : > { %v1833_v63 = vadd.f32 %v4776_v62, %v6233_v27  ;;  %v1824_v42 = vpop.f32.mrb[27].mxu1  ;;  %v1878_v1 = vmax.f32 %v1830_v60, 0.0 }
 0x445   : > { %v1825_v0 = vadd.f32 %v6233_v27, %v1824_v42  ;;  %v1876_v3 = vmax.f32 %v1822_v61, 0.0 }
 0x446   : > { %v1879_v2 = vmax.f32 %v1833_v63, 0.0 }
 0x447   : > { %v1877_v25 = vmax.f32 %v1825_v0, 0.0 }
 0x448   : > { %v1897_v51 = vpack.c.bf16 %v1879_v2, %v1878_v1  ;;  %v5289_v2 = vld [vmem:[#allocation15 + $0x18] sm:$0xff] (!%p4210_p9)  }
 0x449   : > { %v1896_v4 = vpack.c.bf16 %v1877_v25, %v1876_v3 }
 0x44b   : > { %4821 = vmatprep.mubr.bf16.mxu1 %v1896_v4 }
 0x44c   : > { %4822 = vmatmul.mubr.bf16.gmra.mrb[56].mxu1 %v1897_v51 }
 0x451   : > { %v4779_v52 = vpop.f32.mrb[28].mxu1 }
 0x452   : > { %v1846_v5 = vadd.f32 %v4779_v52, %v6233_v27  ;;  %v1837_v6 = vpop.f32.mrb[29].mxu1 }
 0x453   : > { %v1838_v7 = vadd.f32 %v6233_v27, %v1837_v6  ;;  %v4780_v8 = vpop.f32.mrb[30].mxu1 }
 0x454   : > { %v1849_v9 = vadd.f32 %v4780_v8, %v6233_v27  ;;  %v1840_v10 = vpop.f32.mrb[31].mxu1  ;;  %v1882_v44 = vmax.f32 %v1846_v5, 0.0 }
 0x455   : > { %v1841_v11 = vadd.f32 %v6233_v27, %v1840_v10  ;;  %v1880_v13 = vmax.f32 %v1838_v7, 0.0 }
 0x456   : > { %v1883_v12 = vmax.f32 %v1849_v9, 0.0 }
 0x457   : > { %v1881_v43 = vmax.f32 %v1841_v11, 0.0 }
 0x458   : > { %v1899_v14 = vpack.c.bf16 %v1883_v12, %v1882_v44 }
 0x459   : > { %v1898_v15 = vpack.c.bf16 %v1881_v43, %v1880_v13 }
 0x45b   : > { %4825 = vmatprep.mubr.bf16.mxu1 %v1898_v15 }
 0x45c   : > { %4826 = vmatmul.mubr.bf16.gmra.mrb[60].mxu1 %v1899_v14 }
 0x4bf   : > { %v4799_v53 = vpop.f32.mrb[32].mxu1 }
 0x4c0   : > { %v6271_v54 = vadd.f32 %v4799_v53, %v6268_v16  ;;  %v2005_v17 = vpop.f32.mrb[33].mxu1 }
 0x4c1   : > { %v6274_v18 = vadd.f32 %v6268_v16, %v2005_v17  ;;  %v4800_v19 = vpop.f32.mrb[34].mxu1 }
 0x4c2   : > { %v2134_v27 = vmax.f32 %v6271_v54, 0.0  ;;  %v6278_v20 = vadd.f32 %v4800_v19, %v6268_v16  ;;  %v2008_v21 = vpop.f32.mrb[35].mxu1 }
 0x4c3   : > { %v2132_v22 = vmax.f32 %v6274_v18, 0.0  ;;  %v6282_v23 = vadd.f32 %v6268_v16, %v2008_v21 }
 0x4c4   : > { %v2135_v24 = vmax.f32 %v6278_v20, 0.0 }
 0x4c5   : > { %v7104_v45 = vmax.f32 %v6282_v23, 0.0 }
 0x4cf   : > { %v4803_v47 = vpop.f32.mrb[36].mxu1 }
 0x4d0   : > { %v6287_v26 = vadd.f32 %v4803_v47, %v6268_v16  ;;  %v2021_v28 = vpop.f32.mrb[37].mxu1 }
 0x4d1   : > { %v6290_v56 = vadd.f32 %v6268_v16, %v2021_v28  ;;  %v4804_v29 = vpop.f32.mrb[38].mxu1 }
 0x4d2   : > { %v2138_v55 = vmax.f32 %v6287_v26, 0.0  ;;  %v6294_v30 = vadd.f32 %v4804_v29, %v6268_v16  ;;  %v2024_v31 = vpop.f32.mrb[39].mxu1 }
 0x4d3   : > { %v2136_v32 = vmax.f32 %v6290_v56, 0.0  ;;  %v6298_v36 = vadd.f32 %v6268_v16, %v2024_v31 }
 0x4d4   : > { %v2139_v33 = vmax.f32 %v6294_v30, 0.0 }
 0x4d5   : > { %v2137_v34 = vmax.f32 %v6298_v36, 0.0 }
 0x4df   : > { %v4807_v48 = vpop.f32.mrb[40].mxu1 }
 0x4e0   : > { %v6303_v35 = vadd.f32 %v4807_v48, %v6268_v16  ;;  %v2037_v37 = vpop.f32.mrb[41].mxu1 }
 0x4e1   : > { %v6306_v49 = vadd.f32 %v6268_v16, %v2037_v37  ;;  %v4808_v38 = vpop.f32.mrb[42].mxu1 }
 0x4e2   : > { %v2142_v39 = vmax.f32 %v6303_v35, 0.0  ;;  %v6310_v40 = vadd.f32 %v4808_v38, %v6268_v16  ;;  %v2040_v41 = vpop.f32.mrb[43].mxu1 }
 0x4e3   : > { %v2140_v57 = vmax.f32 %v6306_v49, 0.0  ;;  %v6314_v46 = vadd.f32 %v6268_v16, %v2040_v41 }
 0x4e4   : > { %v2143_v58 = vmax.f32 %v6310_v40, 0.0 }
 0x4e5   : > { %v2141_v59 = vmax.f32 %v6314_v46, 0.0 }
 0x4ef   : > { %v4811_v60 = vpop.f32.mrb[44].mxu1 }
 0x4f0   : > { %v6319_v50 = vadd.f32 %v4811_v60, %v6268_v16  ;;  %v2053_v61 = vpop.f32.mrb[45].mxu1 }
 0x4f1   : > { %v6322_v62 = vadd.f32 %v6268_v16, %v2053_v61  ;;  %v4812_v63 = vpop.f32.mrb[46].mxu1 }
 0x4f2   : > { %v6326_v0 = vadd.f32 %v4812_v63, %v6268_v16  ;;  %v2056_v1 = vpop.f32.mrb[47].mxu1 }
 0x4f3   : > { %v6330_v3 = vadd.f32 %v6268_v16, %v2056_v1 }
 0x4ff   : > { %v4815_v4 = vpop.f32.mrb[48].mxu1 }
 0x500   : > { %v6335_v52 = vadd.f32 %v4815_v4, %v6268_v16  ;;  %v2069_v5 = vpop.f32.mrb[49].mxu1 }
 0x501   : > { %v6338_v6 = vadd.f32 %v6268_v16, %v2069_v5  ;;  %v4816_v7 = vpop.f32.mrb[50].mxu1 }
 0x502   : > { %v2150_v8 = vmax.f32 %v6335_v52, 0.0  ;;  %v6342_v9 = vadd.f32 %v4816_v7, %v6268_v16  ;;  %v2072_v10 = vpop.f32.mrb[51].mxu1 }
 0x503   : > { %v2148_v11 = vmax.f32 %v6338_v6, 0.0  ;;  %v6346_v44 = vadd.f32 %v6268_v16, %v2072_v10  ;;  %v5287_v10 = vld [vmem:[#allocation15 + $0x8] sm:$0xff] (!%p4210_p9)  }
 0x504   : > { %v2151_v12 = vmax.f32 %v6342_v9, 0.0 }
 0x505   : > { %v2149_v13 = vmax.f32 %v6346_v44, 0.0 }
 0x50f   : > { %v4819_v43 = vpop.f32.mrb[52].mxu1 }
 0x510   : > { %v6351_v14 = vadd.f32 %v4819_v43, %v6268_v16  ;;  %v2085_v15 = vpop.f32.mrb[53].mxu1 }
 0x511   : > { %v6354_v53 = vadd.f32 %v6268_v16, %v2085_v15  ;;  %v4820_v17 = vpop.f32.mrb[54].mxu1 }
 0x512   : > { %v7106_v19 = vmax.f32 %v6351_v14, 0.0  ;;  %v6358_v21 = vadd.f32 %v4820_v17, %v6268_v16  ;;  %v2088_v47 = vpop.f32.mrb[55].mxu1 }
 0x513   : > { %v2152_v28 = vmax.f32 %v6354_v53, 0.0  ;;  %v6362_v29 = vadd.f32 %v6268_v16, %v2088_v47 }
 0x514   : > { %v7105_v31 = vmax.f32 %v6358_v21, 0.0 }
 0x515   : > { %v7107_v48 = vmax.f32 %v6362_v29, 0.0 }
 0x51f   : > { %v4823_v37 = vpop.f32.mrb[56].mxu1 }
 0x520   : > { %v6367_v38 = vadd.f32 %v4823_v37, %v6268_v16  ;;  %v2101_v41 = vpop.f32.mrb[57].mxu1 }
 0x521   : > { %v6370_v60 = vadd.f32 %v6268_v16, %v2101_v41  ;;  %v4824_v61 = vpop.f32.mrb[58].mxu1 }
 0x522   : > { %v7108_v63 = vmax.f32 %v6367_v38, 0.0  ;;  %v6374_v1 = vadd.f32 %v4824_v61, %v6268_v16  ;;  %v2104_v4 = vpop.f32.mrb[59].mxu1 }
 0x523   : > { %v7113_v5 = vmax.f32 %v6370_v60, 0.0  ;;  %v6378_v7 = vadd.f32 %v6268_v16, %v2104_v4 }
 0x525   : > { %v7112_v43 = vmax.f32 %v6378_v7, 0.0 }
 0x52f   : > { %v4827_v15 = vpop.f32.mrb[60].mxu1  ;;  %2167 = sbr.rel (%p4210_p9) target bundleno = 1604 (0x644), region = 104 }
 0x530   : > { %v6383_v17 = vadd.f32 %v4827_v15, %v6268_v16  ;;  %v2117_v47 = vpop.f32.mrb[61].mxu1 }
 0x531   : > { %v6386_v37 = vadd.f32 %v6268_v16, %v2117_v47  ;;  %v4828_v41 = vpop.f32.mrb[62].mxu1  ;;  %v5286_v47 = vld [vmem:[#allocation15] sm:$0xff] (!%p4210_p9)  }
 0x532   : > { %v7110_v61 = vmax.f32 %v6383_v17, 0.0  ;;  %v6390_v25 = vadd.f32 %v4828_v41, %v6268_v16  ;;  %v2120_v4 = vpop.f32.mrb[63].mxu1  ;;  %v2168_v41 = vpack.c.bf16 (!%p4210_p9), %v7104_v45, %v2132_v22  ;;  %4829 = vmatprep.subr.bf16.mxu0 (!%p4210_p9), %v5286_v47  ;;  %5037 = vmatprep.subr.bf16.mxu1 (!%p4210_p9), %v5286_v47  ;;  %v5290_v45 = vld [vmem:[#allocation15 + $0x20] sm:$0xff] (!%p4210_p9)  }
 0x533   : > { %v7111_v42 = vmax.f32 %v6386_v37, 0.0  ;;  %v6394_v51 = vadd.f32 %v6268_v16, %v2120_v4  ;;  %v2176_v16 = vpack.c.bf16 (!%p4210_p9), %v2149_v13, %v2148_v11  ;;  %4830 = vmatpush3.bf16.msra.mxu0 (!%p4210_p9), %v5286_v47  ;;  %5045 = vmatpush3.bf16.msra.mxu1 (!%p4210_p9), %v5286_v47  ;;  %v5288_v4 = vld [vmem:[#allocation15 + $0x10] sm:$0xff] (!%p4210_p9)   ;;  %v5291_v47 = vld [vmem:[#allocation15 + $0x28] sm:$0xff] (!%p4210_p9)  }
 0x534   : > { %4831 = vmatprep.subr.bf16.mxu0 (!%p4210_p9), %v5287_v10  ;;  %5038 = vmatprep.subr.bf16.mxu1 (!%p4210_p9), %v5287_v10 }
 0x535   : > { %v7109_v15 = vmax.f32 %v6394_v51, 0.0  ;;  %4845 = vmatprep.mubr.bf16.mxu0 (!%p4210_p9), %v2168_v41  ;;  %4861 = vmatprep.mubr.bf16.mxu1 (!%p4210_p9), %v2176_v16  ;;  %v5292_v41 = vld [vmem:[#allocation15 + $0x30] sm:$0xff] (!%p4210_p9)   ;;  %v2170_v16 = vpack.c.bf16 (!%p4210_p9), %v2137_v34, %v2136_v32 }
 0x537   : > { %4832 = vmatpush3.bf16.msra.mxu0 %v5287_v10  ;;  %5046 = vmatpush3.bf16.msra.mxu1 %v5287_v10  ;;  %v5293_v10 = vld [vmem:[#allocation15 + $0x38] sm:$0xff]  }
 0x538   : > { %4833 = vmatprep.subr.bf16.mxu0 %v5288_v4  ;;  %5039 = vmatprep.subr.bf16.mxu1 %v5288_v4 }
 0x53b   : > { %4834 = vmatpush3.bf16.msra.mxu0 %v5288_v4  ;;  %5047 = vmatpush3.bf16.msra.mxu1 %v5288_v4  ;;  %v2178_v4 = vpack.c.bf16 %v7107_v48, %v2152_v28 }
 0x53c   : > { %4835 = vmatprep.subr.bf16.mxu0 %v5289_v2  ;;  %5040 = vmatprep.subr.bf16.mxu1 %v5289_v2 }
 0x53f   : > { %4836 = vmatpush3.bf16.msra.mxu0 %v5289_v2  ;;  %5048 = vmatpush3.bf16.msra.mxu1 %v5289_v2  ;;  %v2169_v2 = vpack.c.bf16 %v2135_v24, %v2134_v27 }
 0x540   : > { %4837 = vmatprep.subr.bf16.mxu0 %v5290_v45  ;;  %5041 = vmatprep.subr.bf16.mxu1 %v5290_v45 }
 0x543   : > { %4838 = vmatpush3.bf16.msra.mxu0 %v5290_v45  ;;  %5049 = vmatpush3.bf16.msra.mxu1 %v5290_v45  ;;  %v2177_v45 = vpack.c.bf16 %v2151_v12, %v2150_v8 }
 0x544   : > { %4839 = vmatprep.subr.bf16.mxu0 %v5291_v47  ;;  %5042 = vmatprep.subr.bf16.mxu1 %v5291_v47 }
 0x547   : > { %4840 = vmatpush3.bf16.msra.mxu0 %v5291_v47  ;;  %5050 = vmatpush3.bf16.msra.mxu1 %v5291_v47  ;;  %v2171_v47 = vpack.c.bf16 %v2139_v33, %v2138_v55 }
 0x548   : > { %4841 = vmatprep.subr.bf16.mxu0 %v5292_v41  ;;  %5043 = vmatprep.subr.bf16.mxu1 %v5292_v41 }
 0x54b   : > { %4842 = vmatpush3.bf16.msra.mxu0 %v5292_v41  ;;  %5051 = vmatpush3.bf16.msra.mxu1 %v5292_v41  ;;  %v2179_v41 = vpack.c.bf16 %v7105_v31, %v7106_v19  ;;  %v7169_v31 = vmax.f32 %v6322_v62, 0.0  ;;  %v7170_v19 = vmax.f32 %v6330_v3, 0.0 }
 0x54c   : > { %4843 = vmatprep.subr.bf16.mxu0 %v5293_v10  ;;  %5044 = vmatprep.subr.bf16.mxu1 %v5293_v10 }
 0x54d   : > { %v2174_v48 = vpack.c.bf16 %v7170_v19, %v7169_v31  ;;  %v6466_v19 = vld [vmem:[%s7174_s13] ss:$0 sm:$0xff] }
 0x54f   : > { %4844 = vmatpush3.bf16.msra.mxu0 %v5293_v10  ;;  %5052 = vmatpush3.bf16.msra.mxu1 %v5293_v10  ;;  %v2172_v10 = vpack.c.bf16 %v2141_v59, %v2140_v57 }
 0x552   : > { %4846 = vmatmul.mubr.bf16.vlgmr.msra.gmra.mrb[0].mxu0 %v2169_v2  ;;  %4862 = vmatmul.mubr.bf16.vlgmr.msra.gmra.mrb[0].mxu1 %v2177_v45  ;;  %v2180_v2 = vpack.c.bf16 %v7112_v43, %v7113_v5  ;;  %v2173_v45 = vpack.c.bf16 %v2143_v58, %v2142_v39 }
 0x553   : > { %4849 = vmatprep.mubr.bf16.mxu0 %v2170_v16  ;;  %4865 = vmatprep.mubr.bf16.mxu1 %v2178_v4  ;;  %v7168_v16 = vmax.f32 %v6374_v1, 0.0 }
 0x555   : > { %v2181_v4 = vpack.c.bf16 %v7168_v16, %v7108_v63  ;;  %v7173_v16 = vmax.f32 %v6390_v25, 0.0 }
 0x557   : > { %v2183_v63 = vpack.c.bf16 %v7173_v16, %v7110_v61 }
 0x55a   : > { %4850 = vmatmul.mubr.bf16.gmra.mrb[4].mxu0 %v2171_v47  ;;  %4866 = vmatmul.mubr.bf16.gmra.mrb[4].mxu1 %v2179_v41  ;;  %v2182_v47 = vpack.c.bf16 %v7109_v15, %v7111_v42  ;;  %v7171_v41 = vmax.f32 %v6319_v50, 0.0 }
 0x55b   : > { %4853 = vmatprep.mubr.bf16.mxu0 %v2172_v10  ;;  %4869 = vmatprep.mubr.bf16.mxu1 %v2180_v2  ;;  %v7172_v10 = vmax.f32 %v6326_v0, 0.0 }
 0x55d   : > { %v2175_v2 = vpack.c.bf16 %v7172_v10, %v7171_v41 }
 0x562   : > { %4854 = vmatmul.mubr.bf16.gmra.mrb[8].mxu0 %v2173_v45  ;;  %4870 = vmatmul.mubr.bf16.gmra.mrb[8].mxu1 %v2181_v4 }
 0x563   : > { %4857 = vmatprep.mubr.bf16.mxu0 %v2174_v48  ;;  %4873 = vmatprep.mubr.bf16.mxu1 %v2182_v47 }
 0x56a   : > { %4858 = vmatmul.mubr.bf16.gmra.mrb[12].mxu0 %v2175_v2  ;;  %4874 = vmatmul.mubr.bf16.gmra.mrb[12].mxu1 %v2183_v63 }
 0x625   : > { %v4847_v31 = vpop.f32.mrb[0].mxu0  ;;  %v4863_v48 = vpop.f32.mrb[0].mxu1 }
 0x626   : > { %v2298_v45 = vadd.f32 %v4847_v31, %v6466_v19  ;;  %v2362_v4 = vadd.f32 %v4863_v48, %v6466_v19  ;;  %v2289_v47 = vpop.f32.mrb[1].mxu0  ;;  %v2353_v41 = vpop.f32.mrb[1].mxu1 }
 0x627   : > { %v2290_v10 = vadd.f32 %v6466_v19, %v2289_v47  ;;  %v2354_v15 = vadd.f32 %v6466_v19, %v2353_v41  ;;  %v4848_v16 = vpop.f32.mrb[2].mxu0  ;;  %v4864_v2 = vpop.f32.mrb[2].mxu1 }
 0x628   : > { %2418 = vst [vmem:[#allocation17 + $0x10] sm:$0xff] %v2298_v45  ;;  %2434 = vst [vmem:[#allocation17 + $0x90] sm:$0xff] %v2362_v4  ;;  %v2301_v63 = vadd.f32 %v4848_v16, %v6466_v19  ;;  %v2365_v61 = vadd.f32 %v4864_v2, %v6466_v19  ;;  %v2292_v42 = vpop.f32.mrb[3].mxu0  ;;  %v2356_v43 = vpop.f32.mrb[3].mxu1 }
 0x629   : > { %2416 = vst [vmem:[#allocation17] sm:$0xff] %v2290_v10  ;;  %2432 = vst [vmem:[#allocation17 + $0x80] sm:$0xff] %v2354_v15  ;;  %v2293_v31 = vadd.f32 %v6466_v19, %v2292_v42  ;;  %v2357_v48 = vadd.f32 %v6466_v19, %v2356_v43 }
 0x62a   : > { %2419 = vst [vmem:[#allocation17 + $0x18] sm:$0xff] %v2301_v63  ;;  %2435 = vst [vmem:[#allocation17 + $0x98] sm:$0xff] %v2365_v61 }
 0x62b   : > { %2417 = vst [vmem:[#allocation17 + $0x8] sm:$0xff] %v2293_v31  ;;  %2433 = vst [vmem:[#allocation17 + $0x88] sm:$0xff] %v2357_v48 }
 0x62d   : > { %v4851_v47 = vpop.f32.mrb[4].mxu0  ;;  %v4867_v41 = vpop.f32.mrb[4].mxu1 }
 0x62e   : > { %v2314_v45 = vadd.f32 %v4851_v47, %v6466_v19  ;;  %v2378_v4 = vadd.f32 %v4867_v41, %v6466_v19  ;;  %v2305_v16 = vpop.f32.mrb[5].mxu0  ;;  %v2369_v2 = vpop.f32.mrb[5].mxu1 }
 0x62f   : > { %v2306_v5 = vadd.f32 %v6466_v19, %v2305_v16  ;;  %v2370_v15 = vadd.f32 %v6466_v19, %v2369_v2  ;;  %v4852_v10 = vpop.f32.mrb[6].mxu0  ;;  %v4868_v42 = vpop.f32.mrb[6].mxu1 }
 0x630   : > { %2422 = vst [vmem:[#allocation17 + $0x30] sm:$0xff] %v2314_v45  ;;  %2438 = vst [vmem:[#allocation17 + $0xb0] sm:$0xff] %v2378_v4  ;;  %v2317_v43 = vadd.f32 %v4852_v10, %v6466_v19  ;;  %v2381_v61 = vadd.f32 %v4868_v42, %v6466_v19  ;;  %v2308_v63 = vpop.f32.mrb[7].mxu0  ;;  %v2372_v31 = vpop.f32.mrb[7].mxu1 }
 0x631   : > { %2420 = vst [vmem:[#allocation17 + $0x20] sm:$0xff] %v2306_v5  ;;  %2436 = vst [vmem:[#allocation17 + $0xa0] sm:$0xff] %v2370_v15  ;;  %v2309_v48 = vadd.f32 %v6466_v19, %v2308_v63  ;;  %v2373_v47 = vadd.f32 %v6466_v19, %v2372_v31 }
 0x632   : > { %2423 = vst [vmem:[#allocation17 + $0x38] sm:$0xff] %v2317_v43  ;;  %2439 = vst [vmem:[#allocation17 + $0xb8] sm:$0xff] %v2381_v61 }
 0x633   : > { %2421 = vst [vmem:[#allocation17 + $0x28] sm:$0xff] %v2309_v48  ;;  %2437 = vst [vmem:[#allocation17 + $0xa8] sm:$0xff] %v2373_v47 }
 0x635   : > { %v4855_v41 = vpop.f32.mrb[8].mxu0  ;;  %v4871_v16 = vpop.f32.mrb[8].mxu1 }
 0x636   : > { %v2330_v45 = vadd.f32 %v4855_v41, %v6466_v19  ;;  %v2394_v4 = vadd.f32 %v4871_v16, %v6466_v19  ;;  %v2321_v2 = vpop.f32.mrb[9].mxu0  ;;  %v2385_v10 = vpop.f32.mrb[9].mxu1 }
 0x637   : > { %v2322_v42 = vadd.f32 %v6466_v19, %v2321_v2  ;;  %v2386_v5 = vadd.f32 %v6466_v19, %v2385_v10  ;;  %v4856_v15 = vpop.f32.mrb[10].mxu0  ;;  %v4872_v63 = vpop.f32.mrb[10].mxu1 }
 0x638   : > { %2426 = vst [vmem:[#allocation17 + $0x50] sm:$0xff] %v2330_v45  ;;  %2442 = vst [vmem:[#allocation17 + $0xd0] sm:$0xff] %v2394_v4  ;;  %v2333_v43 = vadd.f32 %v4856_v15, %v6466_v19  ;;  %v2397_v61 = vadd.f32 %v4872_v63, %v6466_v19  ;;  %v2324_v31 = vpop.f32.mrb[11].mxu0  ;;  %v2388_v48 = vpop.f32.mrb[11].mxu1 }
 0x639   : > { %2424 = vst [vmem:[#allocation17 + $0x40] sm:$0xff] %v2322_v42  ;;  %2440 = vst [vmem:[#allocation17 + $0xc0] sm:$0xff] %v2386_v5  ;;  %v2325_v47 = vadd.f32 %v6466_v19, %v2324_v31  ;;  %v2389_v41 = vadd.f32 %v6466_v19, %v2388_v48 }
 0x63a   : > { %2427 = vst [vmem:[#allocation17 + $0x58] sm:$0xff] %v2333_v43  ;;  %2443 = vst [vmem:[#allocation17 + $0xd8] sm:$0xff] %v2397_v61 }
 0x63b   : > { %2425 = vst [vmem:[#allocation17 + $0x48] sm:$0xff] %v2325_v47  ;;  %2441 = vst [vmem:[#allocation17 + $0xc8] sm:$0xff] %v2389_v41 }
 0x63d   : > { %v4859_v16 = vpop.f32.mrb[12].mxu0  ;;  %v4875_v2 = vpop.f32.mrb[12].mxu1 }
 0x63e   : > { %v2346_v45 = vadd.f32 %v4859_v16, %v6466_v19  ;;  %v2410_v4 = vadd.f32 %v4875_v2, %v6466_v19  ;;  %v2337_v10 = vpop.f32.mrb[13].mxu0  ;;  %v2401_v15 = vpop.f32.mrb[13].mxu1 }
 0x63f   : > { %v2338_v63 = vadd.f32 %v6466_v19, %v2337_v10  ;;  %v2402_v42 = vadd.f32 %v6466_v19, %v2401_v15  ;;  %v4860_v5 = vpop.f32.mrb[14].mxu0  ;;  %v4876_v31 = vpop.f32.mrb[14].mxu1 }
 0x640   : > { %2430 = vst [vmem:[#allocation17 + $0x70] sm:$0xff] %v2346_v45  ;;  %2446 = vst [vmem:[#allocation17 + $0xf0] sm:$0xff] %v2410_v4  ;;  %v2349_v43 = vadd.f32 %v4860_v5, %v6466_v19  ;;  %v2413_v61 = vadd.f32 %v4876_v31, %v6466_v19  ;;  %v2340_v48 = vpop.f32.mrb[15].mxu0  ;;  %v2404_v47 = vpop.f32.mrb[15].mxu1 }
 0x641   : > { %2428 = vst [vmem:[#allocation17 + $0x60] sm:$0xff] %v2338_v63  ;;  %2444 = vst [vmem:[#allocation17 + $0xe0] sm:$0xff] %v2402_v42  ;;  %v2341_v41 = vadd.f32 %v6466_v19, %v2340_v48  ;;  %v2405_v16 = vadd.f32 %v6466_v19, %v2404_v47 }
 0x642   : > { %2431 = vst [vmem:[#allocation17 + $0x78] sm:$0xff] %v2349_v43  ;;  %2447 = vst [vmem:[#allocation17 + $0xf8] sm:$0xff] %v2413_v61 }
 0x643   : > { %2429 = vst [vmem:[#allocation17 + $0x68] sm:$0xff] %v2341_v41  ;;  %2445 = vst [vmem:[#allocation17 + $0xe8] sm:$0xff] %v2405_v16 }
 0x644 PF: > { %p4220_p2 = scmp.ge.s32.totalorder %s5643_s20, 2 }
 0x645   : > { %v7175_v2 = vmax.f32 (!%p4220_p2), %v6282_v23, 0.0  ;;  %v2453_v4 = vpack.c.bf16 (!%p4220_p2), %v2135_v24, %v2134_v27  ;;  %v2454_v19 = vpack.c.bf16 (!%p4220_p2), %v2137_v34, %v2136_v32  ;;  %v2455_v10 = vpack.c.bf16 (!%p4220_p2), %v2139_v33, %v2138_v55 }
 0x646   : > { %2451 = sbr.rel (%p4220_p2) target bundleno = 1617 (0x651), region = 108  ;;  %v2456_v18 = vpack.c.bf16 (!%p4220_p2), %v2141_v59, %v2140_v57  ;;  %v2457_v54 = vpack.c.bf16 (!%p4220_p2), %v2143_v58, %v2142_v39  ;;  %v7176_v27 = vmax.f32 (!%p4220_p2), %v6322_v62, 0.0  ;;  %v7177_v20 = vmax.f32 (!%p4220_p2), %v6330_v3, 0.0 }
 0x647   : > { %v2452_v45 = vpack.c.bf16 (!%p4220_p2), %v7175_v2, %v2132_v22  ;;  %v7178_v23 = vmax.f32 (!%p4220_p2), %v6319_v50, 0.0  ;;  %v7179_v24 = vmax.f32 (!%p4220_p2), %v6326_v0, 0.0  ;;  %2471 = vst [vmem:[#allocation3 + $0x8] sm:$0xff] (!%p4220_p2), %v2453_v4  ;;  %2472 = vst [vmem:[#allocation3 + $0x10] sm:$0xff] (!%p4220_p2), %v2454_v19  ;;  %v2460_v56 = vpack.c.bf16 (!%p4220_p2), %v2149_v13, %v2148_v11 }
 0x648   : > { %v2458_v22 = vpack.c.bf16 (!%p4220_p2), %v7177_v20, %v7176_v27  ;;  %2473 = vst [vmem:[#allocation3 + $0x18] sm:$0xff] (!%p4220_p2), %v2455_v10  ;;  %v2461_v55 = vpack.c.bf16 (!%p4220_p2), %v2151_v12, %v2150_v8  ;;  %v7180_v30 = vmax.f32 (!%p4220_p2), %v6362_v29, 0.0  ;;  %v7181_v36 = vmax.f32 (!%p4220_p2), %v6351_v14, 0.0  ;;  %2474 = vst [vmem:[#allocation3 + $0x20] sm:$0xff] (!%p4220_p2), %v2456_v18 }
 0x649   : > { %v2459_v26 = vpack.c.bf16 (!%p4220_p2), %v7179_v24, %v7178_v23  ;;  %2470 = vst [vmem:[#allocation3] sm:$0xff] (!%p4220_p2), %v2452_v45  ;;  %v7182_v33 = vmax.f32 (!%p4220_p2), %v6358_v21, 0.0  ;;  %2475 = vst [vmem:[#allocation3 + $0x28] sm:$0xff] (!%p4220_p2), %v2457_v54  ;;  %v7183_v35 = vmax.f32 (!%p4220_p2), %v6370_v60, 0.0  ;;  %v7184_v49 = vmax.f32 (!%p4220_p2), %v6378_v7, 0.0 }
 0x64a   : > { %v2462_v32 = vpack.c.bf16 (!%p4220_p2), %v7180_v30, %v2152_v28  ;;  %2476 = vst [vmem:[#allocation3 + $0x30] sm:$0xff] (!%p4220_p2), %v2458_v22  ;;  %v7185_v40 = vmax.f32 (!%p4220_p2), %v6367_v38, 0.0  ;;  %v7186_v57 = vmax.f32 (!%p4220_p2), %v6374_v1, 0.0  ;;  %v7187_v58 = vmax.f32 (!%p4220_p2), %v6386_v37, 0.0  ;;  %2478 = vst [vmem:[#allocation3 + $0x40] sm:$0xff] (!%p4220_p2), %v2460_v56 }
 0x64b   : > { %v2463_v34 = vpack.c.bf16 (!%p4220_p2), %v7182_v33, %v7181_v36  ;;  %2477 = vst [vmem:[#allocation3 + $0x38] sm:$0xff] (!%p4220_p2), %v2459_v26  ;;  %v2464_v39 = vpack.c.bf16 (!%p4220_p2), %v7184_v49, %v7183_v35  ;;  %v7188_v59 = vmax.f32 (!%p4220_p2), %v6394_v51, 0.0  ;;  %v7189_v62 = vmax.f32 (!%p4220_p2), %v6383_v17, 0.0  ;;  %2479 = vst [vmem:[#allocation3 + $0x48] sm:$0xff] (!%p4220_p2), %v2461_v55 }
 0x64c   : > { %v2465_v46 = vpack.c.bf16 (!%p4220_p2), %v7186_v57, %v7185_v40  ;;  %v7190_v0 = vmax.f32 (!%p4220_p2), %v6390_v25, 0.0  ;;  %2480 = vst [vmem:[#allocation3 + $0x50] sm:$0xff] (!%p4220_p2), %v2462_v32 }
 0x64d   : > { %v2466_v50 = vpack.c.bf16 %v7188_v59, %v7187_v58  ;;  %2481 = vst [vmem:[#allocation3 + $0x58] sm:$0xff] %v2463_v34  ;;  %2482 = vst [vmem:[#allocation3 + $0x60] sm:$0xff] %v2464_v39 }
 0x64e   : > { %v2467_v3 = vpack.c.bf16 %v7190_v0, %v7189_v62  ;;  %2483 = vst [vmem:[#allocation3 + $0x68] sm:$0xff] %v2465_v46 }
 0x64f   : > { %2484 = vst [vmem:[#allocation3 + $0x70] sm:$0xff] %v2466_v50 }
 0x650   : > { %2485 = vst [vmem:[#allocation3 + $0x78] sm:$0xff] %v2467_v3 }
 0x651 PF: > { %p2486_p6 = scmp.ge.s32.totalorder %s5643_s20, 2  ;;  %p2487_p3 = scmp.eq.s32.totalorder %s7233_s26, 0 }
 0x653   : > { %p2488_p13 = pnand %p2487_p3, %p2486_p6 }
 0x654   : > { %v6571_v51 = vld [vmem:[#allocation3] sm:$0xff] (!%p2488_p13)  ;;  %v6578_v6 = vld [vmem:[#allocation3 + $0x8] sm:$0xff] (!%p2488_p13)  ;;  %v6584_v11 = vld [vmem:[#allocation3 + $0x10] sm:$0xff] (!%p2488_p13)  ;;  %s2862_s4 = sld [smem:[#allocation4 + %s6041_s15]] (!%p2488_p13)  ;;  %p4272_p4 = scmp.ne.s32.totalorder (!%p2488_p13), %s5643_s20, 2 }
 0x655   : > { %2491 = sbr.rel (%p2488_p13) target bundleno = 2717 (0xa9d), region = 112  ;;  %v6569_v25 = vld [vmem:[#allocation3 + $0x40] sm:$0xff] (!%p2488_p13)  ;;  %v6590_v12 = vld [vmem:[#allocation3 + $0x18] sm:$0xff] (!%p2488_p13)  ;;  %v6598_v53 = vld [vmem:[#allocation3 + $0x68] sm:$0xff] (!%p2488_p13)  ;;  %v2884_v57 = vunpack.c.l.bf16 (!%p2488_p13), %v6571_v51  ;;  %v2885_v46 = vunpack.c.h.bf16 (!%p2488_p13), %v6571_v51 }
 0x656   : > { %v6573_v52 = vld [vmem:[#allocation3 + $0x48] sm:$0xff] (!%p2488_p13)  ;;  %4501 = vmatprep.subr.bf16.mxu0 (!%p2488_p13), %v6569_v25  ;;  %v6596_v14 = vld [vmem:[#allocation3 + $0x20] sm:$0xff] (!%p2488_p13)  ;;  %v6604_v28 = vld [vmem:[#allocation3 + $0x70] sm:$0xff] (!%p2488_p13) }
 0x657   : > { %4502 = vmatpush3.bf16.msra.mxu0 (!%p2488_p13), %v6571_v51  ;;  %v6580_v8 = vld [vmem:[#allocation3 + $0x50] sm:$0xff] (!%p2488_p13)  ;;  %v5296_v9 = vld [vmem:[#allocation9 + $0x4] ss:$8 sps:$4 sm:$0xff] (!%p2488_p13)   ;;  %v6610_v38 = vld [vmem:[#allocation3 + $0x78] sm:$0xff] (!%p2488_p13)  ;;  %v2887_v51 = vunpack.c.h.bf16 (!%p2488_p13), %v6578_v6 }
 0x658   : > { %4503 = vmatprep.subr.bf16.mxu0 (!%p2488_p13), %v6573_v52  ;;  %v6586_v44 = vld [vmem:[#allocation3 + $0x58] sm:$0xff] (!%p2488_p13)  ;;  %2733 = vmatprep.mubr.bf16.mxu0 (!%p2488_p13), %v5296_v9  ;;  %v6592_v13 = vld [vmem:[#allocation3 + $0x60] sm:$0xff] (!%p2488_p13)  ;;  %v6602_v21 = vld [vmem:[#allocation3 + $0x28] sm:$0xff] (!%p2488_p13) }
 0x659   : > { %v6608_v29 = vld [vmem:[#allocation3 + $0x30] sm:$0xff] (!%p2488_p13)  ;;  %v6613_v60 = vld [vmem:[#allocation3 + $0x38] sm:$0xff] (!%p2488_p13)  ;;  %v5294_v1 = vld [vmem:[#allocation9] ss:$8 sps:$4 sm:$0xff] (!%p2488_p13)  }
 0x65a   : > { %v5342_v7 = vld [vmem:[%s6028_s14] sm:$0xff] (!%p2488_p13)   ;;  %v5343_v17 = vld [vmem:[%s6028_s14 + $0x8] sm:$0xff] (!%p2488_p13)   ;;  %v5297_v37 = vld [vmem:[#allocation9 + $0x14] ss:$8 sps:$4 sm:$0xff] (!%p2488_p13)   ;;  %s2863_s30 = sadd.f32 (!%p2488_p13), 1.0, %s2862_s4 }
 0x65b   : > { %4504 = vmatpush3.bf16.msra.mxu0 (!%p2488_p13), %v6578_v6  ;;  %4877 = vmatprep.subr.bf16.mxu1 (!%p2488_p13), %v5342_v7  ;;  %v5344_v15 = vld [vmem:[%s6028_s14 + $0x10] sm:$0xff] (!%p2488_p13)   ;;  %v5345_v63 = vld [vmem:[%s6028_s14 + $0x18] sm:$0xff] (!%p2488_p13)   ;;  %v5300_v5 = vld [vmem:[#allocation9 + $0x24] ss:$8 sps:$4 sm:$0xff] (!%p2488_p13)  }
 0x65c   : > { %4505 = vmatprep.subr.bf16.mxu0 %v6580_v8  ;;  %4878 = vmatpush3.bf16.msra.mxu1 %v5342_v7  ;;  %v5299_v42 = vld [vmem:[#allocation9 + $0x10] ss:$8 sps:$4 sm:$0xff]   ;;  %v5302_v31 = vld [vmem:[#allocation9 + $0x20] ss:$8 sps:$4 sm:$0xff]   ;;  %v5303_v43 = vld [vmem:[#allocation9 + $0x34] ss:$8 sps:$4 sm:$0xff]   ;;  %v6628_v58 = vstv %s2863_s30 }
 0x65d   : > { %4879 = vmatprep.subr.bf16.mxu1 %v5343_v17  ;;  %v5305_v61 = vld [vmem:[#allocation9 + $0x30] ss:$8 sps:$4 sm:$0xff]   ;;  %v5306_v48 = vld [vmem:[#allocation9 + $0x44] ss:$8 sps:$4 sm:$0xff]   ;;  %v5308_v47 = vld [vmem:[#allocation9 + $0x40] ss:$8 sps:$4 sm:$0xff]   ;;  %v2917_v3 = vmul.f32 %v6628_v58, %v2884_v57  ;;  %v2918_v9 = vmul.f32 %v6628_v58, %v2885_v46 }
 0x65e   : > { %v5309_v41 = vld [vmem:[#allocation9 + $0x54] ss:$8 sps:$4 sm:$0xff]   ;;  %v5311_v16 = vld [vmem:[#allocation9 + $0x50] ss:$8 sps:$4 sm:$0xff]   ;;  %v5312_v2 = vld [vmem:[#allocation9 + $0x64] ss:$8 sps:$4 sm:$0xff]  }
 0x65f   : > { %4506 = vmatpush3.bf16.msra.mxu0 %v6584_v11  ;;  %v5314_v45 = vld [vmem:[#allocation9 + $0x60] ss:$8 sps:$4 sm:$0xff]   ;;  %v5315_v4 = vld [vmem:[#allocation9 + $0x74] ss:$8 sps:$4 sm:$0xff]   ;;  %v5317_v19 = vld [vmem:[#allocation9 + $0x70] ss:$8 sps:$4 sm:$0xff]  }
 0x660   : > { %4507 = vmatprep.subr.bf16.mxu0 %v6586_v44  ;;  %4880 = vmatpush3.bf16.msra.mxu1 %v5343_v17  ;;  %v5318_v10 = vld [vmem:[#allocation9 + $0x84] ss:$8 sps:$4 sm:$0xff]   ;;  %v5320_v18 = vld [vmem:[#allocation9 + $0x80] ss:$8 sps:$4 sm:$0xff]   ;;  %v5321_v54 = vld [vmem:[#allocation9 + $0x94] ss:$8 sps:$4 sm:$0xff]  }
 0x661   : > { %4881 = vmatprep.subr.bf16.mxu1 %v5344_v15  ;;  %v5323_v27 = vld [vmem:[#allocation9 + $0x90] ss:$8 sps:$4 sm:$0xff]   ;;  %v5324_v20 = vld [vmem:[#allocation9 + $0xa4] ss:$8 sps:$4 sm:$0xff]   ;;  %v5326_v22 = vld [vmem:[#allocation9 + $0xa0] ss:$8 sps:$4 sm:$0xff]  }
 0x662   : > { %v5327_v23 = vld [vmem:[#allocation9 + $0xb4] ss:$8 sps:$4 sm:$0xff]   ;;  %v5346_v24 = vld [vmem:[%s6028_s14 + $0x20] sm:$0xff]   ;;  %v5329_v26 = vld [vmem:[#allocation9 + $0xb0] ss:$8 sps:$4 sm:$0xff]   ;;  %s7197_s15 = sld [smem:[#allocation34_spill]] (!%p4272_p4) }
 0x663   : > { %4508 = vmatpush3.bf16.msra.mxu0 %v6590_v12  ;;  %v5330_v56 = vld [vmem:[#allocation9 + $0xc4] ss:$8 sps:$4 sm:$0xff]   ;;  %v5348_v30 = vld [vmem:[%s6028_s14 + $0x30] sm:$0xff]   ;;  %v5332_v32 = vld [vmem:[#allocation9 + $0xc0] ss:$8 sps:$4 sm:$0xff]  }
 0x664   : > { %4509 = vmatprep.subr.bf16.mxu0 %v6592_v13  ;;  %4882 = vmatpush3.bf16.msra.mxu1 %v5344_v15  ;;  %v5347_v55 = vld [vmem:[%s6028_s14 + $0x28] sm:$0xff]   ;;  %v5333_v36 = vld [vmem:[#allocation9 + $0xd4] ss:$8 sps:$4 sm:$0xff]   ;;  %v5335_v34 = vld [vmem:[#allocation9 + $0xd0] ss:$8 sps:$4 sm:$0xff]  }
 0x665   : > { %4883 = vmatprep.subr.bf16.mxu1 %v5345_v63  ;;  %v5349_v33 = vld [vmem:[%s6028_s14 + $0x38] sm:$0xff]   ;;  %v5336_v35 = vld [vmem:[#allocation9 + $0xe4] ss:$8 sps:$4 sm:$0xff]   ;;  %v5338_v49 = vld [vmem:[#allocation9 + $0xe0] ss:$8 sps:$4 sm:$0xff]  }
 0x666   : > { %v5339_v39 = vld [vmem:[#allocation9 + $0xf4] ss:$8 sps:$4 sm:$0xff]   ;;  %v5341_v40 = vld [vmem:[#allocation9 + $0xf0] ss:$8 sps:$4 sm:$0xff]  }
 0x667   : > { %4510 = vmatpush3.bf16.msra.mxu0 %v6596_v14 }
 0x668   : > { %4511 = vmatprep.subr.bf16.mxu0 %v6598_v53  ;;  %4884 = vmatpush3.bf16.msra.mxu1 %v5345_v63 }
 0x669   : > { %4885 = vmatprep.subr.bf16.mxu1 %v5346_v24 }
 0x66b   : > { %4512 = vmatpush3.bf16.msra.mxu0 %v6602_v21 }
 0x66c   : > { %4513 = vmatprep.subr.bf16.mxu0 %v6604_v28  ;;  %4886 = vmatpush3.bf16.msra.mxu1 %v5346_v24 }
 0x66d   : > { %4887 = vmatprep.subr.bf16.mxu1 %v5347_v55 }
 0x66f   : > { %4514 = vmatpush3.bf16.msra.mxu0 %v6608_v29 }
 0x670   : > { %4515 = vmatprep.subr.bf16.mxu0 %v6610_v38  ;;  %4888 = vmatpush3.bf16.msra.mxu1 %v5347_v55 }
 0x671   : > { %4889 = vmatprep.subr.bf16.mxu1 %v5348_v30 }
 0x673   : > { %4516 = vmatpush3.bf16.msra.mxu0 %v6613_v60 }
 0x674   : > { %4890 = vmatpush3.bf16.msra.mxu1 %v5348_v30 }
 0x675   : > { %4891 = vmatprep.subr.bf16.mxu1 %v5349_v33 }
 0x676   : > { %2734 = vmatmul.mubr.bf16.vlgmr.msra.gmra.mrb[0].mxu0 %v5294_v1  ;;  %v5350_v1 = vld [vmem:[%s6034_s3] sm:$0xff]  }
 0x677   : > { %2741 = vmatprep.mubr.bf16.mxu0 %v5297_v37  ;;  %v2886_v37 = vunpack.c.l.bf16 %v6578_v6  ;;  %v2889_v6 = vunpack.c.h.bf16 %v6584_v11 }
 0x678   : > { %4892 = vmatpush3.bf16.msra.mxu1 %v5349_v33 }
 0x679   : > { %4925 = vmatprep.subr.bf16.mxu1 %v5350_v1 }
 0x67e   : > { %2742 = vmatmul.mubr.bf16.gmra.mrb[4].mxu0 %v5299_v42 }
 0x67f   : > { %2749 = vmatprep.mubr.bf16.mxu0 %v5300_v5 }
 0x686   : > { %2750 = vmatmul.mubr.bf16.gmra.mrb[8].mxu0 %v5302_v31 }
 0x687   : > { %2757 = vmatprep.mubr.bf16.mxu0 %v5303_v43 }
 0x68e   : > { %2758 = vmatmul.mubr.bf16.gmra.mrb[12].mxu0 %v5305_v61  ;;  %v2919_v61 = vmul.f32 %v6628_v58, %v2886_v37 }
 0x68f   : > { %2765 = vmatprep.mubr.bf16.mxu0 %v5306_v48 }
 0x696   : > { %2766 = vmatmul.mubr.bf16.gmra.mrb[16].mxu0 %v5308_v47  ;;  %v2920_v47 = vmul.f32 %v6628_v58, %v2887_v51 }
 0x697   : > { %2773 = vmatprep.mubr.bf16.mxu0 %v5309_v41 }
 0x69e   : > { %2774 = vmatmul.mubr.bf16.gmra.mrb[20].mxu0 %v5311_v16 }
 0x69f   : > { %2781 = vmatprep.mubr.bf16.mxu0 %v5312_v2 }
 0x6a6   : > { %2782 = vmatmul.mubr.bf16.gmra.mrb[24].mxu0 %v5314_v45 }
 0x6a7   : > { %2789 = vmatprep.mubr.bf16.mxu0 %v5315_v4  ;;  %v2888_v4 = vunpack.c.l.bf16 %v6584_v11  ;;  %v2890_v11 = vunpack.c.l.bf16 %v6590_v12 }
 0x6ae   : > { %2790 = vmatmul.mubr.bf16.gmra.mrb[28].mxu0 %v5317_v19 }
 0x6af   : > { %2797 = vmatprep.mubr.bf16.mxu0 %v5318_v10 }
 0x6b6   : > { %2798 = vmatmul.mubr.bf16.gmra.mrb[32].mxu0 %v5320_v18  ;;  %v5351_v18 = vld [vmem:[%s6034_s3 + $0x8] sm:$0xff]  }
 0x6b7   : > { %2805 = vmatprep.mubr.bf16.mxu0 %v5321_v54 }
 0x6be   : > { %2806 = vmatmul.mubr.bf16.gmra.mrb[36].mxu0 %v5323_v27 }
 0x6bf   : > { %2813 = vmatprep.mubr.bf16.mxu0 %v5324_v20  ;;  %v2921_v20 = vmul.f32 %v6628_v58, %v2888_v4 }
 0x6c6   : > { %2814 = vmatmul.mubr.bf16.gmra.mrb[40].mxu0 %v5326_v22 }
 0x6c7   : > { %2821 = vmatprep.mubr.bf16.mxu0 %v5327_v23  ;;  %v2922_v23 = vmul.f32 %v6628_v58, %v2889_v6 }
 0x6ce   : > { %2822 = vmatmul.mubr.bf16.gmra.mrb[44].mxu0 %v5329_v26 }
 0x6cf   : > { %2829 = vmatprep.mubr.bf16.mxu0 %v5330_v56  ;;  %v5352_v56 = vld [vmem:[%s6034_s3 + $0x10] sm:$0xff]  }
 0x6d6   : > { %2830 = vmatmul.mubr.bf16.gmra.mrb[48].mxu0 %v5332_v32  ;;  %v2891_v32 = vunpack.c.h.bf16 %v6590_v12  ;;  %v5354_v12 = vld [vmem:[%s6034_s3 + $0x20] sm:$0xff]  }
 0x6d7   : > { %2837 = vmatprep.mubr.bf16.mxu0 %v5333_v36 }
 0x6d8   : > { %v2924_v57 = vmul.f32 %v6628_v58, %v2891_v32 }
 0x6de   : > { %2838 = vmatmul.mubr.bf16.gmra.mrb[52].mxu0 %v5335_v34  ;;  %v5353_v34 = vld [vmem:[%s6034_s3 + $0x18] sm:$0xff]  }
 0x6df   : > { %2845 = vmatprep.mubr.bf16.mxu0 %v5336_v35 }
 0x6e6   : > { %2846 = vmatmul.mubr.bf16.gmra.mrb[56].mxu0 %v5338_v49 }
 0x6e7   : > { %2853 = vmatprep.mubr.bf16.mxu0 %v5339_v39  ;;  %v2923_v39 = vmul.f32 %v6628_v58, %v2890_v11 }
 0x6ee   : > { %2854 = vmatmul.mubr.bf16.gmra.mrb[60].mxu0 %v5341_v40 }
 0x749   : > { %v4517_v59 = vpop.f32.mrb[0].mxu0 }
 0x74a   : > { %v4518_v50 = vpop.f32.mrb[1].mxu0 }
 0x74b   : > { %v4519_v62 = vadd.f32 %v4518_v50, %v4517_v59  ;;  %v4520_v0 = vpop.f32.mrb[2].mxu0 }
 0x74c   : > { %v4521_v7 = vpop.f32.mrb[3].mxu0 }
 0x74d   : > { %v4522_v17 = vadd.f32 %v4521_v7, %v4520_v0  ;;  %v2949_v15 = vadd.f32 %v4519_v62, %v2917_v3  ;;  %v2892_v0 = vunpack.c.l.bf16 %v6596_v14  ;;  %v2893_v3 = vunpack.c.h.bf16 %v6596_v14  ;;  %v5355_v7 = vld [vmem:[%s6034_s3 + $0x28] sm:$0xff]  }
 0x74e   : > { %v2894_v14 = vunpack.c.l.bf16 %v6602_v21 }
 0x74f   : > { %v2950_v63 = vadd.f32 %v4522_v17, %v2918_v9  ;;  %v2926_v51 = vmul.f32 %v6628_v58, %v2893_v3 }
 0x751   : > { %v4523_v42 = vpop.f32.mrb[4].mxu0  ;;  %v2981_v5 = vpack.c.bf16 %v2950_v63, %v2949_v15  ;;  %v2925_v15 = vmul.f32 %v6628_v58, %v2892_v0  ;;  %v2901_v0 = vunpack.c.h.bf16 %v6569_v25 }
 0x752   : > { %v4524_v31 = vpop.f32.mrb[5].mxu0 }
 0x753   : > { %v4525_v43 = vadd.f32 %v4524_v31, %v4523_v42  ;;  %v4526_v48 = vpop.f32.mrb[6].mxu0  ;;  %4893 = vmatprep.mubr.bf16.mxu1 %v2981_v5 }
 0x754   : > { %v4527_v41 = vpop.f32.mrb[7].mxu0 }
 0x755   : > { %v4528_v16 = vadd.f32 %v4527_v41, %v4526_v48  ;;  %v2951_v2 = vadd.f32 %v4525_v43, %v2919_v61  ;;  %v2895_v61 = vunpack.c.h.bf16 %v6602_v21 }
 0x757   : > { %v2952_v45 = vadd.f32 %v4528_v16, %v2920_v47  ;;  %v2928_v4 = vmul.f32 %v6628_v58, %v2895_v61 }
 0x759   : > { %v4529_v19 = vpop.f32.mrb[8].mxu0  ;;  %v2982_v10 = vpack.c.bf16 %v2952_v45, %v2951_v2  ;;  %v2927_v2 = vmul.f32 %v6628_v58, %v2894_v14 }
 0x75a   : > { %v4530_v54 = vpop.f32.mrb[9].mxu0 }
 0x75b   : > { %v4531_v27 = vadd.f32 %v4530_v54, %v4529_v19  ;;  %v4532_v22 = vpop.f32.mrb[10].mxu0  ;;  %4894 = vmatmul.mubr.bf16.vlgmr.msra.gmra.mrb[0].mxu1 %v2982_v10  ;;  %v2896_v54 = vunpack.c.l.bf16 %v6608_v29 }
 0x75c   : > { %v4533_v24 = vpop.f32.mrb[11].mxu0  ;;  %4926 = vmatpush3.bf16.msra.mxu1 %v5350_v1 }
 0x75d   : > { %v4534_v26 = vadd.f32 %v4533_v24, %v4532_v22  ;;  %4927 = vmatprep.subr.bf16.mxu1 %v5351_v18  ;;  %v2953_v55 = vadd.f32 %v4531_v27, %v2921_v20  ;;  %v2897_v27 = vunpack.c.h.bf16 %v6608_v29  ;;  %v2929_v24 = vmul.f32 %v6628_v58, %v2896_v54 }
 0x75f   : > { %v2954_v30 = vadd.f32 %v4534_v26, %v2922_v23 }
 0x760   : > { %4928 = vmatpush3.bf16.msra.mxu1 %v5351_v18 }
 0x761   : > { %v4535_v36 = vpop.f32.mrb[12].mxu0  ;;  %v2983_v33 = vpack.c.bf16 %v2954_v30, %v2953_v55  ;;  %4929 = vmatprep.subr.bf16.mxu1 %v5352_v56 }
 0x762   : > { %v4536_v35 = vpop.f32.mrb[13].mxu0 }
 0x763   : > { %v4537_v49 = vadd.f32 %v4536_v35, %v4535_v36  ;;  %v4538_v40 = vpop.f32.mrb[14].mxu0  ;;  %4897 = vmatprep.mubr.bf16.mxu1 %v2983_v33  ;;  %v2898_v36 = vunpack.c.l.bf16 %v6613_v60  ;;  %v2899_v33 = vunpack.c.h.bf16 %v6613_v60 }
 0x764   : > { %v4539_v46 = vpop.f32.mrb[15].mxu0  ;;  %4930 = vmatpush3.bf16.msra.mxu1 %v5352_v56  ;;  %v2930_v56 = vmul.f32 %v6628_v58, %v2897_v27 }
 0x765   : > { %v4540_v59 = vadd.f32 %v4539_v46, %v4538_v40  ;;  %4931 = vmatprep.subr.bf16.mxu1 %v5353_v34  ;;  %v2955_v50 = vadd.f32 %v4537_v49, %v2923_v39  ;;  %v2931_v39 = vmul.f32 %v6628_v58, %v2898_v36 }
 0x767   : > { %v2956_v62 = vadd.f32 %v4540_v59, %v2924_v57  ;;  %v2932_v57 = vmul.f32 %v6628_v58, %v2899_v33 }
 0x768   : > { %4932 = vmatpush3.bf16.msra.mxu1 %v5353_v34 }
 0x769   : > { %v4541_v9 = vpop.f32.mrb[16].mxu0  ;;  %v2984_v1 = vpack.c.bf16 %v2956_v62, %v2955_v50  ;;  %4933 = vmatprep.subr.bf16.mxu1 %v5354_v12  ;;  %v2900_v62 = vunpack.c.l.bf16 %v6569_v25 }
 0x76a   : > { %v4542_v17 = vpop.f32.mrb[17].mxu0 }
 0x76b   : > { %v4543_v37 = vadd.f32 %v4542_v17, %v4541_v9  ;;  %v4544_v63 = vpop.f32.mrb[18].mxu0  ;;  %4898 = vmatmul.mubr.bf16.gmra.mrb[4].mxu1 %v2984_v1 }
 0x76c   : > { %v4545_v42 = vpop.f32.mrb[19].mxu0  ;;  %4934 = vmatpush3.bf16.msra.mxu1 %v5354_v12 }
 0x76d   : > { %v4546_v5 = vadd.f32 %v4545_v42, %v4544_v63  ;;  %4935 = vmatprep.subr.bf16.mxu1 %v5355_v7  ;;  %v2957_v31 = vadd.f32 %v4543_v37, %v2925_v15  ;;  %v2934_v37 = vmul.f32 %v6628_v58, %v2901_v0 }
 0x76f   : > { %v2958_v43 = vadd.f32 %v4546_v5, %v2926_v51  ;;  %v2902_v5 = vunpack.c.l.bf16 %v6573_v52 }
 0x770   : > { %4936 = vmatpush3.bf16.msra.mxu1 %v5355_v7  ;;  %v2933_v7 = vmul.f32 %v6628_v58, %v2900_v62 }
 0x771   : > { %v4547_v48 = vpop.f32.mrb[20].mxu0  ;;  %v2985_v47 = vpack.c.bf16 %v2958_v43, %v2957_v31  ;;  %v2903_v31 = vunpack.c.h.bf16 %v6573_v52 }
 0x772   : > { %v4548_v41 = vpop.f32.mrb[21].mxu0 }
 0x773   : > { %v4549_v16 = vadd.f32 %v4548_v41, %v4547_v48  ;;  %v4550_v45 = vpop.f32.mrb[22].mxu0  ;;  %4901 = vmatprep.mubr.bf16.mxu1 %v2985_v47  ;;  %v2935_v48 = vmul.f32 %v6628_v58, %v2902_v5  ;;  %v2936_v41 = vmul.f32 %v6628_v58, %v2903_v31 }
 0x774   : > { %v4551_v6 = vpop.f32.mrb[23].mxu0 }
 0x775   : > { %v4552_v19 = vadd.f32 %v4551_v6, %v4550_v45  ;;  %v2959_v10 = vadd.f32 %v4549_v16, %v2927_v2  ;;  %v2904_v6 = vunpack.c.l.bf16 %v6580_v8 }
 0x777   : > { %v2960_v18 = vadd.f32 %v4552_v19, %v2928_v4  ;;  %v2905_v19 = vunpack.c.h.bf16 %v6580_v8  ;;  %v2937_v27 = vmul.f32 %v6628_v58, %v2904_v6 }
 0x779   : > { %v4553_v21 = vpop.f32.mrb[24].mxu0  ;;  %v2986_v20 = vpack.c.bf16 %v2960_v18, %v2959_v10 }
 0x77a   : > { %v4554_v22 = vpop.f32.mrb[25].mxu0 }
 0x77b   : > { %v4555_v23 = vadd.f32 %v4554_v22, %v4553_v21  ;;  %v4556_v26 = vpop.f32.mrb[26].mxu0  ;;  %4902 = vmatmul.mubr.bf16.gmra.mrb[8].mxu1 %v2986_v20  ;;  %v2938_v20 = vmul.f32 %v6628_v58, %v2905_v19 }
 0x77c   : > { %v4557_v55 = vpop.f32.mrb[27].mxu0 }
 0x77d   : > { %v4558_v30 = vadd.f32 %v4557_v55, %v4556_v26  ;;  %v2961_v11 = vadd.f32 %v4555_v23, %v2929_v24  ;;  %v2907_v55 = vunpack.c.h.bf16 %v6586_v44 }
 0x77f   : > { %v2962_v32 = vadd.f32 %v4558_v30, %v2930_v56  ;;  %v2906_v56 = vunpack.c.l.bf16 %v6586_v44 }
 0x781   : > { %v4559_v34 = vpop.f32.mrb[28].mxu0  ;;  %v2987_v29 = vpack.c.bf16 %v2962_v32, %v2961_v11  ;;  %v2939_v36 = vmul.f32 %v6628_v58, %v2906_v56 }
 0x782   : > { %v4560_v35 = vpop.f32.mrb[29].mxu0 }
 0x783   : > { %v4561_v49 = vadd.f32 %v4560_v35, %v4559_v34  ;;  %v4562_v40 = vpop.f32.mrb[30].mxu0  ;;  %4905 = vmatprep.mubr.bf16.mxu1 %v2987_v29  ;;  %v2940_v34 = vmul.f32 %v6628_v58, %v2907_v55 }
 0x784   : > { %v4563_v46 = vpop.f32.mrb[31].mxu0 }
 0x785   : > { %v4564_v59 = vadd.f32 %v4563_v46, %v4562_v40  ;;  %v2963_v12 = vadd.f32 %v4561_v49, %v2931_v39  ;;  %v2908_v40 = vunpack.c.l.bf16 %v6592_v13 }
 0x787   : > { %v2964_v50 = vadd.f32 %v4564_v59, %v2932_v57  ;;  %v2909_v57 = vunpack.c.h.bf16 %v6592_v13  ;;  %v5356_v13 = vld [vmem:[%s6034_s3 + $0x30] sm:$0xff]  }
 0x788   : > { %4937 = vmatprep.subr.bf16.mxu1 %v5356_v13 }
 0x789   : > { %v4565_v3 = vpop.f32.mrb[32].mxu0  ;;  %v2988_v60 = vpack.c.bf16 %v2964_v50, %v2963_v12  ;;  %v2941_v50 = vmul.f32 %v6628_v58, %v2908_v40  ;;  %v2942_v0 = vmul.f32 %v6628_v58, %v2909_v57  ;;  %4938 = vmatpush3.bf16.msra.mxu1 %v5356_v13 }
 0x78a   : > { %v4566_v9 = vpop.f32.mrb[33].mxu0 }
 0x78b   : > { %v4567_v1 = vadd.f32 %v4566_v9, %v4565_v3  ;;  %v4568_v17 = vpop.f32.mrb[34].mxu0  ;;  %4906 = vmatmul.mubr.bf16.gmra.mrb[12].mxu1 %v2988_v60 }
 0x78c   : > { %v4569_v15 = vpop.f32.mrb[35].mxu0 }
 0x78d   : > { %v4570_v63 = vadd.f32 %v4569_v15, %v4568_v17  ;;  %v2965_v51 = vadd.f32 %v4567_v1, %v2933_v7  ;;  %v2910_v7 = vunpack.c.l.bf16 %v6598_v53  ;;  %v2911_v17 = vunpack.c.h.bf16 %v6598_v53 }
 0x78f   : > { %v2966_v42 = vadd.f32 %v4570_v63, %v2934_v37  ;;  %v2944_v31 = vmul.f32 %v6628_v58, %v2911_v17 }
 0x791   : > { %v4571_v43 = vpop.f32.mrb[36].mxu0  ;;  %v2989_v25 = vpack.c.bf16 %v2966_v42, %v2965_v51  ;;  %v2943_v42 = vmul.f32 %v6628_v58, %v2910_v7 }
 0x792   : > { %v4572_v14 = vpop.f32.mrb[37].mxu0 }
 0x793   : > { %v4573_v61 = vadd.f32 %v4572_v14, %v4571_v43  ;;  %v4574_v47 = vpop.f32.mrb[38].mxu0  ;;  %4909 = vmatprep.mubr.bf16.mxu1 %v2989_v25  ;;  %v5357_v43 = vld [vmem:[%s6034_s3 + $0x38] sm:$0xff]  }
 0x794   : > { %v4575_v16 = vpop.f32.mrb[39].mxu0  ;;  %4939 = vmatprep.subr.bf16.mxu1 %v5357_v43 }
 0x795   : > { %v4576_v2 = vadd.f32 %v4575_v16, %v4574_v47  ;;  %v2967_v45 = vadd.f32 %v4573_v61, %v2935_v48  ;;  %4940 = vmatpush3.bf16.msra.mxu1 %v5357_v43  ;;  %v2912_v48 = vunpack.c.l.bf16 %v6604_v28  ;;  %v2913_v47 = vunpack.c.h.bf16 %v6604_v28 }
 0x797   : > { %v2968_v4 = vadd.f32 %v4576_v2, %v2936_v41  ;;  %v2946_v19 = vmul.f32 %v6628_v58, %v2913_v47 }
 0x799   : > { %v4577_v10 = vpop.f32.mrb[40].mxu0  ;;  %v2990_v52 = vpack.c.bf16 %v2968_v4, %v2967_v45  ;;  %v2945_v4 = vmul.f32 %v6628_v58, %v2912_v48 }
 0x79a   : > { %v4578_v18 = vpop.f32.mrb[41].mxu0 }
 0x79b   : > { %v4579_v54 = vadd.f32 %v4578_v18, %v4577_v10  ;;  %v4580_v21 = vpop.f32.mrb[42].mxu0  ;;  %4910 = vmatmul.mubr.bf16.gmra.mrb[16].mxu1 %v2990_v52 }
 0x79c   : > { %v4581_v22 = vpop.f32.mrb[43].mxu0 }
 0x79d   : > { %v4582_v23 = vadd.f32 %v4581_v22, %v4580_v21  ;;  %v2969_v24 = vadd.f32 %v4579_v54, %v2937_v27  ;;  %v2914_v27 = vunpack.c.l.bf16 %v6610_v38  ;;  %v2915_v21 = vunpack.c.h.bf16 %v6610_v38 }
 0x79f   : > { %v2970_v26 = vadd.f32 %v4582_v23, %v2938_v20  ;;  %v2948_v56 = vmul.f32 %v6628_v58, %v2915_v21 }
 0x7a1   : > { %v4583_v30 = vpop.f32.mrb[44].mxu0  ;;  %v2991_v8 = vpack.c.bf16 %v2970_v26, %v2969_v24  ;;  %v2947_v24 = vmul.f32 %v6628_v58, %v2914_v27 }
 0x7a2   : > { %v4584_v11 = vpop.f32.mrb[45].mxu0 }
 0x7a3   : > { %v4585_v32 = vadd.f32 %v4584_v11, %v4583_v30  ;;  %v4586_v33 = vpop.f32.mrb[46].mxu0  ;;  %4913 = vmatprep.mubr.bf16.mxu1 %v2991_v8 }
 0x7a4   : > { %v4587_v29 = vpop.f32.mrb[47].mxu0 }
 0x7a5   : > { %v4588_v35 = vadd.f32 %v4587_v29, %v4586_v33  ;;  %v2971_v49 = vadd.f32 %v4585_v32, %v2939_v36  ;;  %v6701_v36 = vld [vmem:[%s6049_s5] ss:$0 sm:$0xff] }
 0x7a7   : > { %v2972_v39 = vadd.f32 %v4588_v35, %v2940_v34 }
 0x7a9   : > { %v4589_v44 = vpop.f32.mrb[48].mxu0  ;;  %v2992_v46 = vpack.c.bf16 %v2972_v39, %v2971_v49 }
 0x7aa   : > { %v4590_v59 = vpop.f32.mrb[49].mxu0 }
 0x7ab   : > { %v4591_v12 = vadd.f32 %v4590_v59, %v4589_v44  ;;  %v4592_v62 = vpop.f32.mrb[50].mxu0  ;;  %4914 = vmatmul.mubr.bf16.gmra.mrb[20].mxu1 %v2992_v46 }
 0x7ac   : > { %v4593_v3 = vpop.f32.mrb[51].mxu0 }
 0x7ad   : > { %v4594_v60 = vadd.f32 %v4593_v3, %v4592_v62  ;;  %v2973_v9 = vadd.f32 %v4591_v12, %v2941_v50 }
 0x7af   : > { %v2974_v1 = vadd.f32 %v4594_v60, %v2942_v0 }
 0x7b1   : > { %v4595_v37 = vpop.f32.mrb[52].mxu0  ;;  %v2993_v15 = vpack.c.bf16 %v2974_v1, %v2973_v9 }
 0x7b2   : > { %v4596_v63 = vpop.f32.mrb[53].mxu0 }
 0x7b3   : > { %v4597_v51 = vadd.f32 %v4596_v63, %v4595_v37  ;;  %v4598_v5 = vpop.f32.mrb[54].mxu0  ;;  %4917 = vmatprep.mubr.bf16.mxu1 %v2993_v15 }
 0x7b4   : > { %v4599_v25 = vpop.f32.mrb[55].mxu0 }
 0x7b5   : > { %v4600_v14 = vadd.f32 %v4599_v25, %v4598_v5  ;;  %v2975_v61 = vadd.f32 %v4597_v51, %v2943_v42 }
 0x7b7   : > { %v2976_v53 = vadd.f32 %v4600_v14, %v2944_v31 }
 0x7b9   : > { %v4601_v41 = vpop.f32.mrb[56].mxu0  ;;  %v2994_v16 = vpack.c.bf16 %v2976_v53, %v2975_v61 }
 0x7ba   : > { %v4602_v2 = vpop.f32.mrb[57].mxu0 }
 0x7bb   : > { %v4603_v45 = vadd.f32 %v4602_v2, %v4601_v41  ;;  %v4604_v6 = vpop.f32.mrb[58].mxu0  ;;  %4918 = vmatmul.mubr.bf16.gmra.mrb[24].mxu1 %v2994_v16 }
 0x7bc   : > { %v4605_v10 = vpop.f32.mrb[59].mxu0 }
 0x7bd   : > { %v4606_v52 = vadd.f32 %v4605_v10, %v4604_v6  ;;  %v2977_v18 = vadd.f32 %v4603_v45, %v2945_v4 }
 0x7bf   : > { %v2978_v54 = vadd.f32 %v4606_v52, %v2946_v19 }
 0x7c1   : > { %v4607_v28 = vpop.f32.mrb[60].mxu0  ;;  %v2995_v20 = vpack.c.bf16 %v2978_v54, %v2977_v18 }
 0x7c2   : > { %v4608_v22 = vpop.f32.mrb[61].mxu0 }
 0x7c3   : > { %v4609_v23 = vadd.f32 %v4608_v22, %v4607_v28  ;;  %v4610_v26 = vpop.f32.mrb[62].mxu0  ;;  %4921 = vmatprep.mubr.bf16.mxu1 %v2995_v20 }
 0x7c4   : > { %v4611_v55 = vpop.f32.mrb[63].mxu0 }
 0x7c5   : > { %v4612_v30 = vadd.f32 %v4611_v55, %v4610_v26  ;;  %v2979_v8 = vadd.f32 %v4609_v23, %v2947_v24 }
 0x7c7   : > { %v2980_v11 = vadd.f32 %v4612_v30, %v2948_v56 }
 0x7c9   : > { %v2996_v32 = vpack.c.bf16 %v2980_v11, %v2979_v8 }
 0x7cb   : > { %4922 = vmatmul.mubr.bf16.gmra.mrb[28].mxu1 %v2996_v32 }
 0x82e   : > { %v4895_v33 = vpop.f32.mrb[0].mxu1 }
 0x82f   : > { %v3111_v38 = vadd.f32 %v4895_v33, %v6701_v36  ;;  %v3102_v34 = vpop.f32.mrb[1].mxu1 }
 0x830   : > { %v3103_v29 = vadd.f32 %v6701_v36, %v3102_v34  ;;  %v4896_v35 = vpop.f32.mrb[2].mxu1 }
 0x831   : > { %v3114_v49 = vadd.f32 %v4896_v35, %v6701_v36  ;;  %v3105_v39 = vpop.f32.mrb[3].mxu1  ;;  %v3231_v40 = vmax.f32 %v3111_v38, 0.0 }
 0x832   : > { %v3106_v58 = vadd.f32 %v6701_v36, %v3105_v39  ;;  %v3229_v44 = vmax.f32 %v3103_v29, 0.0 }
 0x833   : > { %v3232_v57 = vmax.f32 %v3114_v49, 0.0 }
 0x834   : > { %v3230_v46 = vmax.f32 %v3106_v58, 0.0 }
 0x835   : > { %v3262_v59 = vpack.c.bf16 %v3232_v57, %v3231_v40 }
 0x836   : > { %v3261_v12 = vpack.c.bf16 %v3230_v46, %v3229_v44 }
 0x838   : > { %4941 = vmatprep.mubr.bf16.mxu1 %v3261_v12 }
 0x839   : > { %4942 = vmatmul.mubr.bf16.vlgmr.msra.gmra.mrb[32].mxu1 %v3262_v59 }
 0x83e   : > { %v4899_v50 = vpop.f32.mrb[4].mxu1 }
 0x83f   : > { %v3127_v62 = vadd.f32 %v4899_v50, %v6701_v36  ;;  %v3118_v0 = vpop.f32.mrb[5].mxu1 }
 0x840   : > { %v3119_v3 = vadd.f32 %v6701_v36, %v3118_v0  ;;  %v4900_v60 = vpop.f32.mrb[6].mxu1 }
 0x841   : > { %v3130_v9 = vadd.f32 %v4900_v60, %v6701_v36  ;;  %v3121_v1 = vpop.f32.mrb[7].mxu1  ;;  %v3235_v17 = vmax.f32 %v3127_v62, 0.0 }
 0x842   : > { %v3122_v7 = vadd.f32 %v6701_v36, %v3121_v1  ;;  %v3233_v37 = vmax.f32 %v3119_v3, 0.0 }
 0x843   : > { %v3236_v13 = vmax.f32 %v3130_v9, 0.0 }
 0x844   : > { %v3234_v15 = vmax.f32 %v3122_v7, 0.0 }
 0x845   : > { %v3264_v63 = vpack.c.bf16 %v3236_v13, %v3235_v17 }
 0x846   : > { %v3263_v51 = vpack.c.bf16 %v3234_v15, %v3233_v37 }
 0x848   : > { %4945 = vmatprep.mubr.bf16.mxu1 %v3263_v51 }
 0x849   : > { %4946 = vmatmul.mubr.bf16.gmra.mrb[36].mxu1 %v3264_v63 }
 0x84e   : > { %v4903_v42 = vpop.f32.mrb[8].mxu1 }
 0x84f   : > { %v3143_v5 = vadd.f32 %v4903_v42, %v6701_v36  ;;  %v3134_v31 = vpop.f32.mrb[9].mxu1 }
 0x850   : > { %v3135_v43 = vadd.f32 %v6701_v36, %v3134_v31  ;;  %v4904_v25 = vpop.f32.mrb[10].mxu1 }
 0x851   : > { %v3146_v14 = vadd.f32 %v4904_v25, %v6701_v36  ;;  %v3137_v61 = vpop.f32.mrb[11].mxu1  ;;  %v3239_v48 = vmax.f32 %v3143_v5, 0.0 }
 0x852   : > { %v3138_v53 = vadd.f32 %v6701_v36, %v3137_v61  ;;  %v3237_v41 = vmax.f32 %v3135_v43, 0.0 }
 0x853   : > { %v3240_v47 = vmax.f32 %v3146_v14, 0.0 }
 0x854   : > { %v3238_v16 = vmax.f32 %v3138_v53, 0.0 }
 0x855   : > { %v3266_v2 = vpack.c.bf16 %v3240_v47, %v3239_v48 }
 0x856   : > { %v3265_v45 = vpack.c.bf16 %v3238_v16, %v3237_v41 }
 0x858   : > { %4949 = vmatprep.mubr.bf16.mxu1 %v3265_v45 }
 0x859   : > { %4950 = vmatmul.mubr.bf16.gmra.mrb[40].mxu1 %v3266_v2 }
 0x85e   : > { %v4907_v4 = vpop.f32.mrb[12].mxu1 }
 0x85f   : > { %v3159_v6 = vadd.f32 %v4907_v4, %v6701_v36  ;;  %v3150_v19 = vpop.f32.mrb[13].mxu1 }
 0x860   : > { %v3151_v10 = vadd.f32 %v6701_v36, %v3150_v19  ;;  %v4908_v52 = vpop.f32.mrb[14].mxu1 }
 0x861   : > { %v3162_v18 = vadd.f32 %v4908_v52, %v6701_v36  ;;  %v3153_v54 = vpop.f32.mrb[15].mxu1  ;;  %v3243_v21 = vmax.f32 %v3159_v6, 0.0 }
 0x862   : > { %v3154_v27 = vadd.f32 %v6701_v36, %v3153_v54  ;;  %v3241_v20 = vmax.f32 %v3151_v10, 0.0 }
 0x863   : > { %v3244_v28 = vmax.f32 %v3162_v18, 0.0 }
 0x864   : > { %v3242_v22 = vmax.f32 %v3154_v27, 0.0  ;;  %v6736_v27 = vld [vmem:[%s6054_s6] ss:$0 sm:$0xff] }
 0x865   : > { %v3268_v23 = vpack.c.bf16 %v3244_v28, %v3243_v21 }
 0x866   : > { %v3267_v24 = vpack.c.bf16 %v3242_v22, %v3241_v20 }
 0x868   : > { %4953 = vmatprep.mubr.bf16.mxu1 %v3267_v24 }
 0x869   : > { %4954 = vmatmul.mubr.bf16.gmra.mrb[44].mxu1 %v3268_v23 }
 0x86e   : > { %v4911_v26 = vpop.f32.mrb[16].mxu1 }
 0x86f   : > { %v3175_v56 = vadd.f32 %v4911_v26, %v6701_v36  ;;  %v3166_v55 = vpop.f32.mrb[17].mxu1 }
 0x870   : > { %v3167_v30 = vadd.f32 %v6701_v36, %v3166_v55  ;;  %v4912_v8 = vpop.f32.mrb[18].mxu1 }
 0x871   : > { %v3178_v11 = vadd.f32 %v4912_v8, %v6701_v36  ;;  %v3169_v32 = vpop.f32.mrb[19].mxu1  ;;  %v3247_v38 = vmax.f32 %v3175_v56, 0.0 }
 0x872   : > { %v3170_v33 = vadd.f32 %v6701_v36, %v3169_v32  ;;  %v3245_v29 = vmax.f32 %v3167_v30, 0.0 }
 0x873   : > { %v3248_v34 = vmax.f32 %v3178_v11, 0.0 }
 0x874   : > { %v3246_v35 = vmax.f32 %v3170_v33, 0.0 }
 0x875   : > { %v3270_v49 = vpack.c.bf16 %v3248_v34, %v3247_v38 }
 0x876   : > { %v3269_v39 = vpack.c.bf16 %v3246_v35, %v3245_v29 }
 0x878   : > { %4957 = vmatprep.mubr.bf16.mxu1 %v3269_v39 }
 0x879   : > { %4958 = vmatmul.mubr.bf16.gmra.mrb[48].mxu1 %v3270_v49 }
 0x87e   : > { %v4915_v58 = vpop.f32.mrb[20].mxu1 }
 0x87f   : > { %v3191_v40 = vadd.f32 %v4915_v58, %v6701_v36  ;;  %v3182_v57 = vpop.f32.mrb[21].mxu1 }
 0x880   : > { %v3183_v44 = vadd.f32 %v6701_v36, %v3182_v57  ;;  %v4916_v46 = vpop.f32.mrb[22].mxu1 }
 0x881   : > { %v3194_v59 = vadd.f32 %v4916_v46, %v6701_v36  ;;  %v3185_v12 = vpop.f32.mrb[23].mxu1  ;;  %v3251_v62 = vmax.f32 %v3191_v40, 0.0 }
 0x882   : > { %v3186_v50 = vadd.f32 %v6701_v36, %v3185_v12  ;;  %v3249_v3 = vmax.f32 %v3183_v44, 0.0 }
 0x883   : > { %v3252_v0 = vmax.f32 %v3194_v59, 0.0 }
 0x884   : > { %v3250_v60 = vmax.f32 %v3186_v50, 0.0 }
 0x885   : > { %v3272_v9 = vpack.c.bf16 %v3252_v0, %v3251_v62 }
 0x886   : > { %v3271_v1 = vpack.c.bf16 %v3250_v60, %v3249_v3 }
 0x888   : > { %4961 = vmatprep.mubr.bf16.mxu1 %v3271_v1 }
 0x889   : > { %4962 = vmatmul.mubr.bf16.gmra.mrb[52].mxu1 %v3272_v9 }
 0x88e   : > { %v4919_v7 = vpop.f32.mrb[24].mxu1 }
 0x88f   : > { %v3207_v17 = vadd.f32 %v4919_v7, %v6701_v36  ;;  %v3198_v13 = vpop.f32.mrb[25].mxu1 }
 0x890   : > { %v3199_v37 = vadd.f32 %v6701_v36, %v3198_v13  ;;  %v4920_v15 = vpop.f32.mrb[26].mxu1 }
 0x891   : > { %v3210_v63 = vadd.f32 %v4920_v15, %v6701_v36  ;;  %v3201_v51 = vpop.f32.mrb[27].mxu1  ;;  %v3255_v5 = vmax.f32 %v3207_v17, 0.0 }
 0x892   : > { %v3202_v42 = vadd.f32 %v6701_v36, %v3201_v51  ;;  %v3253_v43 = vmax.f32 %v3199_v37, 0.0 }
 0x893   : > { %v3256_v31 = vmax.f32 %v3210_v63, 0.0 }
 0x894   : > { %v3254_v25 = vmax.f32 %v3202_v42, 0.0 }
 0x895   : > { %v3274_v14 = vpack.c.bf16 %v3256_v31, %v3255_v5  ;;  %v5361_v31 = vld [vmem:[#allocation15 + $0x18] sm:$0xff] (!%p4272_p4)  }
 0x896   : > { %v3273_v61 = vpack.c.bf16 %v3254_v25, %v3253_v43 }
 0x898   : > { %4965 = vmatprep.mubr.bf16.mxu1 %v3273_v61 }
 0x899   : > { %4966 = vmatmul.mubr.bf16.gmra.mrb[56].mxu1 %v3274_v14 }
 0x89e   : > { %v4923_v53 = vpop.f32.mrb[28].mxu1 }
 0x89f   : > { %v3223_v48 = vadd.f32 %v4923_v53, %v6701_v36  ;;  %v3214_v47 = vpop.f32.mrb[29].mxu1 }
 0x8a0   : > { %v3215_v41 = vadd.f32 %v6701_v36, %v3214_v47  ;;  %v4924_v16 = vpop.f32.mrb[30].mxu1 }
 0x8a1   : > { %v3226_v2 = vadd.f32 %v4924_v16, %v6701_v36  ;;  %v3217_v45 = vpop.f32.mrb[31].mxu1  ;;  %v3259_v6 = vmax.f32 %v3223_v48, 0.0 }
 0x8a2   : > { %v3218_v4 = vadd.f32 %v6701_v36, %v3217_v45  ;;  %v3257_v10 = vmax.f32 %v3215_v41, 0.0 }
 0x8a3   : > { %v3260_v19 = vmax.f32 %v3226_v2, 0.0 }
 0x8a4   : > { %v3258_v52 = vmax.f32 %v3218_v4, 0.0 }
 0x8a5   : > { %v3276_v18 = vpack.c.bf16 %v3260_v19, %v3259_v6 }
 0x8a6   : > { %v3275_v54 = vpack.c.bf16 %v3258_v52, %v3257_v10 }
 0x8a8   : > { %4969 = vmatprep.mubr.bf16.mxu1 %v3275_v54 }
 0x8a9   : > { %4970 = vmatmul.mubr.bf16.gmra.mrb[60].mxu1 %v3276_v18 }
 0x90c   : > { %v4943_v21 = vpop.f32.mrb[32].mxu1 }
 0x90d   : > { %v6739_v28 = vadd.f32 %v4943_v21, %v6736_v27  ;;  %v3382_v20 = vpop.f32.mrb[33].mxu1 }
 0x90e   : > { %v6742_v22 = vadd.f32 %v6736_v27, %v3382_v20  ;;  %v4944_v23 = vpop.f32.mrb[34].mxu1 }
 0x90f   : > { %v3511_v36 = vmax.f32 %v6739_v28, 0.0  ;;  %v6746_v24 = vadd.f32 %v4944_v23, %v6736_v27  ;;  %v3385_v26 = vpop.f32.mrb[35].mxu1 }
 0x910   : > { %v3509_v56 = vmax.f32 %v6742_v22, 0.0  ;;  %v6750_v55 = vadd.f32 %v6736_v27, %v3385_v26 }
 0x911   : > { %v3512_v30 = vmax.f32 %v6746_v24, 0.0 }
 0x912   : > { %v7114_v8 = vmax.f32 %v6750_v55, 0.0 }
 0x91c   : > { %v4947_v11 = vpop.f32.mrb[36].mxu1 }
 0x91d   : > { %v6755_v32 = vadd.f32 %v4947_v11, %v6736_v27  ;;  %v3398_v33 = vpop.f32.mrb[37].mxu1 }
 0x91e   : > { %v6758_v38 = vadd.f32 %v6736_v27, %v3398_v33  ;;  %v4948_v34 = vpop.f32.mrb[38].mxu1 }
 0x91f   : > { %v3515_v29 = vmax.f32 %v6755_v32, 0.0  ;;  %v6762_v35 = vadd.f32 %v4948_v34, %v6736_v27  ;;  %v3401_v49 = vpop.f32.mrb[39].mxu1 }
 0x920   : > { %v3513_v39 = vmax.f32 %v6758_v38, 0.0  ;;  %v6766_v58 = vadd.f32 %v6736_v27, %v3401_v49 }
 0x921   : > { %v3516_v40 = vmax.f32 %v6762_v35, 0.0 }
 0x922   : > { %v3514_v57 = vmax.f32 %v6766_v58, 0.0 }
 0x92c   : > { %v4951_v44 = vpop.f32.mrb[40].mxu1 }
 0x92d   : > { %v6771_v46 = vadd.f32 %v4951_v44, %v6736_v27  ;;  %v3414_v59 = vpop.f32.mrb[41].mxu1 }
 0x92e   : > { %v6774_v12 = vadd.f32 %v6736_v27, %v3414_v59  ;;  %v4952_v50 = vpop.f32.mrb[42].mxu1 }
 0x92f   : > { %v3519_v62 = vmax.f32 %v6771_v46, 0.0  ;;  %v6778_v0 = vadd.f32 %v4952_v50, %v6736_v27  ;;  %v3417_v3 = vpop.f32.mrb[43].mxu1 }
 0x930   : > { %v3517_v60 = vmax.f32 %v6774_v12, 0.0  ;;  %v6782_v9 = vadd.f32 %v6736_v27, %v3417_v3 }
 0x931   : > { %v3520_v1 = vmax.f32 %v6778_v0, 0.0 }
 0x932   : > { %v3518_v7 = vmax.f32 %v6782_v9, 0.0 }
 0x93c   : > { %v4955_v17 = vpop.f32.mrb[44].mxu1 }
 0x93d   : > { %v6787_v13 = vadd.f32 %v4955_v17, %v6736_v27  ;;  %v3430_v37 = vpop.f32.mrb[45].mxu1 }
 0x93e   : > { %v6790_v15 = vadd.f32 %v6736_v27, %v3430_v37  ;;  %v4956_v63 = vpop.f32.mrb[46].mxu1 }
 0x93f   : > { %v6794_v42 = vadd.f32 %v4956_v63, %v6736_v27  ;;  %v3433_v5 = vpop.f32.mrb[47].mxu1 }
 0x940   : > { %v6798_v43 = vadd.f32 %v6736_v27, %v3433_v5 }
 0x94c   : > { %v4959_v61 = vpop.f32.mrb[48].mxu1 }
 0x94d   : > { %v6803_v53 = vadd.f32 %v4959_v61, %v6736_v27  ;;  %v3446_v48 = vpop.f32.mrb[49].mxu1 }
 0x94e   : > { %v6806_v47 = vadd.f32 %v6736_v27, %v3446_v48  ;;  %v4960_v41 = vpop.f32.mrb[50].mxu1 }
 0x94f   : > { %v3527_v16 = vmax.f32 %v6803_v53, 0.0  ;;  %v6810_v2 = vadd.f32 %v4960_v41, %v6736_v27  ;;  %v3449_v45 = vpop.f32.mrb[51].mxu1 }
 0x950   : > { %v3525_v4 = vmax.f32 %v6806_v47, 0.0  ;;  %v6814_v6 = vadd.f32 %v6736_v27, %v3449_v45  ;;  %v5359_v45 = vld [vmem:[#allocation15 + $0x8] sm:$0xff] (!%p4272_p4)  }
 0x951   : > { %v3528_v19 = vmax.f32 %v6810_v2, 0.0 }
 0x952   : > { %v3526_v10 = vmax.f32 %v6814_v6, 0.0 }
 0x95c   : > { %v4963_v52 = vpop.f32.mrb[52].mxu1 }
 0x95d   : > { %v6819_v18 = vadd.f32 %v4963_v52, %v6736_v27  ;;  %v3462_v54 = vpop.f32.mrb[53].mxu1 }
 0x95e   : > { %v6822_v21 = vadd.f32 %v6736_v27, %v3462_v54  ;;  %v4964_v20 = vpop.f32.mrb[54].mxu1 }
 0x95f   : > { %v7116_v23 = vmax.f32 %v6819_v18, 0.0  ;;  %v6826_v26 = vadd.f32 %v4964_v20, %v6736_v27  ;;  %v3465_v11 = vpop.f32.mrb[55].mxu1 }
 0x960   : > { %v3529_v33 = vmax.f32 %v6822_v21, 0.0  ;;  %v6830_v34 = vadd.f32 %v6736_v27, %v3465_v11 }
 0x961   : > { %v7115_v49 = vmax.f32 %v6826_v26, 0.0 }
 0x962   : > { %v7117_v44 = vmax.f32 %v6830_v34, 0.0 }
 0x96c   : > { %v4967_v59 = vpop.f32.mrb[56].mxu1 }
 0x96d   : > { %v6835_v50 = vadd.f32 %v4967_v59, %v6736_v27  ;;  %v3478_v3 = vpop.f32.mrb[57].mxu1 }
 0x96e   : > { %v6838_v17 = vadd.f32 %v6736_v27, %v3478_v3  ;;  %v4968_v37 = vpop.f32.mrb[58].mxu1 }
 0x96f   : > { %v7118_v63 = vmax.f32 %v6835_v50, 0.0  ;;  %v6842_v5 = vadd.f32 %v4968_v37, %v6736_v27  ;;  %v3481_v61 = vpop.f32.mrb[59].mxu1 }
 0x970   : > { %v7123_v48 = vmax.f32 %v6838_v17, 0.0  ;;  %v6846_v41 = vadd.f32 %v6736_v27, %v3481_v61 }
 0x972   : > { %v7122_v52 = vmax.f32 %v6846_v41, 0.0 }
 0x97c   : > { %v4971_v54 = vpop.f32.mrb[60].mxu1  ;;  %3544 = sbr.rel (%p4272_p4) target bundleno = 2705 (0xa91), region = 116 }
 0x97d   : > { %v6851_v20 = vadd.f32 %v4971_v54, %v6736_v27  ;;  %v3494_v11 = vpop.f32.mrb[61].mxu1 }
 0x97e   : > { %v6854_v59 = vadd.f32 %v6736_v27, %v3494_v11  ;;  %v4972_v3 = vpop.f32.mrb[62].mxu1  ;;  %v5358_v11 = vld [vmem:[#allocation15] sm:$0xff] (!%p4272_p4)  }
 0x97f   : > { %v7120_v37 = vmax.f32 %v6851_v20, 0.0  ;;  %v6858_v25 = vadd.f32 %v4972_v3, %v6736_v27  ;;  %v3497_v61 = vpop.f32.mrb[63].mxu1  ;;  %v3545_v3 = vpack.c.bf16 (!%p4272_p4), %v7114_v8, %v3509_v56  ;;  %4973 = vmatprep.subr.bf16.mxu0 (!%p4272_p4), %v5358_v11  ;;  %5053 = vmatprep.subr.bf16.mxu1 (!%p4272_p4), %v5358_v11  ;;  %v5362_v8 = vld [vmem:[#allocation15 + $0x20] sm:$0xff] (!%p4272_p4)  }
 0x980   : > { %v7121_v51 = vmax.f32 %v6854_v59, 0.0  ;;  %v6862_v14 = vadd.f32 %v6736_v27, %v3497_v61  ;;  %v3553_v27 = vpack.c.bf16 (!%p4272_p4), %v3526_v10, %v3525_v4  ;;  %4974 = vmatpush3.bf16.msra.mxu0 (!%p4272_p4), %v5358_v11  ;;  %5061 = vmatpush3.bf16.msra.mxu1 (!%p4272_p4), %v5358_v11  ;;  %v5360_v61 = vld [vmem:[#allocation15 + $0x10] sm:$0xff] (!%p4272_p4)   ;;  %v5363_v11 = vld [vmem:[#allocation15 + $0x28] sm:$0xff] (!%p4272_p4)  }
 0x981   : > { %4975 = vmatprep.subr.bf16.mxu0 (!%p4272_p4), %v5359_v45  ;;  %5054 = vmatprep.subr.bf16.mxu1 (!%p4272_p4), %v5359_v45 }
 0x982   : > { %v7119_v54 = vmax.f32 %v6862_v14, 0.0  ;;  %4989 = vmatprep.mubr.bf16.mxu0 (!%p4272_p4), %v3545_v3  ;;  %5005 = vmatprep.mubr.bf16.mxu1 (!%p4272_p4), %v3553_v27  ;;  %v5364_v3 = vld [vmem:[#allocation15 + $0x30] sm:$0xff] (!%p4272_p4)   ;;  %v3547_v27 = vpack.c.bf16 (!%p4272_p4), %v3514_v57, %v3513_v39 }
 0x984   : > { %4976 = vmatpush3.bf16.msra.mxu0 %v5359_v45  ;;  %5062 = vmatpush3.bf16.msra.mxu1 %v5359_v45  ;;  %v5365_v45 = vld [vmem:[#allocation15 + $0x38] sm:$0xff]  }
 0x985   : > { %4977 = vmatprep.subr.bf16.mxu0 %v5360_v61  ;;  %5055 = vmatprep.subr.bf16.mxu1 %v5360_v61 }
 0x988   : > { %4978 = vmatpush3.bf16.msra.mxu0 %v5360_v61  ;;  %5063 = vmatpush3.bf16.msra.mxu1 %v5360_v61  ;;  %v3555_v61 = vpack.c.bf16 %v7117_v44, %v3529_v33 }
 0x989   : > { %4979 = vmatprep.subr.bf16.mxu0 %v5361_v31  ;;  %5056 = vmatprep.subr.bf16.mxu1 %v5361_v31 }
 0x98c   : > { %4980 = vmatpush3.bf16.msra.mxu0 %v5361_v31  ;;  %5064 = vmatpush3.bf16.msra.mxu1 %v5361_v31  ;;  %v3546_v31 = vpack.c.bf16 %v3512_v30, %v3511_v36 }
 0x98d   : > { %4981 = vmatprep.subr.bf16.mxu0 %v5362_v8  ;;  %5057 = vmatprep.subr.bf16.mxu1 %v5362_v8 }
 0x990   : > { %4982 = vmatpush3.bf16.msra.mxu0 %v5362_v8  ;;  %5065 = vmatpush3.bf16.msra.mxu1 %v5362_v8  ;;  %v3554_v8 = vpack.c.bf16 %v3528_v19, %v3527_v16 }
 0x991   : > { %4983 = vmatprep.subr.bf16.mxu0 %v5363_v11  ;;  %5058 = vmatprep.subr.bf16.mxu1 %v5363_v11 }
 0x994   : > { %4984 = vmatpush3.bf16.msra.mxu0 %v5363_v11  ;;  %5066 = vmatpush3.bf16.msra.mxu1 %v5363_v11  ;;  %v3548_v11 = vpack.c.bf16 %v3516_v40, %v3515_v29 }
 0x995   : > { %4985 = vmatprep.subr.bf16.mxu0 %v5364_v3  ;;  %5059 = vmatprep.subr.bf16.mxu1 %v5364_v3 }
 0x998   : > { %4986 = vmatpush3.bf16.msra.mxu0 %v5364_v3  ;;  %5067 = vmatpush3.bf16.msra.mxu1 %v5364_v3  ;;  %v3556_v3 = vpack.c.bf16 %v7115_v49, %v7116_v23  ;;  %v7192_v49 = vmax.f32 %v6790_v15, 0.0  ;;  %v7193_v23 = vmax.f32 %v6798_v43, 0.0 }
 0x999   : > { %4987 = vmatprep.subr.bf16.mxu0 %v5365_v45  ;;  %5060 = vmatprep.subr.bf16.mxu1 %v5365_v45 }
 0x99a   : > { %v3551_v44 = vpack.c.bf16 %v7193_v23, %v7192_v49  ;;  %v6934_v23 = vld [vmem:[%s7197_s15] ss:$0 sm:$0xff] }
 0x99c   : > { %4988 = vmatpush3.bf16.msra.mxu0 %v5365_v45  ;;  %5068 = vmatpush3.bf16.msra.mxu1 %v5365_v45  ;;  %v3549_v45 = vpack.c.bf16 %v3518_v7, %v3517_v60 }
 0x99f   : > { %4990 = vmatmul.mubr.bf16.vlgmr.msra.gmra.mrb[0].mxu0 %v3546_v31  ;;  %5006 = vmatmul.mubr.bf16.vlgmr.msra.gmra.mrb[0].mxu1 %v3554_v8  ;;  %v3557_v31 = vpack.c.bf16 %v7122_v52, %v7123_v48  ;;  %v3550_v8 = vpack.c.bf16 %v3520_v1, %v3519_v62 }
 0x9a0   : > { %4993 = vmatprep.mubr.bf16.mxu0 %v3547_v27  ;;  %5009 = vmatprep.mubr.bf16.mxu1 %v3555_v61  ;;  %v7191_v27 = vmax.f32 %v6842_v5, 0.0 }
 0x9a2   : > { %v3558_v61 = vpack.c.bf16 %v7191_v27, %v7118_v63  ;;  %v7196_v27 = vmax.f32 %v6858_v25, 0.0 }
 0x9a4   : > { %v3560_v63 = vpack.c.bf16 %v7196_v27, %v7120_v37 }
 0x9a7   : > { %4994 = vmatmul.mubr.bf16.gmra.mrb[4].mxu0 %v3548_v11  ;;  %5010 = vmatmul.mubr.bf16.gmra.mrb[4].mxu1 %v3556_v3  ;;  %v3559_v11 = vpack.c.bf16 %v7119_v54, %v7121_v51  ;;  %v7194_v3 = vmax.f32 %v6787_v13, 0.0 }
 0x9a8   : > { %4997 = vmatprep.mubr.bf16.mxu0 %v3549_v45  ;;  %5013 = vmatprep.mubr.bf16.mxu1 %v3557_v31  ;;  %v7195_v45 = vmax.f32 %v6794_v42, 0.0 }
 0x9aa   : > { %v3552_v31 = vpack.c.bf16 %v7195_v45, %v7194_v3 }
 0x9af   : > { %4998 = vmatmul.mubr.bf16.gmra.mrb[8].mxu0 %v3550_v8  ;;  %5014 = vmatmul.mubr.bf16.gmra.mrb[8].mxu1 %v3558_v61 }
 0x9b0   : > { %5001 = vmatprep.mubr.bf16.mxu0 %v3551_v44  ;;  %5017 = vmatprep.mubr.bf16.mxu1 %v3559_v11 }
 0x9b7   : > { %5002 = vmatmul.mubr.bf16.gmra.mrb[12].mxu0 %v3552_v31  ;;  %5018 = vmatmul.mubr.bf16.gmra.mrb[12].mxu1 %v3560_v63 }
 0xa72   : > { %v4991_v49 = vpop.f32.mrb[0].mxu0  ;;  %v5007_v44 = vpop.f32.mrb[0].mxu1 }
 0xa73   : > { %v3675_v8 = vadd.f32 %v4991_v49, %v6934_v23  ;;  %v3739_v61 = vadd.f32 %v5007_v44, %v6934_v23  ;;  %v3666_v11 = vpop.f32.mrb[1].mxu0  ;;  %v3730_v3 = vpop.f32.mrb[1].mxu1 }
 0xa74   : > { %v3667_v45 = vadd.f32 %v6934_v23, %v3666_v11  ;;  %v3731_v54 = vadd.f32 %v6934_v23, %v3730_v3  ;;  %v4992_v27 = vpop.f32.mrb[2].mxu0  ;;  %v5008_v31 = vpop.f32.mrb[2].mxu1 }
 0xa75   : > { %3795 = vst [vmem:[#allocation17 + $0x10] sm:$0xff] %v3675_v8  ;;  %3811 = vst [vmem:[#allocation17 + $0x90] sm:$0xff] %v3739_v61  ;;  %v3678_v63 = vadd.f32 %v4992_v27, %v6934_v23  ;;  %v3742_v37 = vadd.f32 %v5008_v31, %v6934_v23  ;;  %v3669_v51 = vpop.f32.mrb[3].mxu0  ;;  %v3733_v52 = vpop.f32.mrb[3].mxu1 }
 0xa76   : > { %3793 = vst [vmem:[#allocation17] sm:$0xff] %v3667_v45  ;;  %3809 = vst [vmem:[#allocation17 + $0x80] sm:$0xff] %v3731_v54  ;;  %v3670_v49 = vadd.f32 %v6934_v23, %v3669_v51  ;;  %v3734_v44 = vadd.f32 %v6934_v23, %v3733_v52 }
 0xa77   : > { %3796 = vst [vmem:[#allocation17 + $0x18] sm:$0xff] %v3678_v63  ;;  %3812 = vst [vmem:[#allocation17 + $0x98] sm:$0xff] %v3742_v37 }
 0xa78   : > { %3794 = vst [vmem:[#allocation17 + $0x8] sm:$0xff] %v3670_v49  ;;  %3810 = vst [vmem:[#allocation17 + $0x88] sm:$0xff] %v3734_v44 }
 0xa7a   : > { %v4995_v11 = vpop.f32.mrb[4].mxu0  ;;  %v5011_v3 = vpop.f32.mrb[4].mxu1 }
 0xa7b   : > { %v3691_v8 = vadd.f32 %v4995_v11, %v6934_v23  ;;  %v3755_v61 = vadd.f32 %v5011_v3, %v6934_v23  ;;  %v3682_v27 = vpop.f32.mrb[5].mxu0  ;;  %v3746_v31 = vpop.f32.mrb[5].mxu1 }
 0xa7c   : > { %v3683_v48 = vadd.f32 %v6934_v23, %v3682_v27  ;;  %v3747_v54 = vadd.f32 %v6934_v23, %v3746_v31  ;;  %v4996_v45 = vpop.f32.mrb[6].mxu0  ;;  %v5012_v51 = vpop.f32.mrb[6].mxu1 }
 0xa7d   : > { %3799 = vst [vmem:[#allocation17 + $0x30] sm:$0xff] %v3691_v8  ;;  %3815 = vst [vmem:[#allocation17 + $0xb0] sm:$0xff] %v3755_v61  ;;  %v3694_v52 = vadd.f32 %v4996_v45, %v6934_v23  ;;  %v3758_v37 = vadd.f32 %v5012_v51, %v6934_v23  ;;  %v3685_v63 = vpop.f32.mrb[7].mxu0  ;;  %v3749_v49 = vpop.f32.mrb[7].mxu1 }
 0xa7e   : > { %3797 = vst [vmem:[#allocation17 + $0x20] sm:$0xff] %v3683_v48  ;;  %3813 = vst [vmem:[#allocation17 + $0xa0] sm:$0xff] %v3747_v54  ;;  %v3686_v44 = vadd.f32 %v6934_v23, %v3685_v63  ;;  %v3750_v11 = vadd.f32 %v6934_v23, %v3749_v49 }
 0xa7f   : > { %3800 = vst [vmem:[#allocation17 + $0x38] sm:$0xff] %v3694_v52  ;;  %3816 = vst [vmem:[#allocation17 + $0xb8] sm:$0xff] %v3758_v37 }
 0xa80   : > { %3798 = vst [vmem:[#allocation17 + $0x28] sm:$0xff] %v3686_v44  ;;  %3814 = vst [vmem:[#allocation17 + $0xa8] sm:$0xff] %v3750_v11 }
 0xa82   : > { %v4999_v3 = vpop.f32.mrb[8].mxu0  ;;  %v5015_v27 = vpop.f32.mrb[8].mxu1 }
 0xa83   : > { %v3707_v8 = vadd.f32 %v4999_v3, %v6934_v23  ;;  %v3771_v61 = vadd.f32 %v5015_v27, %v6934_v23  ;;  %v3698_v31 = vpop.f32.mrb[9].mxu0  ;;  %v3762_v45 = vpop.f32.mrb[9].mxu1 }
 0xa84   : > { %v3699_v51 = vadd.f32 %v6934_v23, %v3698_v31  ;;  %v3763_v48 = vadd.f32 %v6934_v23, %v3762_v45  ;;  %v5000_v54 = vpop.f32.mrb[10].mxu0  ;;  %v5016_v63 = vpop.f32.mrb[10].mxu1 }
 0xa85   : > { %3803 = vst [vmem:[#allocation17 + $0x50] sm:$0xff] %v3707_v8  ;;  %3819 = vst [vmem:[#allocation17 + $0xd0] sm:$0xff] %v3771_v61  ;;  %v3710_v52 = vadd.f32 %v5000_v54, %v6934_v23  ;;  %v3774_v37 = vadd.f32 %v5016_v63, %v6934_v23  ;;  %v3701_v49 = vpop.f32.mrb[11].mxu0  ;;  %v3765_v44 = vpop.f32.mrb[11].mxu1 }
 0xa86   : > { %3801 = vst [vmem:[#allocation17 + $0x40] sm:$0xff] %v3699_v51  ;;  %3817 = vst [vmem:[#allocation17 + $0xc0] sm:$0xff] %v3763_v48  ;;  %v3702_v11 = vadd.f32 %v6934_v23, %v3701_v49  ;;  %v3766_v3 = vadd.f32 %v6934_v23, %v3765_v44 }
 0xa87   : > { %3804 = vst [vmem:[#allocation17 + $0x58] sm:$0xff] %v3710_v52  ;;  %3820 = vst [vmem:[#allocation17 + $0xd8] sm:$0xff] %v3774_v37 }
 0xa88   : > { %3802 = vst [vmem:[#allocation17 + $0x48] sm:$0xff] %v3702_v11  ;;  %3818 = vst [vmem:[#allocation17 + $0xc8] sm:$0xff] %v3766_v3 }
 0xa8a   : > { %v5003_v27 = vpop.f32.mrb[12].mxu0  ;;  %v5019_v31 = vpop.f32.mrb[12].mxu1 }
 0xa8b   : > { %v3723_v8 = vadd.f32 %v5003_v27, %v6934_v23  ;;  %v3787_v61 = vadd.f32 %v5019_v31, %v6934_v23  ;;  %v3714_v45 = vpop.f32.mrb[13].mxu0  ;;  %v3778_v54 = vpop.f32.mrb[13].mxu1 }
 0xa8c   : > { %v3715_v63 = vadd.f32 %v6934_v23, %v3714_v45  ;;  %v3779_v51 = vadd.f32 %v6934_v23, %v3778_v54  ;;  %v5004_v48 = vpop.f32.mrb[14].mxu0  ;;  %v5020_v49 = vpop.f32.mrb[14].mxu1 }
 0xa8d   : > { %3807 = vst [vmem:[#allocation17 + $0x70] sm:$0xff] %v3723_v8  ;;  %3823 = vst [vmem:[#allocation17 + $0xf0] sm:$0xff] %v3787_v61  ;;  %v3726_v52 = vadd.f32 %v5004_v48, %v6934_v23  ;;  %v3790_v37 = vadd.f32 %v5020_v49, %v6934_v23  ;;  %v3717_v44 = vpop.f32.mrb[15].mxu0  ;;  %v3781_v11 = vpop.f32.mrb[15].mxu1 }
 0xa8e   : > { %3805 = vst [vmem:[#allocation17 + $0x60] sm:$0xff] %v3715_v63  ;;  %3821 = vst [vmem:[#allocation17 + $0xe0] sm:$0xff] %v3779_v51  ;;  %v3718_v3 = vadd.f32 %v6934_v23, %v3717_v44  ;;  %v3782_v27 = vadd.f32 %v6934_v23, %v3781_v11 }
 0xa8f   : > { %3808 = vst [vmem:[#allocation17 + $0x78] sm:$0xff] %v3726_v52  ;;  %3824 = vst [vmem:[#allocation17 + $0xf8] sm:$0xff] %v3790_v37 }
 0xa90   : > { %3806 = vst [vmem:[#allocation17 + $0x68] sm:$0xff] %v3718_v3  ;;  %3822 = vst [vmem:[#allocation17 + $0xe8] sm:$0xff] %v3782_v27 }
 0xa91 PF: > { %3828 = sbr.rel (%p2486_p6) target bundleno = 2717 (0xa9d), region = 120  ;;  %v7198_v31 = vmax.f32 (!%p2486_p6), %v6750_v55, 0.0  ;;  %v3830_v61 = vpack.c.bf16 (!%p2486_p6), %v3512_v30, %v3511_v36  ;;  %v3831_v23 = vpack.c.bf16 (!%p2486_p6), %v3514_v57, %v3513_v39  ;;  %v3832_v45 = vpack.c.bf16 (!%p2486_p6), %v3516_v40, %v3515_v29 }
 0xa92   : > { %v3833_v22 = vpack.c.bf16 (!%p2486_p6), %v3518_v7, %v3517_v60  ;;  %v3834_v28 = vpack.c.bf16 (!%p2486_p6), %v3520_v1, %v3519_v62  ;;  %v7199_v36 = vmax.f32 (!%p2486_p6), %v6790_v15, 0.0  ;;  %v7200_v24 = vmax.f32 (!%p2486_p6), %v6798_v43, 0.0 }
 0xa93   : > { %v3829_v8 = vpack.c.bf16 (!%p2486_p6), %v7198_v31, %v3509_v56  ;;  %v7201_v55 = vmax.f32 (!%p2486_p6), %v6787_v13, 0.0  ;;  %v7202_v30 = vmax.f32 (!%p2486_p6), %v6794_v42, 0.0  ;;  %3848 = vst [vmem:[#allocation2 + $0x8] sm:$0xff] (!%p2486_p6), %v3830_v61  ;;  %3849 = vst [vmem:[#allocation2 + $0x10] sm:$0xff] (!%p2486_p6), %v3831_v23  ;;  %v3837_v38 = vpack.c.bf16 (!%p2486_p6), %v3526_v10, %v3525_v4 }
 0xa94   : > { %v3835_v56 = vpack.c.bf16 (!%p2486_p6), %v7200_v24, %v7199_v36  ;;  %3850 = vst [vmem:[#allocation2 + $0x18] sm:$0xff] (!%p2486_p6), %v3832_v45  ;;  %v3838_v29 = vpack.c.bf16 (!%p2486_p6), %v3528_v19, %v3527_v16  ;;  %v7203_v35 = vmax.f32 (!%p2486_p6), %v6830_v34, 0.0  ;;  %v7204_v58 = vmax.f32 (!%p2486_p6), %v6819_v18, 0.0  ;;  %3851 = vst [vmem:[#allocation2 + $0x20] sm:$0xff] (!%p2486_p6), %v3833_v22 }
 0xa95   : > { %v3836_v32 = vpack.c.bf16 (!%p2486_p6), %v7202_v30, %v7201_v55  ;;  %3847 = vst [vmem:[#allocation2] sm:$0xff] (!%p2486_p6), %v3829_v8  ;;  %v7205_v40 = vmax.f32 (!%p2486_p6), %v6826_v26, 0.0  ;;  %3852 = vst [vmem:[#allocation2 + $0x28] sm:$0xff] (!%p2486_p6), %v3834_v28  ;;  %v7206_v46 = vmax.f32 (!%p2486_p6), %v6838_v17, 0.0  ;;  %v7207_v12 = vmax.f32 (!%p2486_p6), %v6846_v41, 0.0 }
 0xa96   : > { %v3839_v39 = vpack.c.bf16 (!%p2486_p6), %v7203_v35, %v3529_v33  ;;  %3853 = vst [vmem:[#allocation2 + $0x30] sm:$0xff] (!%p2486_p6), %v3835_v56  ;;  %v7208_v0 = vmax.f32 (!%p2486_p6), %v6835_v50, 0.0  ;;  %v7209_v60 = vmax.f32 (!%p2486_p6), %v6842_v5, 0.0  ;;  %v7210_v1 = vmax.f32 (!%p2486_p6), %v6854_v59, 0.0  ;;  %3855 = vst [vmem:[#allocation2 + $0x40] sm:$0xff] (!%p2486_p6), %v3837_v38 }
 0xa97   : > { %v3840_v57 = vpack.c.bf16 (!%p2486_p6), %v7205_v40, %v7204_v58  ;;  %3854 = vst [vmem:[#allocation2 + $0x38] sm:$0xff] (!%p2486_p6), %v3836_v32  ;;  %v3841_v62 = vpack.c.bf16 (!%p2486_p6), %v7207_v12, %v7206_v46  ;;  %v7211_v7 = vmax.f32 (!%p2486_p6), %v6862_v14, 0.0  ;;  %v7212_v15 = vmax.f32 (!%p2486_p6), %v6851_v20, 0.0  ;;  %3856 = vst [vmem:[#allocation2 + $0x48] sm:$0xff] (!%p2486_p6), %v3838_v29 }
 0xa98   : > { %v3842_v9 = vpack.c.bf16 %v7209_v60, %v7208_v0  ;;  %v7213_v42 = vmax.f32 %v6858_v25, 0.0  ;;  %3857 = vst [vmem:[#allocation2 + $0x50] sm:$0xff] %v3839_v39 }
 0xa99   : > { %v3843_v13 = vpack.c.bf16 %v7211_v7, %v7210_v1  ;;  %3858 = vst [vmem:[#allocation2 + $0x58] sm:$0xff] %v3840_v57  ;;  %3859 = vst [vmem:[#allocation2 + $0x60] sm:$0xff] %v3841_v62 }
 0xa9a   : > { %v3844_v43 = vpack.c.bf16 %v7213_v42, %v7212_v15  ;;  %3860 = vst [vmem:[#allocation2 + $0x68] sm:$0xff] %v3842_v9 }
 0xa9b   : > { %3861 = vst [vmem:[#allocation2 + $0x70] sm:$0xff] %v3843_v13 }
 0xa9c   : > { %3862 = vst [vmem:[#allocation2 + $0x78] sm:$0xff] %v3844_v43 }
 0xa9d PF: > { %p5135_p8 = scmp.eq.s32.totalorder %s5756_s23, 2  ;;  %s5664_s20 = smov [#allocation17]  }
 0xa9e   : > { %s3879_s5 = sshll.u32 %s5664_s20, 4  ;;  %s3880_s5 = int_to_ptr.vmem [resolvable:$true] %s3879_s5 }
 0xa9f   : > { %s5551_s10 = scalar_lea.vmem %s3880_s5, 4096  ;;  %s5557_s17 = scalar_lea.vmem %s3880_s5, 8192 }
 0xaa0   : > { %p5552_p7 = scmp.ne.s32.totalorder %s3880_s5, %s5551_s10  ;;  %p5558_p11 = scmp.lt.s32.totalorder %s3880_s5, %s3880_s5 }
 0xaa1   : > { %p5559_p1 = scmp.lt.s32.totalorder %s5557_s17, %s5551_s10 }
 0xaa2   : > { %p5553_p5 = pnand %p5552_p7, %p5135_p8 }
 0xaa3   : > { %p5560_p12 = por %p5559_p1, %p5558_p11 }
 0xaa4   : > { %p5554_p10 = pneg %p5553_p5 }
 0xaa6   : > { %p5561_p0 = pnand %p5560_p12, %p5554_p10 }
 0xaa8   : > { %5564 = shalt.err (!%p5561_p0)
}
 0xaa9   : > { %s7214_s16 = sld [smem:[#allocation35_spill]] }
 0xaaf   : > { %s5565_s12 = scalar_lea.hbm %s7214_s16, 4096 }
 0xab0   : > { %p5566_p9 = scmp.ne.s32.totalorder %s7214_s16, %s5565_s12  ;;  %p5571_p3 = scmp.lt.u32.totalorder %s5565_s12, %s7214_s16 }
 0xab2   : > { %p5567_p2 = pnand %p5566_p9, %p5135_p8 }
 0xab4   : > { %p5568_p6 = pneg %p5567_p2 }
 0xab6   : > { %p5573_p13 = pnand %p5571_p3, %p5568_p6 }
 0xab8   : > { %5576 = shalt.err (!%p5573_p13)
}
 0xab9   : > { %s5665_s26 = smov 128   ;;  %s5666_s11 = smov 8  }
 0xaba   : > { %5094 = dma.vmem_to_hbm [thread:$0]  (%p5135_p8), %s3880_s5, 4096, %s7214_s16, [#allocation6], %s5665_s26, %s5665_s26, %s5666_s11  }
 0xabb PF: > { %p5136_p4 = scmp.ge.s32.totalorder %s5651_s22, 2  ;;  %s7215_s25 = sadd.s32 4294967294, %s5651_s22  }
 0xabc   : > { %p5137_p7 = scmp.eq.s32.totalorder %s7215_s25, 2 }
 0xabe   : > { %p5121_p5 = pnand %p5137_p7, %p5136_p4 }
 0xac0   : > { %5626 = dma.done.wait (!%p5121_p5), [#allocation6], 4096  }
 0xac1   : > { %5628 = vsyncadd (!%p5121_p5), [#allocation6], 4294963200  ;;  %s35_s22 = sadd.s32 1, %s5651_s22   ;;  %s7216_s13 = sld [smem:[#allocation25_spill]] }
 0xac2   : > { %p32_p10 = scmp.ge.s32.totalorder %s35_s22, 5   ;;  %s7217_s19 = sld [smem:[#allocation28_spill]] }
 0xac3   : > { %s7218_s20 = sld [smem:[#allocation26_spill]]  ;;  %s7219_s21 = sld [smem:[#allocation27_spill]] }
 0xac4   : > { %s7220_s17 = smov %s5635_s18  ;;  %34 = sbr.rel (!%p32_p10) target bundleno = 20 (0x14), region = 198 }
 0xac7   : > { %s7221_s18 = smov %s7216_s13 }
 0xacb   :  { %3900 = vsyncpa [#allocation5], 1 }
 0xacc   :  { %3902 = vsyncpa [#allocation5 + $0x1], 1 }
 0xacd   :  { %3903 = vsyncpa [#allocation10], 1 }
 0xace   :  { %3905 = vsyncpa [#allocation10 + $0x1], 1 }
 0xacf   :  { %3906 = vsyncpa [#allocation13], 1 }
 0xad0   :  { %3908 = vsyncpa [#allocation13 + $0x1], 1 }
 0xad1   :  { %3909 = vsyncpa [#allocation16], 1 }
 0xad2   :  { %3910 = vsyncpa [#allocation6], 1 }
 0xad3   :  { %3912 = vsyncpa [#allocation6 + $0x1], 1 }
 0xad4   :  { %3913 = vsyncpa [#allocation7], 1 }
 0xad5   :  { %3915 = vsyncpa [#allocation7 + $0x1], 1 }

</bundles_post_ra>
